<compile_context>
chip_gen: v7x
topology: tpu7x:2x2x1
jax: 0.10.0
libtpu: 0.0.40
codegen_flags: <defaults>
</compile_context>

<pallas_src>
import functools

import jax
import jax.numpy as jnp
from jax.experimental import pallas as pl
from jax.experimental.pallas import tpu as pltpu


# ----------------------------- Pallas kernels -------------------------------


def _k_conv(p_ref, w_ref, o_ref):
    # plain conv: patches @ weights (bf16 x bf16 -> f32 accumulate)
    o_ref[...] = jnp.dot(p_ref[...], w_ref[...],
                         preferred_element_type=jnp.float32).astype(o_ref.dtype)


def _k_conv_bn(p_ref, w_ref, s_ref, b_ref, o_ref):
    # conv, then fused (next layer's) BN scale/shift + ReLU on the f32 acc
    acc = jnp.dot(p_ref[...], w_ref[...], preferred_element_type=jnp.float32)
    o_ref[...] = jnp.maximum(acc * s_ref[...] + b_ref[...], 0.0).astype(o_ref.dtype)


def _k_conv_res_bn(p_ref, w_ref, r_ref, s_ref, b_ref, o_ref):
    # conv + residual add, then fused BN + ReLU
    acc = jnp.dot(p_ref[...], w_ref[...], preferred_element_type=jnp.float32)
    acc = acc + r_ref[...]
    o_ref[...] = jnp.maximum(acc * s_ref[...] + b_ref[...], 0.0).astype(o_ref.dtype)


def _k_conv_dual(p_ref, w_ref, s_ref, b_ref, act_ref, raw_ref):
    # One matmul whose output columns are [main | aux]:
    #   act = relu(bn(main))  (bf16, feeds the next conv)
    #   raw = aux             (f32, kept for a later residual add)
    # When the two column groups coincide (na == acc width) the same
    # accumulator is emitted twice (raw conv output + its activation).
    acc = jnp.dot(p_ref[...], w_ref[...], preferred_element_type=jnp.float32)
    na = act_ref.shape[-1]
    nr = raw_ref.shape[-1]
    act_ref[...] = jnp.maximum(acc[:, :na] * s_ref[...] + b_ref[...],
                               0.0).astype(act_ref.dtype)
    raw_ref[...] = acc[:, acc.shape[-1] - nr:].astype(raw_ref.dtype)


# --------------------------- pallas_call plumbing ---------------------------


def _row_tiles(m):
    """Largest comfortable M tile; >=2 tiles when M > 256 so the 'parallel'
    grid axis can feed both v7x TensorCores (no effect on v5e/v6e)."""
    if m > 256:
        tm = 256
    else:
        tm = max(8, ((m + 7) // 8) * 8)
    m_pad = tm * pl.cdiv(m, tm)
    return tm, m_pad


def _pad_rows(a, m_pad):
    m = a.shape[0]
    return a if m == m_pad else jnp.pad(a, ((0, m_pad - m), (0, 0)))


def _conv_matmul(kernel, inputs, out_cols_dtypes):
    """Run `kernel` with a 1-D parallel grid over the M (row) axis.

    inputs          : ordered list of (2-D array, tiled_over_rows: bool);
                      tiled arrays are blocked (tm, cols), the rest (weights,
                      BN scale/shift) are passed whole to every grid step.
    out_cols_dtypes : list of (ncols, dtype); outputs are (M, ncols).
    """
    m = next(a.shape[0] for a, tiled in inputs if tiled)
    tm, m_pad = _row_tiles(m)
    grid = (m_pad // tm,)

    args, in_specs = [], []
    for a, tiled in inputs:
        if tiled:
            args.append(_pad_rows(a, m_pad))
            in_specs.append(pl.BlockSpec((tm, a.shape[1]), lambda i: (i, 0)))
        else:
            args.append(a)
            in_specs.append(pl.BlockSpec(a.shape, lambda i: (0, 0)))

    out_shape = tuple(jax.ShapeDtypeStruct((m_pad, nc), dt)
                      for nc, dt in out_cols_dtypes)
    out_specs = tuple(pl.BlockSpec((tm, nc), lambda i: (i, 0))
                      for nc, _ in out_cols_dtypes)

    outs = pl.pallas_call(
        kernel,
        out_shape=out_shape,
        grid=grid,
        in_specs=in_specs,
        out_specs=out_specs,
        compiler_params=pltpu.CompilerParams(
            dimension_semantics=("parallel",)),
    )(*args)
    return tuple(o[:m] for o in outs)


# ------------------------------- JAX glue -----------------------------------


def _im2col(x, kh, kw, stride, pad):
    """x: (N,H,W,C) -> patches (N*Ho*Wo, kh*kw*C) and output spatial dims."""
    n, h, w, c = x.shape
    ho = (h + 2 * pad - kh) // stride + 1
    wo = (w + 2 * pad - kw) // stride + 1
    xp = jnp.pad(x, ((0, 0), (pad, pad), (pad, pad), (0, 0)))
    cols = []
    for i in range(kh):
        for j in range(kw):
            cols.append(xp[:, i:i + (ho - 1) * stride + 1:stride,
                           j:j + (wo - 1) * stride + 1:stride, :])
    patches = jnp.concatenate(cols, axis=-1).reshape(n * ho * wo, kh * kw * c)
    return patches, (n, ho, wo)


def _fold_bn(bn, eps=1e-5):
    gamma, beta, mean, var = bn
    scale = gamma / jnp.sqrt(var + eps)
    shift = beta - mean * scale
    c = scale.shape[0]
    return (scale.reshape(1, c).astype(jnp.float32),
            shift.reshape(1, c).astype(jnp.float32))


def resnet_stem_forward(x_nchw, params):
    f32, bf16 = jnp.float32, jnp.bfloat16
    x = jnp.transpose(x_nchw, (0, 2, 3, 1)).astype(bf16)        # -> NHWC bf16
    n = x.shape[0]

    # ---- stem conv (3->64) fused with layer1.bn1 + ReLU ---------------------
    p, (_, ho, wo) = _im2col(x, 3, 3, 1, 1)                     # (512, 27)
    w = params["conv1"].reshape(27, 64).astype(bf16)
    s, b = _fold_bn(params["l1_bn1"])
    a2d, h0_2d = _conv_matmul(
        _k_conv_dual,
        [(p, True), (w, False), (s, False), (b, False)],
        [(64, bf16), (64, f32)])
    # a2d = relu(bn1(h0)) (bf16) ; h0_2d = raw conv output (f32, residual)

    # ---- layer1 conv1 (64->64) fused with layer1.bn2 + ReLU -----------------
    a = a2d.reshape(n, ho, wo, 64)
    p, _ = _im2col(a, 3, 3, 1, 1)                               # (512, 576)
    w = params["l1_conv1"].reshape(576, 64).astype(bf16)
    s, b = _fold_bn(params["l1_bn2"])
    (c2d,) = _conv_matmul(
        _k_conv_bn,
        [(p, True), (w, False), (s, False), (b, False)],
        [(64, bf16)])

    # ---- layer1 conv2 (64->64) + residual h0, fused with layer2.bn1 + ReLU --
    c = c2d.reshape(n, ho, wo, 64)
    p, _ = _im2col(c, 3, 3, 1, 1)
    w = params["l1_conv2"].reshape(576, 64).astype(bf16)
    s, b = _fold_bn(params["l2_bn1"])
    (a2_2d,) = _conv_matmul(
        _k_conv_res_bn,
        [(p, True), (w, False), (h0_2d, True), (s, False), (b, False)],
        [(64, bf16)])

    # ---- layer2: 3x3 stride-2 conv1 and 1x1 stride-2 shortcut as ONE matmul -
    # The 1x1 stride-2 pad-0 shortcut samples exactly the centre tap of the
    # 3x3 stride-2 pad-1 conv, so its weight is embedded at rows [4*64, 5*64).
    a2 = a2_2d.reshape(n, ho, wo, 64)
    p, (_, ho2, wo2) = _im2col(a2, 3, 3, 2, 1)                  # (128, 576)
    w_main = params["l2_conv1"].reshape(576, 128)
    w_sc = jnp.zeros((576, 128), f32).at[4 * 64:5 * 64, :].set(
        params["l2_short"].reshape(64, 128))
    w_cat = jnp.concatenate([w_main, w_sc], axis=1).astype(bf16)  # (576, 256)
    s, b = _fold_bn(params["l2_bn2"])
    c2_2d, sc_2d = _conv_matmul(
        _k_conv_dual,
        [(p, True), (w_cat, False), (s, False), (b, False)],
        [(128, bf16), (128, f32)])
    # c2_2d = relu(bn2(conv1(a2))) ; sc_2d = shortcut(a2) raw (f32 residual)

    # ---- layer2 conv2 (128->128) + residual sc, fused with head bn + ReLU ---
    c2 = c2_2d.reshape(n, ho2, wo2, 128)
    p, _ = _im2col(c2, 3, 3, 1, 1)                              # (128, 1152)
    w = params["l2_conv2"].reshape(1152, 128).astype(bf16)
    s, b = _fold_bn(params["bn"])
    (e2d,) = _conv_matmul(
        _k_conv_res_bn,
        [(p, True), (w, False), (sc_2d, True), (s, False), (b, False)],
        [(128, bf16)])

    # ---- head conv (128 -> d_model), output channels padded to 128 lanes ----
    e = e2d.reshape(n, ho2, wo2, 128)
    p, (_, ho3, wo3) = _im2col(e, 3, 3, 2, 1)                   # (32, 1152)
    w4 = params["conv2"]
    d_model = w4.shape[-1]
    c_pad = max(128, ((d_model + 127) // 128) * 128)
    w_p = jnp.zeros((1152, c_pad), f32).at[:, :d_model].set(
        w4.reshape(1152, d_model)).astype(bf16)
    (out2d,) = _conv_matmul(
        _k_conv,
        [(p, True), (w_p, False)],
        [(c_pad, f32)])
    out = out2d[:, :d_model].reshape(n, ho3, wo3, d_model)

    return jnp.transpose(out, (0, 3, 1, 2)).astype(f32)         # back to NCHW


# --------------------------- deterministic params ---------------------------


def make_params(key, d_model):
    ks = iter(jax.random.split(key, 32))

    def conv_w(kh, kw, cin, cout):
        return 0.05 * jax.random.normal(next(ks), (kh, kw, cin, cout),
                                        dtype=jnp.float32)

    def bn_p(c):
        gamma = jax.random.uniform(next(ks), (c,), minval=0.8, maxval=1.2)
        beta = 0.1 * jax.random.normal(next(ks), (c,))
        mean = 0.1 * jax.random.normal(next(ks), (c,))
        var = jax.random.uniform(next(ks), (c,), minval=0.5, maxval=1.5)
        return (gamma.astype(jnp.float32), beta.astype(jnp.float32),
                mean.astype(jnp.float32), var.astype(jnp.float32))

    return {
        "conv1": conv_w(3, 3, 3, 64),
        "l1_bn1": bn_p(64),
        "l1_conv1": conv_w(3, 3, 64, 64),
        "l1_bn2": bn_p(64),
        "l1_conv2": conv_w(3, 3, 64, 64),
        "l2_bn1": bn_p(64),
        "l2_short": conv_w(1, 1, 64, 128),
        "l2_conv1": conv_w(3, 3, 64, 128),
        "l2_bn2": bn_p(128),
        "l2_conv2": conv_w(3, 3, 128, 128),
        "bn": bn_p(128),
        "conv2": conv_w(3, 3, 128, d_model),
    }


# ----------------------------------- main -----------------------------------


if __name__ == "__main__":
    d_model = 32
    key = jax.random.PRNGKey(0)
    k_x, k_p = jax.random.split(key)

    x = jax.random.normal(k_x, (2, 3, 16, 16), dtype=jnp.float32)  # NCHW input
    params = make_params(k_p, d_model)

    fwd = jax.jit(functools.partial(resnet_stem_forward, params=params))
    out = fwd(x)
    out = jax.block_until_ready(out)

    assert out.shape == (2, d_model, 4, 4), out.shape
    assert jnp.all(jnp.isfinite(out))
    print("KERNEL_OK")
</pallas_src>

<mosaic_0001>
module attributes {stable_mosaic.version = 11 : i64} {
  func.func @_k_conv_dual(%arg0: i32, %arg1: memref<256x27xbf16, #tpu.memory_space<vmem>>, %arg2: memref<27x64xbf16, #tpu.memory_space<vmem>>, %arg3: memref<1x64xf32, #tpu.memory_space<vmem>>, %arg4: memref<1x64xf32, #tpu.memory_space<vmem>>, %arg5: memref<256x64xbf16, #tpu.memory_space<vmem>>, %arg6: memref<256x64xf32, #tpu.memory_space<vmem>>) attributes {dimension_semantics = [#tpu.dimension_semantics<parallel>], iteration_bounds = array<i64: 2>, scalar_prefetch = 0 : i64, scratch_operands = 0 : i64, tpu.core_type = #tpu.core_type<tc>, window_params = [{transform_indices = @transform_0, window_bounds = array<i64: 256, 27>}, {pipeline_mode = #tpu.pipeline_mode<synchronous>, transform_indices = @transform_1, window_bounds = array<i64: 27, 64>}, {pipeline_mode = #tpu.pipeline_mode<synchronous>, transform_indices = @transform_2, window_bounds = array<i64: 1, 64>}, {pipeline_mode = #tpu.pipeline_mode<synchronous>, transform_indices = @transform_3, window_bounds = array<i64: 1, 64>}, {transform_indices = @transform_4, window_bounds = array<i64: 256, 64>}, {transform_indices = @transform_5, window_bounds = array<i64: 256, 64>}]} {
    %c0 = arith.constant 0 : index
    %c0_0 = arith.constant 0 : index
    %0 = vector.load %arg1[%c0, %c0_0] : memref<256x27xbf16, #tpu.memory_space<vmem>>, vector<256x27xbf16>
    %c0_1 = arith.constant 0 : index
    %c0_2 = arith.constant 0 : index
    %1 = vector.load %arg2[%c0_1, %c0_2] : memref<27x64xbf16, #tpu.memory_space<vmem>>, vector<27x64xbf16>
    %cst = arith.constant dense<0.000000e+00> : vector<256x64xf32>
    %2 = tpu.matmul %0, %1, %cst {dimension_numbers = #tpu.dot_dimension_numbers<[1], [0], [0], [1], [0, 0, 1, 1], [], []>} : vector<256x27xbf16>, vector<27x64xbf16>, vector<256x64xf32> -> vector<256x64xf32>
    %c0_3 = arith.constant 0 : index
    %c0_4 = arith.constant 0 : index
    %3 = vector.load %arg3[%c0_3, %c0_4] : memref<1x64xf32, #tpu.memory_space<vmem>>, vector<1x64xf32>
    %4 = vector.broadcast %3 : vector<1x64xf32> to vector<256x64xf32>
    %5 = arith.mulf %2, %4 : vector<256x64xf32>
    %c0_5 = arith.constant 0 : index
    %c0_6 = arith.constant 0 : index
    %6 = vector.load %arg4[%c0_5, %c0_6] : memref<1x64xf32, #tpu.memory_space<vmem>>, vector<1x64xf32>
    %7 = vector.broadcast %6 : vector<1x64xf32> to vector<256x64xf32>
    %8 = arith.addf %5, %7 : vector<256x64xf32>
    %cst_7 = arith.constant 0.000000e+00 : f32
    %9 = vector.broadcast %cst_7 : f32 to vector<256x64xf32>
    %10 = arith.maximumf %8, %9 : vector<256x64xf32>
    %11 = arith.truncf %10 : vector<256x64xf32> to vector<256x64xbf16>
    %c0_8 = arith.constant 0 : index
    %c0_9 = arith.constant 0 : index
    %12 = vector.load %arg5[%c0_8, %c0_9] : memref<256x64xbf16, #tpu.memory_space<vmem>>, vector<256x64xbf16>
    tpu.vector_store %arg5[%c0_8, %c0_9], %11 {strides = array<i32>} : memref<256x64xbf16, #tpu.memory_space<vmem>>, vector<256x64xbf16>,
    %c0_10 = arith.constant 0 : index
    %c0_11 = arith.constant 0 : index
    %13 = vector.load %arg6[%c0_10, %c0_11] : memref<256x64xf32, #tpu.memory_space<vmem>>, vector<256x64xf32>
    tpu.vector_store %arg6[%c0_10, %c0_11], %2 {strides = array<i32>} : memref<256x64xf32, #tpu.memory_space<vmem>>, vector<256x64xf32>,
    return
  }
  func.func @transform_0(%arg0: i32) -> (i32, i32) {
    %c0_i32 = arith.constant 0 : i32
    %c0_i32_0 = arith.constant 0 : i32
    return %arg0, %c0_i32 : i32, i32
  }
  func.func @transform_1(%arg0: i32) -> (i32, i32) {
    %c0_i32 = arith.constant 0 : i32
    %c0_i32_0 = arith.constant 0 : i32
    %c0_i32_1 = arith.constant 0 : i32
    return %c0_i32, %c0_i32_0 : i32, i32
  }
  func.func @transform_2(%arg0: i32) -> (i32, i32) {
    %c0_i32 = arith.constant 0 : i32
    %c0_i32_0 = arith.constant 0 : i32
    %c0_i32_1 = arith.constant 0 : i32
    return %c0_i32, %c0_i32_0 : i32, i32
  }
  func.func @transform_3(%arg0: i32) -> (i32, i32) {
    %c0_i32 = arith.constant 0 : i32
    %c0_i32_0 = arith.constant 0 : i32
    %c0_i32_1 = arith.constant 0 : i32
    return %c0_i32, %c0_i32_0 : i32, i32
  }
  func.func @transform_4(%arg0: i32) -> (i32, i32) {
    %c0_i32 = arith.constant 0 : i32
    %c0_i32_0 = arith.constant 0 : i32
    return %arg0, %c0_i32 : i32, i32
  }
  func.func @transform_5(%arg0: i32) -> (i32, i32) {
    %c0_i32 = arith.constant 0 : i32
    %c0_i32_0 = arith.constant 0 : i32
    return %arg0, %c0_i32 : i32, i32
  }
}

module attributes {stable_mosaic.version = 11 : i64} {
  func.func @_k_conv_bn(%arg0: i32, %arg1: memref<256x576xbf16, #tpu.memory_space<vmem>>, %arg2: memref<576x64xbf16, #tpu.memory_space<vmem>>, %arg3: memref<1x64xf32, #tpu.memory_space<vmem>>, %arg4: memref<1x64xf32, #tpu.memory_space<vmem>>, %arg5: memref<256x64xbf16, #tpu.memory_space<vmem>>) attributes {dimension_semantics = [#tpu.dimension_semantics<parallel>], iteration_bounds = array<i64: 2>, scalar_prefetch = 0 : i64, scratch_operands = 0 : i64, tpu.core_type = #tpu.core_type<tc>, window_params = [{transform_indices = @transform_0, window_bounds = array<i64: 256, 576>}, {pipeline_mode = #tpu.pipeline_mode<synchronous>, transform_indices = @transform_1, window_bounds = array<i64: 576, 64>}, {pipeline_mode = #tpu.pipeline_mode<synchronous>, transform_indices = @transform_2, window_bounds = array<i64: 1, 64>}, {pipeline_mode = #tpu.pipeline_mode<synchronous>, transform_indices = @transform_3, window_bounds = array<i64: 1, 64>}, {transform_indices = @transform_4, window_bounds = array<i64: 256, 64>}]} {
    %c0 = arith.constant 0 : index
    %c0_0 = arith.constant 0 : index
    %0 = vector.load %arg1[%c0, %c0_0] : memref<256x576xbf16, #tpu.memory_space<vmem>>, vector<256x576xbf16>
    %c0_1 = arith.constant 0 : index
    %c0_2 = arith.constant 0 : index
    %1 = vector.load %arg2[%c0_1, %c0_2] : memref<576x64xbf16, #tpu.memory_space<vmem>>, vector<576x64xbf16>
    %cst = arith.constant dense<0.000000e+00> : vector<256x64xf32>
    %2 = tpu.matmul %0, %1, %cst {dimension_numbers = #tpu.dot_dimension_numbers<[1], [0], [0], [1], [0, 0, 1, 1], [], []>} : vector<256x576xbf16>, vector<576x64xbf16>, vector<256x64xf32> -> vector<256x64xf32>
    %c0_3 = arith.constant 0 : index
    %c0_4 = arith.constant 0 : index
    %3 = vector.load %arg3[%c0_3, %c0_4] : memref<1x64xf32, #tpu.memory_space<vmem>>, vector<1x64xf32>
    %4 = vector.broadcast %3 : vector<1x64xf32> to vector<256x64xf32>
    %5 = arith.mulf %2, %4 : vector<256x64xf32>
    %c0_5 = arith.constant 0 : index
    %c0_6 = arith.constant 0 : index
    %6 = vector.load %arg4[%c0_5, %c0_6] : memref<1x64xf32, #tpu.memory_space<vmem>>, vector<1x64xf32>
    %7 = vector.broadcast %6 : vector<1x64xf32> to vector<256x64xf32>
    %8 = arith.addf %5, %7 : vector<256x64xf32>
    %cst_7 = arith.constant 0.000000e+00 : f32
    %9 = vector.broadcast %cst_7 : f32 to vector<256x64xf32>
    %10 = arith.maximumf %8, %9 : vector<256x64xf32>
    %11 = arith.truncf %10 : vector<256x64xf32> to vector<256x64xbf16>
    %c0_8 = arith.constant 0 : index
    %c0_9 = arith.constant 0 : index
    %12 = vector.load %arg5[%c0_8, %c0_9] : memref<256x64xbf16, #tpu.memory_space<vmem>>, vector<256x64xbf16>
    tpu.vector_store %arg5[%c0_8, %c0_9], %11 {strides = array<i32>} : memref<256x64xbf16, #tpu.memory_space<vmem>>, vector<256x64xbf16>,
    return
  }
  func.func @transform_0(%arg0: i32) -> (i32, i32) {
    %c0_i32 = arith.constant 0 : i32
    %c0_i32_0 = arith.constant 0 : i32
    return %arg0, %c0_i32 : i32, i32
  }
  func.func @transform_1(%arg0: i32) -> (i32, i32) {
    %c0_i32 = arith.constant 0 : i32
    %c0_i32_0 = arith.constant 0 : i32
    %c0_i32_1 = arith.constant 0 : i32
    return %c0_i32, %c0_i32_0 : i32, i32
  }
  func.func @transform_2(%arg0: i32) -> (i32, i32) {
    %c0_i32 = arith.constant 0 : i32
    %c0_i32_0 = arith.constant 0 : i32
    %c0_i32_1 = arith.constant 0 : i32
    return %c0_i32, %c0_i32_0 : i32, i32
  }
  func.func @transform_3(%arg0: i32) -> (i32, i32) {
    %c0_i32 = arith.constant 0 : i32
    %c0_i32_0 = arith.constant 0 : i32
    %c0_i32_1 = arith.constant 0 : i32
    return %c0_i32, %c0_i32_0 : i32, i32
  }
  func.func @transform_4(%arg0: i32) -> (i32, i32) {
    %c0_i32 = arith.constant 0 : i32
    %c0_i32_0 = arith.constant 0 : i32
    return %arg0, %c0_i32 : i32, i32
  }
}

module attributes {stable_mosaic.version = 11 : i64} {
  func.func @_k_conv_res_bn(%arg0: i32, %arg1: memref<256x576xbf16, #tpu.memory_space<vmem>>, %arg2: memref<576x64xbf16, #tpu.memory_space<vmem>>, %arg3: memref<256x64xf32, #tpu.memory_space<vmem>>, %arg4: memref<1x64xf32, #tpu.memory_space<vmem>>, %arg5: memref<1x64xf32, #tpu.memory_space<vmem>>, %arg6: memref<256x64xbf16, #tpu.memory_space<vmem>>) attributes {dimension_semantics = [#tpu.dimension_semantics<parallel>], iteration_bounds = array<i64: 2>, scalar_prefetch = 0 : i64, scratch_operands = 0 : i64, tpu.core_type = #tpu.core_type<tc>, window_params = [{transform_indices = @transform_0, window_bounds = array<i64: 256, 576>}, {pipeline_mode = #tpu.pipeline_mode<synchronous>, transform_indices = @transform_1, window_bounds = array<i64: 576, 64>}, {transform_indices = @transform_2, window_bounds = array<i64: 256, 64>}, {pipeline_mode = #tpu.pipeline_mode<synchronous>, transform_indices = @transform_3, window_bounds = array<i64: 1, 64>}, {pipeline_mode = #tpu.pipeline_mode<synchronous>, transform_indices = @transform_4, window_bounds = array<i64: 1, 64>}, {transform_indices = @transform_5, window_bounds = array<i64: 256, 64>}]} {
    %c0 = arith.constant 0 : index
    %c0_0 = arith.constant 0 : index
    %0 = vector.load %arg1[%c0, %c0_0] : memref<256x576xbf16, #tpu.memory_space<vmem>>, vector<256x576xbf16>
    %c0_1 = arith.constant 0 : index
    %c0_2 = arith.constant 0 : index
    %1 = vector.load %arg2[%c0_1, %c0_2] : memref<576x64xbf16, #tpu.memory_space<vmem>>, vector<576x64xbf16>
    %cst = arith.constant dense<0.000000e+00> : vector<256x64xf32>
    %2 = tpu.matmul %0, %1, %cst {dimension_numbers = #tpu.dot_dimension_numbers<[1], [0], [0], [1], [0, 0, 1, 1], [], []>} : vector<256x576xbf16>, vector<576x64xbf16>, vector<256x64xf32> -> vector<256x64xf32>
    %c0_3 = arith.constant 0 : index
    %c0_4 = arith.constant 0 : index
    %3 = vector.load %arg3[%c0_3, %c0_4] : memref<256x64xf32, #tpu.memory_space<vmem>>, vector<256x64xf32>
    %4 = arith.addf %2, %3 : vector<256x64xf32>
    %c0_5 = arith.constant 0 : index
    %c0_6 = arith.constant 0 : index
    %5 = vector.load %arg4[%c0_5, %c0_6] : memref<1x64xf32, #tpu.memory_space<vmem>>, vector<1x64xf32>
    %6 = vector.broadcast %5 : vector<1x64xf32> to vector<256x64xf32>
    %7 = arith.mulf %4, %6 : vector<256x64xf32>
    %c0_7 = arith.constant 0 : index
    %c0_8 = arith.constant 0 : index
    %8 = vector.load %arg5[%c0_7, %c0_8] : memref<1x64xf32, #tpu.memory_space<vmem>>, vector<1x64xf32>
    %9 = vector.broadcast %8 : vector<1x64xf32> to vector<256x64xf32>
    %10 = arith.addf %7, %9 : vector<256x64xf32>
    %cst_9 = arith.constant 0.000000e+00 : f32
    %11 = vector.broadcast %cst_9 : f32 to vector<256x64xf32>
    %12 = arith.maximumf %10, %11 : vector<256x64xf32>
    %13 = arith.truncf %12 : vector<256x64xf32> to vector<256x64xbf16>
    %c0_10 = arith.constant 0 : index
    %c0_11 = arith.constant 0 : index
    %14 = vector.load %arg6[%c0_10, %c0_11] : memref<256x64xbf16, #tpu.memory_space<vmem>>, vector<256x64xbf16>
    tpu.vector_store %arg6[%c0_10, %c0_11], %13 {strides = array<i32>} : memref<256x64xbf16, #tpu.memory_space<vmem>>, vector<256x64xbf16>,
    return
  }
  func.func @transform_0(%arg0: i32) -> (i32, i32) {
    %c0_i32 = arith.constant 0 : i32
    %c0_i32_0 = arith.constant 0 : i32
    return %arg0, %c0_i32 : i32, i32
  }
  func.func @transform_1(%arg0: i32) -> (i32, i32) {
    %c0_i32 = arith.constant 0 : i32
    %c0_i32_0 = arith.constant 0 : i32
    %c0_i32_1 = arith.constant 0 : i32
    return %c0_i32, %c0_i32_0 : i32, i32
  }
  func.func @transform_2(%arg0: i32) -> (i32, i32) {
    %c0_i32 = arith.constant 0 : i32
    %c0_i32_0 = arith.constant 0 : i32
    return %arg0, %c0_i32 : i32, i32
  }
  func.func @transform_3(%arg0: i32) -> (i32, i32) {
    %c0_i32 = arith.constant 0 : i32
    %c0_i32_0 = arith.constant 0 : i32
    %c0_i32_1 = arith.constant 0 : i32
    return %c0_i32, %c0_i32_0 : i32, i32
  }
  func.func @transform_4(%arg0: i32) -> (i32, i32) {
    %c0_i32 = arith.constant 0 : i32
    %c0_i32_0 = arith.constant 0 : i32
    %c0_i32_1 = arith.constant 0 : i32
    return %c0_i32, %c0_i32_0 : i32, i32
  }
  func.func @transform_5(%arg0: i32) -> (i32, i32) {
    %c0_i32 = arith.constant 0 : i32
    %c0_i32_0 = arith.constant 0 : i32
    return %arg0, %c0_i32 : i32, i32
  }
}

module attributes {stable_mosaic.version = 11 : i64} {
  func.func @_k_conv_dual(%arg0: i32, %arg1: memref<128x576xbf16, #tpu.memory_space<vmem>>, %arg2: memref<576x256xbf16, #tpu.memory_space<vmem>>, %arg3: memref<1x128xf32, #tpu.memory_space<vmem>>, %arg4: memref<1x128xf32, #tpu.memory_space<vmem>>, %arg5: memref<128x128xbf16, #tpu.memory_space<vmem>>, %arg6: memref<128x128xf32, #tpu.memory_space<vmem>>) attributes {dimension_semantics = [#tpu.dimension_semantics<parallel>], iteration_bounds = array<i64: 1>, scalar_prefetch = 0 : i64, scratch_operands = 0 : i64, tpu.core_type = #tpu.core_type<tc>, window_params = [{transform_indices = @transform_0, window_bounds = array<i64: 128, 576>}, {pipeline_mode = #tpu.pipeline_mode<synchronous>, transform_indices = @transform_1, window_bounds = array<i64: 576, 256>}, {pipeline_mode = #tpu.pipeline_mode<synchronous>, transform_indices = @transform_2, window_bounds = array<i64: 1, 128>}, {pipeline_mode = #tpu.pipeline_mode<synchronous>, transform_indices = @transform_3, window_bounds = array<i64: 1, 128>}, {transform_indices = @transform_4, window_bounds = array<i64: 128, 128>}, {transform_indices = @transform_5, window_bounds = array<i64: 128, 128>}]} {
    %c0 = arith.constant 0 : index
    %c0_0 = arith.constant 0 : index
    %0 = vector.load %arg1[%c0, %c0_0] : memref<128x576xbf16, #tpu.memory_space<vmem>>, vector<128x576xbf16>
    %c0_1 = arith.constant 0 : index
    %c0_2 = arith.constant 0 : index
    %1 = vector.load %arg2[%c0_1, %c0_2] : memref<576x256xbf16, #tpu.memory_space<vmem>>, vector<576x256xbf16>
    %cst = arith.constant dense<0.000000e+00> : vector<128x256xf32>
    %2 = tpu.matmul %0, %1, %cst {dimension_numbers = #tpu.dot_dimension_numbers<[1], [0], [0], [1], [0, 0, 1, 1], [], []>} : vector<128x576xbf16>, vector<576x256xbf16>, vector<128x256xf32> -> vector<128x256xf32>
    %3 = vector.extract_strided_slice %2 {offsets = [0, 0], sizes = [128, 128], strides = [1, 1]} : vector<128x256xf32> to vector<128x128xf32>
    %c0_3 = arith.constant 0 : index
    %c0_4 = arith.constant 0 : index
    %4 = vector.load %arg3[%c0_3, %c0_4] : memref<1x128xf32, #tpu.memory_space<vmem>>, vector<1x128xf32>
    %5 = vector.broadcast %4 : vector<1x128xf32> to vector<128x128xf32>
    %6 = arith.mulf %3, %5 : vector<128x128xf32>
    %c0_5 = arith.constant 0 : index
    %c0_6 = arith.constant 0 : index
    %7 = vector.load %arg4[%c0_5, %c0_6] : memref<1x128xf32, #tpu.memory_space<vmem>>, vector<1x128xf32>
    %8 = vector.broadcast %7 : vector<1x128xf32> to vector<128x128xf32>
    %9 = arith.addf %6, %8 : vector<128x128xf32>
    %cst_7 = arith.constant 0.000000e+00 : f32
    %10 = vector.broadcast %cst_7 : f32 to vector<128x128xf32>
    %11 = arith.maximumf %9, %10 : vector<128x128xf32>
    %12 = arith.truncf %11 : vector<128x128xf32> to vector<128x128xbf16>
    %c0_8 = arith.constant 0 : index
    %c0_9 = arith.constant 0 : index
    %13 = vector.load %arg5[%c0_8, %c0_9] : memref<128x128xbf16, #tpu.memory_space<vmem>>, vector<128x128xbf16>
    tpu.vector_store %arg5[%c0_8, %c0_9], %12 {strides = array<i32>} : memref<128x128xbf16, #tpu.memory_space<vmem>>, vector<128x128xbf16>,
    %14 = vector.extract_strided_slice %2 {offsets = [0, 128], sizes = [128, 128], strides = [1, 1]} : vector<128x256xf32> to vector<128x128xf32>
    %c0_10 = arith.constant 0 : index
    %c0_11 = arith.constant 0 : index
    %15 = vector.load %arg6[%c0_10, %c0_11] : memref<128x128xf32, #tpu.memory_space<vmem>>, vector<128x128xf32>
    tpu.vector_store %arg6[%c0_10, %c0_11], %14 {strides = array<i32>} : memref<128x128xf32, #tpu.memory_space<vmem>>, vector<128x128xf32>,
    return
  }
  func.func @transform_0(%arg0: i32) -> (i32, i32) {
    %c0_i32 = arith.constant 0 : i32
    %c0_i32_0 = arith.constant 0 : i32
    return %arg0, %c0_i32 : i32, i32
  }
  func.func @transform_1(%arg0: i32) -> (i32, i32) {
    %c0_i32 = arith.constant 0 : i32
    %c0_i32_0 = arith.constant 0 : i32
    %c0_i32_1 = arith.constant 0 : i32
    return %c0_i32, %c0_i32_0 : i32, i32
  }
  func.func @transform_2(%arg0: i32) -> (i32, i32) {
    %c0_i32 = arith.constant 0 : i32
    %c0_i32_0 = arith.constant 0 : i32
    %c0_i32_1 = arith.constant 0 : i32
    return %c0_i32, %c0_i32_0 : i32, i32
  }
  func.func @transform_3(%arg0: i32) -> (i32, i32) {
    %c0_i32 = arith.constant 0 : i32
    %c0_i32_0 = arith.constant 0 : i32
    %c0_i32_1 = arith.constant 0 : i32
    return %c0_i32, %c0_i32_0 : i32, i32
  }
  func.func @transform_4(%arg0: i32) -> (i32, i32) {
    %c0_i32 = arith.constant 0 : i32
    %c0_i32_0 = arith.constant 0 : i32
    return %arg0, %c0_i32 : i32, i32
  }
  func.func @transform_5(%arg0: i32) -> (i32, i32) {
    %c0_i32 = arith.constant 0 : i32
    %c0_i32_0 = arith.constant 0 : i32
    return %arg0, %c0_i32 : i32, i32
  }
}

module attributes {stable_mosaic.version = 11 : i64} {
  func.func @_k_conv_res_bn(%arg0: i32, %arg1: memref<128x1152xbf16, #tpu.memory_space<vmem>>, %arg2: memref<1152x128xbf16, #tpu.memory_space<vmem>>, %arg3: memref<128x128xf32, #tpu.memory_space<vmem>>, %arg4: memref<1x128xf32, #tpu.memory_space<vmem>>, %arg5: memref<1x128xf32, #tpu.memory_space<vmem>>, %arg6: memref<128x128xbf16, #tpu.memory_space<vmem>>) attributes {dimension_semantics = [#tpu.dimension_semantics<parallel>], iteration_bounds = array<i64: 1>, scalar_prefetch = 0 : i64, scratch_operands = 0 : i64, tpu.core_type = #tpu.core_type<tc>, window_params = [{transform_indices = @transform_0, window_bounds = array<i64: 128, 1152>}, {pipeline_mode = #tpu.pipeline_mode<synchronous>, transform_indices = @transform_1, window_bounds = array<i64: 1152, 128>}, {transform_indices = @transform_2, window_bounds = array<i64: 128, 128>}, {pipeline_mode = #tpu.pipeline_mode<synchronous>, transform_indices = @transform_3, window_bounds = array<i64: 1, 128>}, {pipeline_mode = #tpu.pipeline_mode<synchronous>, transform_indices = @transform_4, window_bounds = array<i64: 1, 128>}, {transform_indices = @transform_5, window_bounds = array<i64: 128, 128>}]} {
    %c0 = arith.constant 0 : index
    %c0_0 = arith.constant 0 : index
    %0 = vector.load %arg1[%c0, %c0_0] : memref<128x1152xbf16, #tpu.memory_space<vmem>>, vector<128x1152xbf16>
    %c0_1 = arith.constant 0 : index
    %c0_2 = arith.constant 0 : index
    %1 = vector.load %arg2[%c0_1, %c0_2] : memref<1152x128xbf16, #tpu.memory_space<vmem>>, vector<1152x128xbf16>
    %cst = arith.constant dense<0.000000e+00> : vector<128x128xf32>
    %2 = tpu.matmul %0, %1, %cst {dimension_numbers = #tpu.dot_dimension_numbers<[1], [0], [0], [1], [0, 0, 1, 1], [], []>} : vector<128x1152xbf16>, vector<1152x128xbf16>, vector<128x128xf32> -> vector<128x128xf32>
    %c0_3 = arith.constant 0 : index
    %c0_4 = arith.constant 0 : index
    %3 = vector.load %arg3[%c0_3, %c0_4] : memref<128x128xf32, #tpu.memory_space<vmem>>, vector<128x128xf32>
    %4 = arith.addf %2, %3 : vector<128x128xf32>
    %c0_5 = arith.constant 0 : index
    %c0_6 = arith.constant 0 : index
    %5 = vector.load %arg4[%c0_5, %c0_6] : memref<1x128xf32, #tpu.memory_space<vmem>>, vector<1x128xf32>
    %6 = vector.broadcast %5 : vector<1x128xf32> to vector<128x128xf32>
    %7 = arith.mulf %4, %6 : vector<128x128xf32>
    %c0_7 = arith.constant 0 : index
    %c0_8 = arith.constant 0 : index
    %8 = vector.load %arg5[%c0_7, %c0_8] : memref<1x128xf32, #tpu.memory_space<vmem>>, vector<1x128xf32>
    %9 = vector.broadcast %8 : vector<1x128xf32> to vector<128x128xf32>
    %10 = arith.addf %7, %9 : vector<128x128xf32>
    %cst_9 = arith.constant 0.000000e+00 : f32
    %11 = vector.broadcast %cst_9 : f32 to vector<128x128xf32>
    %12 = arith.maximumf %10, %11 : vector<128x128xf32>
    %13 = arith.truncf %12 : vector<128x128xf32> to vector<128x128xbf16>
    %c0_10 = arith.constant 0 : index
    %c0_11 = arith.constant 0 : index
    %14 = vector.load %arg6[%c0_10, %c0_11] : memref<128x128xbf16, #tpu.memory_space<vmem>>, vector<128x128xbf16>
    tpu.vector_store %arg6[%c0_10, %c0_11], %13 {strides = array<i32>} : memref<128x128xbf16, #tpu.memory_space<vmem>>, vector<128x128xbf16>,
    return
  }
  func.func @transform_0(%arg0: i32) -> (i32, i32) {
    %c0_i32 = arith.constant 0 : i32
    %c0_i32_0 = arith.constant 0 : i32
    return %arg0, %c0_i32 : i32, i32
  }
  func.func @transform_1(%arg0: i32) -> (i32, i32) {
    %c0_i32 = arith.constant 0 : i32
    %c0_i32_0 = arith.constant 0 : i32
    %c0_i32_1 = arith.constant 0 : i32
    return %c0_i32, %c0_i32_0 : i32, i32
  }
  func.func @transform_2(%arg0: i32) -> (i32, i32) {
    %c0_i32 = arith.constant 0 : i32
    %c0_i32_0 = arith.constant 0 : i32
    return %arg0, %c0_i32 : i32, i32
  }
  func.func @transform_3(%arg0: i32) -> (i32, i32) {
    %c0_i32 = arith.constant 0 : i32
    %c0_i32_0 = arith.constant 0 : i32
    %c0_i32_1 = arith.constant 0 : i32
    return %c0_i32, %c0_i32_0 : i32, i32
  }
  func.func @transform_4(%arg0: i32) -> (i32, i32) {
    %c0_i32 = arith.constant 0 : i32
    %c0_i32_0 = arith.constant 0 : i32
    %c0_i32_1 = arith.constant 0 : i32
    return %c0_i32, %c0_i32_0 : i32, i32
  }
  func.func @transform_5(%arg0: i32) -> (i32, i32) {
    %c0_i32 = arith.constant 0 : i32
    %c0_i32_0 = arith.constant 0 : i32
    return %arg0, %c0_i32 : i32, i32
  }
}

module attributes {stable_mosaic.version = 11 : i64} {
  func.func @_k_conv(%arg0: i32, %arg1: memref<32x1152xbf16, #tpu.memory_space<vmem>>, %arg2: memref<1152x128xbf16, #tpu.memory_space<vmem>>, %arg3: memref<32x128xf32, #tpu.memory_space<vmem>>) attributes {dimension_semantics = [#tpu.dimension_semantics<parallel>], iteration_bounds = array<i64: 1>, scalar_prefetch = 0 : i64, scratch_operands = 0 : i64, tpu.core_type = #tpu.core_type<tc>, window_params = [{transform_indices = @transform_0, window_bounds = array<i64: 32, 1152>}, {pipeline_mode = #tpu.pipeline_mode<synchronous>, transform_indices = @transform_1, window_bounds = array<i64: 1152, 128>}, {transform_indices = @transform_2, window_bounds = array<i64: 32, 128>}]} {
    %c0 = arith.constant 0 : index
    %c0_0 = arith.constant 0 : index
    %0 = vector.load %arg1[%c0, %c0_0] : memref<32x1152xbf16, #tpu.memory_space<vmem>>, vector<32x1152xbf16>
    %c0_1 = arith.constant 0 : index
    %c0_2 = arith.constant 0 : index
    %1 = vector.load %arg2[%c0_1, %c0_2] : memref<1152x128xbf16, #tpu.memory_space<vmem>>, vector<1152x128xbf16>
    %cst = arith.constant dense<0.000000e+00> : vector<32x128xf32>
    %2 = tpu.matmul %0, %1, %cst {dimension_numbers = #tpu.dot_dimension_numbers<[1], [0], [0], [1], [0, 0, 1, 1], [], []>} : vector<32x1152xbf16>, vector<1152x128xbf16>, vector<32x128xf32> -> vector<32x128xf32>
    %c0_3 = arith.constant 0 : index
    %c0_4 = arith.constant 0 : index
    %3 = vector.load %arg3[%c0_3, %c0_4] : memref<32x128xf32, #tpu.memory_space<vmem>>, vector<32x128xf32>
    tpu.vector_store %arg3[%c0_3, %c0_4], %2 {strides = array<i32>} : memref<32x128xf32, #tpu.memory_space<vmem>>, vector<32x128xf32>,
    return
  }
  func.func @transform_0(%arg0: i32) -> (i32, i32) {
    %c0_i32 = arith.constant 0 : i32
    %c0_i32_0 = arith.constant 0 : i32
    return %arg0, %c0_i32 : i32, i32
  }
  func.func @transform_1(%arg0: i32) -> (i32, i32) {
    %c0_i32 = arith.constant 0 : i32
    %c0_i32_0 = arith.constant 0 : i32
    %c0_i32_1 = arith.constant 0 : i32
    return %c0_i32, %c0_i32_0 : i32, i32
  }
  func.func @transform_2(%arg0: i32) -> (i32, i32) {
    %c0_i32 = arith.constant 0 : i32
    %c0_i32_0 = arith.constant 0 : i32
    return %arg0, %c0_i32 : i32, i32
  }
}

</mosaic_0001>

<bundles_post_ra>
// kernel: resnet_stem_forward.6
= control target key start
LH: loop header
LB: loop body
LE: loop exit
PB: predicated region body
PF: predicated region fallthrough
CT: control target
= control target key end

     0   :  { %s1218_s18 = smov 0   ;;  %s1492_s0 = inlined_call_operand.vmem [shape: bf16[512,27], index: 0, kind: input, shape index: {}]   ;;  %s1493_s1 = inlined_call_operand.vmem [shape: bf16[27,64], index: 1, kind: input, shape index: {}]   ;;  %s1494_s2 = inlined_call_operand.vmem [shape: f32[1,64], index: 2, kind: input, shape index: {}]   ;;  %s1495_s3 = inlined_call_operand.vmem [shape: f32[1,64], index: 3, kind: input, shape index: {}]   ;;  %s1496_s4 = inlined_call_operand.vmem [shape: bf16[512,64], index: 4, kind: output, shape index: {0}]   ;;  %s1497_s5 = inlined_call_operand.vmem [shape: f32[512,64], index: 5, kind: output, shape index: {1}]  }
   0x1 LB: > { %s981_s19 = sadd.s32 4294967295, %s1185_s18   ;;  %p985_p0 = scmp.ge.s32.totalorder %s1185_s18, 1  ;;  %s1185_s18 = sphi %s1218_s18, %s16_s18  }
   0x2   : > { %p191_p1 = scmp.lt.s32.totalorder %s1185_s18, 3 }
   0x4   : > { %p192_p2 = pnand %p985_p0, %p191_p1 }
   0x5   : > { %v1161_v0 = vld [vmem:[%s1493_s1] sm:$0xff] (!%p192_p2)   ;;  %vm419_vm0 = vcmask (!%p192_p2), 1044480   ;;  %v1162_v1 = vld [vmem:[%s1493_s1 + $0x8] sm:$0x3f] (!%p192_p2)   ;;  %vm420_vm1 = vcmask (!%p192_p2), 1045504   ;;  %s986_s24 = sshll.u32 (!%p192_p2), %s981_s19, 5 }
   0x6   : > { %195 = sbr.rel (%p192_p2) target bundleno = 270 (0x10e), region = 36  ;;  %1112 = vmatprep.subr.bf16.mxu0 (!%p192_p2), %v1161_v0  ;;  %1148 = vmatprep.subr.bf16.mxu1 (!%p192_p2), %v1161_v0  ;;  %v1187_v2 = vmov (!%p192_p2), 65535   ;;  %p225_p3 = scmp.lt.s32.totalorder (!%p192_p2), %s986_s24, 63  ;;  %vm370_vm2 = vcmask (!%p192_p2), 220160   ;;  %v1283_v22 = vld [vmem:[%s1494_s2] ss:$0 sm:$0xff] (!%p192_p2) }
   0x7   : > { %1113 = vmatpush3.bf16.msra.mxu0 (!%p192_p2), %v1161_v0  ;;  %1150 = vmatpush3.bf16.msra.mxu1 (!%p192_p2), %v1161_v0  ;;  %v421_v3 = vsel (!%p192_p2), %vm419_vm0, 4294967295, %v1187_v2  ;;  %vm858_vm3 = vcmask (!%p192_p2), 523264   ;;  %v1288_v24 = vld [vmem:[%s1495_s3] ss:$0 sm:$0xff] (!%p192_p2)  ;;  %vm825_vm4 = vcmask (!%p192_p2), 519168  }
   0x8   : > { %v422_v4 = vsel (!%p192_p2), %vm420_vm1, %v421_v3, 0 }
   0x9   : > { %v424_v5 = vand.u32 (!%p192_p2), %v1162_v1, %v422_v4 }
   0xb   : > { %1114 = vmatprep.subr.bf16.mxu0 (!%p192_p2), %v424_v5  ;;  %1149 = vmatprep.subr.bf16.mxu1 (!%p192_p2), %v424_v5 }
   0xc   : > { %1115 = vmatpush3.bf16.msra.mxu0 (!%p192_p2), %v424_v5  ;;  %1151 = vmatpush3.bf16.msra.mxu1 (!%p192_p2), %v424_v5 }
   0xd   : > { %s1499_s24 = smov (!%p225_p3, %s986_s24), 63 }
   0xe   : > { %s987_s25 = sshll.u32 %s1499_s24, 2  ;;  %s991_s29 = sshll.u32 %s1499_s24, 3 }
   0xf   : > { %s1240_s28 = scalar_lea.vmem %s1492_s0, %s987_s25  ;;  %s1278_s7 = scalar_lea.vmem %s1497_s5, %s991_s29 }
  0x10   : > { %v1163_v6 = vld [vmem:[%s1240_s28] sm:$0xff]   ;;  %v1165_v8 = vld [vmem:[%s1240_s28 + $0x8] sm:$0xff]   ;;  %v1167_v10 = vld [vmem:[%s1240_s28 + $0x10] sm:$0xff]   ;;  %s1324_s14 = scalar_lea.vmem %s1496_s4, %s987_s25 }
  0x11   : > { %v1164_v7 = vld [vmem:[%s1240_s28 + $0x40] sm:$0xff]   ;;  %1116 = vmatprep.mubr.msk.bf16.mxu0 %vm370_vm2, %v1163_v6  ;;  %v1166_v9 = vld [vmem:[%s1240_s28 + $0x48] sm:$0xff]   ;;  %v1168_v11 = vld [vmem:[%s1240_s28 + $0x50] sm:$0xff]  }
  0x12   : > { %1132 = vmatprep.mubr.msk.bf16.mxu1 %vm370_vm2, %v1164_v7  ;;  %1117 = vmatmul.mubr.msk.bf16.vlgmr.msra.gmra.mrb[0].mxu0 %vm370_vm2, %v1165_v8  ;;  %v1169_v12 = vld [vmem:[%s1240_s28 + $0x18] sm:$0xff]   ;;  %v1171_v14 = vld [vmem:[%s1240_s28 + $0x20] sm:$0xff]   ;;  %v1173_v16 = vld [vmem:[%s1240_s28 + $0x28] sm:$0xff]  }
  0x13   : > { %1133 = vmatmul.mubr.msk.bf16.vlgmr.msra.gmra.mrb[0].mxu1 %vm370_vm2, %v1166_v9  ;;  %1120 = vmatprep.mubr.msk.bf16.mxu0 %vm370_vm2, %v1167_v10  ;;  %v1170_v13 = vld [vmem:[%s1240_s28 + $0x58] sm:$0xff]   ;;  %v1172_v15 = vld [vmem:[%s1240_s28 + $0x60] sm:$0xff]   ;;  %v1174_v17 = vld [vmem:[%s1240_s28 + $0x68] sm:$0xff]  }
  0x14   : > { %1136 = vmatprep.mubr.msk.bf16.mxu1 %vm370_vm2, %v1168_v11  ;;  %v1175_v18 = vld [vmem:[%s1240_s28 + $0x30] sm:$0xff]   ;;  %v1177_v20 = vld [vmem:[%s1240_s28 + $0x38] sm:$0xff]  }
  0x15   : > { %v1176_v19 = vld [vmem:[%s1240_s28 + $0x70] sm:$0xff]   ;;  %v1178_v21 = vld [vmem:[%s1240_s28 + $0x78] sm:$0xff]  }
  0x1a   : > { %1121 = vmatmul.mubr.msk.bf16.gmra.mrb[4].mxu0 %vm370_vm2, %v1169_v12 }
  0x1b   : > { %1137 = vmatmul.mubr.msk.bf16.gmra.mrb[4].mxu1 %vm370_vm2, %v1170_v13  ;;  %1124 = vmatprep.mubr.msk.bf16.mxu0 %vm370_vm2, %v1171_v14 }
  0x1c   : > { %1140 = vmatprep.mubr.msk.bf16.mxu1 %vm370_vm2, %v1172_v15 }
  0x22   : > { %1125 = vmatmul.mubr.msk.bf16.gmra.mrb[8].mxu0 %vm370_vm2, %v1173_v16 }
  0x23   : > { %1141 = vmatmul.mubr.msk.bf16.gmra.mrb[8].mxu1 %vm370_vm2, %v1174_v17  ;;  %1128 = vmatprep.mubr.msk.bf16.mxu0 %vm370_vm2, %v1175_v18 }
  0x24   : > { %1144 = vmatprep.mubr.msk.bf16.mxu1 %vm370_vm2, %v1176_v19 }
  0x2a   : > { %1129 = vmatmul.mubr.msk.bf16.gmra.mrb[12].mxu0 %vm370_vm2, %v1177_v20 }
  0x2b   : > { %1145 = vmatmul.mubr.msk.bf16.gmra.mrb[12].mxu1 %vm370_vm2, %v1178_v21 }
  0xe5   : > { %v1118_v23 = vpop.f32.mrb[0].mxu0 }
  0xe6   : > { %v596_v25 = vmul.f32 %v1118_v23, %v1283_v22  ;;  %861 = vst.msk [vmem:[%s1278_s7 + $0x10] sm:$0xff] %vm858_vm3, %v1118_v23  ;;  %v1134_v26 = vpop.f32.mrb[0].mxu1  ;;  %v460_v27 = vpop.f32.mrb[1].mxu0 }
  0xe7   : > { %v612_v28 = vmul.f32 %v1134_v26, %v1283_v22  ;;  %877 = vst.msk [vmem:[%s1278_s7 + $0x90] sm:$0xff] %vm858_vm3, %v1134_v26  ;;  %v594_v29 = vmul.f32 %v1283_v22, %v460_v27  ;;  %859 = vst.msk [vmem:[%s1278_s7] sm:$0xff] %vm858_vm3, %v460_v27  ;;  %v524_v30 = vpop.f32.mrb[1].mxu1  ;;  %v1119_v31 = vpop.f32.mrb[2].mxu0 }
  0xe8   : > { %v635_v32 = vadd.f32 %v1288_v24, %v596_v25  ;;  %v610_v33 = vmul.f32 %v1283_v22, %v524_v30  ;;  %875 = vst.msk [vmem:[%s1278_s7 + $0x80] sm:$0xff] %vm858_vm3, %v524_v30  ;;  %v597_v34 = vmul.f32 %v1119_v31, %v1283_v22  ;;  %862 = vst.msk [vmem:[%s1278_s7 + $0x18] sm:$0xff] %vm858_vm3, %v1119_v31  ;;  %v1135_v35 = vpop.f32.mrb[2].mxu1  ;;  %v463_v36 = vpop.f32.mrb[3].mxu0 }
  0xe9   : > { %v651_v37 = vadd.f32 %v1288_v24, %v612_v28  ;;  %v633_v38 = vadd.f32 %v1288_v24, %v594_v29  ;;  %v613_v39 = vmul.f32 %v1135_v35, %v1283_v22  ;;  %878 = vst.msk [vmem:[%s1278_s7 + $0x98] sm:$0xff] %vm858_vm3, %v1135_v35  ;;  %v595_v40 = vmul.f32 %v1283_v22, %v463_v36  ;;  %v527_v41 = vpop.f32.mrb[3].mxu1 }
  0xea   : > { %860 = vst.msk [vmem:[%s1278_s7 + $0x8] sm:$0xff] %vm858_vm3, %v463_v36  ;;  %v667_v42 = vmax.f32 %v635_v32, 0.0  ;;  %v649_v43 = vadd.f32 %v1288_v24, %v610_v33  ;;  %v636_v44 = vadd.f32 %v1288_v24, %v597_v34  ;;  %v611_v45 = vmul.f32 %v1283_v22, %v527_v41  ;;  %876 = vst.msk [vmem:[%s1278_s7 + $0x88] sm:$0xff] %vm858_vm3, %v527_v41 }
  0xeb   : > { %v683_v46 = vmax.f32 %v651_v37, 0.0  ;;  %v665_v47 = vmax.f32 %v633_v38, 0.0  ;;  %v652_v48 = vadd.f32 %v1288_v24, %v613_v39  ;;  %v634_v49 = vadd.f32 %v1288_v24, %v595_v40 }
  0xec   : > { %v1064_v50 = vpack.c.bf16 %v667_v42, %v667_v42  ;;  %v681_v51 = vmax.f32 %v649_v43, 0.0  ;;  %v668_v52 = vmax.f32 %v636_v44, 0.0  ;;  %v650_v53 = vadd.f32 %v1288_v24, %v611_v45 }
  0xed   : > { %v1080_v54 = vpack.c.bf16 %v683_v46, %v683_v46  ;;  %v1062_v55 = vpack.c.bf16 %v665_v47, %v665_v47  ;;  %v684_v56 = vmax.f32 %v652_v48, 0.0  ;;  %v666_v57 = vmax.f32 %v634_v49, 0.0  ;;  %v1122_v58 = vpop.f32.mrb[4].mxu0 }
  0xee   : > { %828 = vst.msk [vmem:[%s1324_s14 + $0x8] sm:$0xf] %vm825_vm4, %v1064_v50  ;;  %v1078_v59 = vpack.c.bf16 %v681_v51, %v681_v51  ;;  %v1065_v60 = vpack.c.bf16 %v668_v52, %v668_v52  ;;  %v682_v61 = vmax.f32 %v650_v53, 0.0  ;;  %v600_v62 = vmul.f32 %v1122_v58, %v1283_v22  ;;  %v1138_v63 = vpop.f32.mrb[4].mxu1  ;;  %v476_v0 = vpop.f32.mrb[5].mxu0 }
  0xef   : > { %865 = vst.msk [vmem:[%s1278_s7 + $0x30] sm:$0xff] %vm858_vm3, %v1122_v58  ;;  %v1081_v1 = vpack.c.bf16 %v684_v56, %v684_v56  ;;  %v1063_v2 = vpack.c.bf16 %v666_v57, %v666_v57  ;;  %v616_v3 = vmul.f32 %v1138_v63, %v1283_v22  ;;  %881 = vst.msk [vmem:[%s1278_s7 + $0xb0] sm:$0xff] %vm858_vm3, %v1138_v63  ;;  %v540_v5 = vpop.f32.mrb[5].mxu1  ;;  %v1123_v6 = vpop.f32.mrb[6].mxu0 }
  0xf0   : > { %844 = vst.msk [vmem:[%s1324_s14 + $0x48] sm:$0xf] %vm825_vm4, %v1080_v54  ;;  %826 = vst.msk [vmem:[%s1324_s14] sm:$0xf] %vm825_vm4, %v1062_v55  ;;  %v598_v4 = vmul.f32 %v1283_v22, %v476_v0  ;;  %v1079_v7 = vpack.c.bf16 %v682_v61, %v682_v61  ;;  %v639_v8 = vadd.f32 %v1288_v24, %v600_v62  ;;  %v1139_v11 = vpop.f32.mrb[6].mxu1  ;;  %v479_v12 = vpop.f32.mrb[7].mxu0 }
  0xf1   : > { %863 = vst.msk [vmem:[%s1278_s7 + $0x20] sm:$0xff] %vm858_vm3, %v476_v0  ;;  %v614_v9 = vmul.f32 %v1283_v22, %v540_v5  ;;  %879 = vst.msk [vmem:[%s1278_s7 + $0xa0] sm:$0xff] %vm858_vm3, %v540_v5  ;;  %v601_v10 = vmul.f32 %v1123_v6, %v1283_v22  ;;  %v655_v13 = vadd.f32 %v1288_v24, %v616_v3  ;;  %v543_v17 = vpop.f32.mrb[7].mxu1 }
  0xf2   : > { %842 = vst.msk [vmem:[%s1324_s14 + $0x40] sm:$0xf] %vm825_vm4, %v1078_v59  ;;  %829 = vst.msk [vmem:[%s1324_s14 + $0xc] sm:$0xf] %vm825_vm4, %v1065_v60  ;;  %v637_v14 = vadd.f32 %v1288_v24, %v598_v4  ;;  %v617_v15 = vmul.f32 %v1139_v11, %v1283_v22  ;;  %v599_v16 = vmul.f32 %v1283_v22, %v479_v12  ;;  %v671_v18 = vmax.f32 %v639_v8, 0.0 }
  0xf3   : > { %866 = vst.msk [vmem:[%s1278_s7 + $0x38] sm:$0xff] %vm858_vm3, %v1123_v6  ;;  %882 = vst.msk [vmem:[%s1278_s7 + $0xb8] sm:$0xff] %vm858_vm3, %v1139_v11  ;;  %v653_v19 = vadd.f32 %v1288_v24, %v614_v9  ;;  %v640_v20 = vadd.f32 %v1288_v24, %v601_v10  ;;  %v615_v21 = vmul.f32 %v1283_v22, %v543_v17  ;;  %v687_v23 = vmax.f32 %v655_v13, 0.0 }
  0xf4   : > { %845 = vst.msk [vmem:[%s1324_s14 + $0x4c] sm:$0xf] %vm825_vm4, %v1081_v1  ;;  %827 = vst.msk [vmem:[%s1324_s14 + $0x4] sm:$0xf] %vm825_vm4, %v1063_v2  ;;  %v669_v25 = vmax.f32 %v637_v14, 0.0  ;;  %v656_v26 = vadd.f32 %v1288_v24, %v617_v15  ;;  %v638_v27 = vadd.f32 %v1288_v24, %v599_v16  ;;  %v1068_v28 = vpack.c.bf16 %v671_v18, %v671_v18 }
  0xf5   : > { %864 = vst.msk [vmem:[%s1278_s7 + $0x28] sm:$0xff] %vm858_vm3, %v479_v12  ;;  %880 = vst.msk [vmem:[%s1278_s7 + $0xa8] sm:$0xff] %vm858_vm3, %v543_v17  ;;  %v685_v29 = vmax.f32 %v653_v19, 0.0  ;;  %v672_v30 = vmax.f32 %v640_v20, 0.0  ;;  %v654_v31 = vadd.f32 %v1288_v24, %v615_v21  ;;  %v1084_v32 = vpack.c.bf16 %v687_v23, %v687_v23  ;;  %v1126_v36 = vpop.f32.mrb[8].mxu0 }
  0xf6   : > { %843 = vst.msk [vmem:[%s1324_s14 + $0x44] sm:$0xf] %vm825_vm4, %v1079_v7  ;;  %v1066_v33 = vpack.c.bf16 %v669_v25, %v669_v25  ;;  %v688_v34 = vmax.f32 %v656_v26, 0.0  ;;  %v670_v35 = vmax.f32 %v638_v27, 0.0  ;;  %832 = vst.msk [vmem:[%s1324_s14 + $0x18] sm:$0xf] %vm825_vm4, %v1068_v28  ;;  %v604_v40 = vmul.f32 %v1126_v36, %v1283_v22 }
  0xf7   : > { %v1082_v37 = vpack.c.bf16 %v685_v29, %v685_v29  ;;  %v1069_v38 = vpack.c.bf16 %v672_v30, %v672_v30  ;;  %v686_v39 = vmax.f32 %v654_v31, 0.0  ;;  %869 = vst.msk [vmem:[%s1278_s7 + $0x50] sm:$0xff] %vm858_vm3, %v1126_v36  ;;  %v1142_v41 = vpop.f32.mrb[8].mxu1  ;;  %v492_v42 = vpop.f32.mrb[9].mxu0 }
  0xf8   : > { %848 = vst.msk [vmem:[%s1324_s14 + $0x58] sm:$0xf] %vm825_vm4, %v1084_v32  ;;  %830 = vst.msk [vmem:[%s1324_s14 + $0x10] sm:$0xf] %vm825_vm4, %v1066_v33  ;;  %v1085_v43 = vpack.c.bf16 %v688_v34, %v688_v34  ;;  %v1067_v44 = vpack.c.bf16 %v670_v35, %v670_v35  ;;  %v620_v45 = vmul.f32 %v1142_v41, %v1283_v22  ;;  %v556_v47 = vpop.f32.mrb[9].mxu1  ;;  %v1127_v48 = vpop.f32.mrb[10].mxu0 }
  0xf9   : > { %885 = vst.msk [vmem:[%s1278_s7 + $0xd0] sm:$0xff] %vm858_vm3, %v1142_v41  ;;  %v602_v46 = vmul.f32 %v1283_v22, %v492_v42  ;;  %867 = vst.msk [vmem:[%s1278_s7 + $0x40] sm:$0xff] %vm858_vm3, %v492_v42  ;;  %v1083_v49 = vpack.c.bf16 %v686_v39, %v686_v39  ;;  %v643_v50 = vadd.f32 %v1288_v24, %v604_v40  ;;  %v1143_v53 = vpop.f32.mrb[10].mxu1  ;;  %v495_v54 = vpop.f32.mrb[11].mxu0 }
  0xfa   : > { %846 = vst.msk [vmem:[%s1324_s14 + $0x50] sm:$0xf] %vm825_vm4, %v1082_v37  ;;  %833 = vst.msk [vmem:[%s1324_s14 + $0x1c] sm:$0xf] %vm825_vm4, %v1069_v38  ;;  %v618_v51 = vmul.f32 %v1283_v22, %v556_v47  ;;  %v605_v52 = vmul.f32 %v1127_v48, %v1283_v22  ;;  %v659_v55 = vadd.f32 %v1288_v24, %v620_v45  ;;  %v559_v59 = vpop.f32.mrb[11].mxu1 }
  0xfb   : > { %883 = vst.msk [vmem:[%s1278_s7 + $0xc0] sm:$0xff] %vm858_vm3, %v556_v47  ;;  %870 = vst.msk [vmem:[%s1278_s7 + $0x58] sm:$0xff] %vm858_vm3, %v1127_v48  ;;  %v641_v56 = vadd.f32 %v1288_v24, %v602_v46  ;;  %v621_v57 = vmul.f32 %v1143_v53, %v1283_v22  ;;  %v603_v58 = vmul.f32 %v1283_v22, %v495_v54  ;;  %v675_v60 = vmax.f32 %v643_v50, 0.0 }
  0xfc   : > { %849 = vst.msk [vmem:[%s1324_s14 + $0x5c] sm:$0xf] %vm825_vm4, %v1085_v43  ;;  %831 = vst.msk [vmem:[%s1324_s14 + $0x14] sm:$0xf] %vm825_vm4, %v1067_v44  ;;  %v657_v61 = vadd.f32 %v1288_v24, %v618_v51  ;;  %v644_v62 = vadd.f32 %v1288_v24, %v605_v52  ;;  %v619_v63 = vmul.f32 %v1283_v22, %v559_v59  ;;  %v691_v0 = vmax.f32 %v659_v55, 0.0 }
  0xfd   : > { %886 = vst.msk [vmem:[%s1278_s7 + $0xd8] sm:$0xff] %vm858_vm3, %v1143_v53  ;;  %868 = vst.msk [vmem:[%s1278_s7 + $0x48] sm:$0xff] %vm858_vm3, %v495_v54  ;;  %v673_v1 = vmax.f32 %v641_v56, 0.0  ;;  %v660_v2 = vadd.f32 %v1288_v24, %v621_v57  ;;  %v642_v3 = vadd.f32 %v1288_v24, %v603_v58  ;;  %v1072_v4 = vpack.c.bf16 %v675_v60, %v675_v60  ;;  %v1130_v12 = vpop.f32.mrb[12].mxu0 }
  0xfe   : > { %847 = vst.msk [vmem:[%s1324_s14 + $0x54] sm:$0xf] %vm825_vm4, %v1083_v49  ;;  %v689_v5 = vmax.f32 %v657_v61, 0.0  ;;  %v676_v6 = vmax.f32 %v644_v62, 0.0  ;;  %v658_v7 = vadd.f32 %v1288_v24, %v619_v63  ;;  %v1088_v8 = vpack.c.bf16 %v691_v0, %v691_v0  ;;  %v1146_v17 = vpop.f32.mrb[12].mxu1  ;;  %v508_v18 = vpop.f32.mrb[13].mxu0 }
  0xff   : > { %884 = vst.msk [vmem:[%s1278_s7 + $0xc8] sm:$0xff] %vm858_vm3, %v559_v59  ;;  %v1070_v9 = vpack.c.bf16 %v673_v1, %v673_v1  ;;  %v692_v10 = vmax.f32 %v660_v2, 0.0  ;;  %v674_v11 = vmax.f32 %v642_v3, 0.0  ;;  %v608_v16 = vmul.f32 %v1130_v12, %v1283_v22  ;;  %873 = vst.msk [vmem:[%s1278_s7 + $0x70] sm:$0xff] %vm858_vm3, %v1130_v12  ;;  %v572_v25 = vpop.f32.mrb[13].mxu1  ;;  %v1131_v26 = vpop.f32.mrb[14].mxu0 }
 0x100   : > { %836 = vst.msk [vmem:[%s1324_s14 + $0x28] sm:$0xf] %vm825_vm4, %v1072_v4  ;;  %v1086_v13 = vpack.c.bf16 %v689_v5, %v689_v5  ;;  %v1073_v14 = vpack.c.bf16 %v676_v6, %v676_v6  ;;  %v690_v15 = vmax.f32 %v658_v7, 0.0  ;;  %852 = vst.msk [vmem:[%s1324_s14 + $0x68] sm:$0xf] %vm825_vm4, %v1088_v8  ;;  %v624_v21 = vmul.f32 %v1146_v17, %v1283_v22  ;;  %v1147_v31 = vpop.f32.mrb[14].mxu1 }
 0x101   : > { %834 = vst.msk [vmem:[%s1324_s14 + $0x20] sm:$0xf] %vm825_vm4, %v1070_v9  ;;  %v1089_v19 = vpack.c.bf16 %v692_v10, %v692_v10  ;;  %v1071_v20 = vpack.c.bf16 %v674_v11, %v674_v11  ;;  %v606_v23 = vmul.f32 %v1283_v22, %v508_v18  ;;  %v647_v28 = vadd.f32 %v1288_v24, %v608_v16  ;;  %v511_v32 = vpop.f32.mrb[15].mxu0  ;;  %v575_v37 = vpop.f32.mrb[15].mxu1 }
 0x102   : > { %889 = vst.msk [vmem:[%s1278_s7 + $0xf0] sm:$0xff] %vm858_vm3, %v1146_v17  ;;  %871 = vst.msk [vmem:[%s1278_s7 + $0x60] sm:$0xff] %vm858_vm3, %v508_v18  ;;  %v1087_v27 = vpack.c.bf16 %v690_v15, %v690_v15  ;;  %v622_v29 = vmul.f32 %v1283_v22, %v572_v25  ;;  %v609_v30 = vmul.f32 %v1131_v26, %v1283_v22 }
 0x103   : > { %850 = vst.msk [vmem:[%s1324_s14 + $0x60] sm:$0xf] %vm825_vm4, %v1086_v13  ;;  %837 = vst.msk [vmem:[%s1324_s14 + $0x2c] sm:$0xf] %vm825_vm4, %v1073_v14  ;;  %v663_v33 = vadd.f32 %v1288_v24, %v624_v21  ;;  %v645_v34 = vadd.f32 %v1288_v24, %v606_v23  ;;  %v625_v35 = vmul.f32 %v1147_v31, %v1283_v22  ;;  %v679_v38 = vmax.f32 %v647_v28, 0.0 }
 0x104   : > { %887 = vst.msk [vmem:[%s1278_s7 + $0xe0] sm:$0xff] %vm858_vm3, %v572_v25  ;;  %874 = vst.msk [vmem:[%s1278_s7 + $0x78] sm:$0xff] %vm858_vm3, %v1131_v26  ;;  %v607_v36 = vmul.f32 %v1283_v22, %v511_v32  ;;  %v661_v39 = vadd.f32 %v1288_v24, %v622_v29  ;;  %v648_v40 = vadd.f32 %v1288_v24, %v609_v30 }
 0x105   : > { %853 = vst.msk [vmem:[%s1324_s14 + $0x6c] sm:$0xf] %vm825_vm4, %v1089_v19  ;;  %835 = vst.msk [vmem:[%s1324_s14 + $0x24] sm:$0xf] %vm825_vm4, %v1071_v20  ;;  %v623_v41 = vmul.f32 %v1283_v22, %v575_v37  ;;  %v695_v42 = vmax.f32 %v663_v33, 0.0  ;;  %v677_v43 = vmax.f32 %v645_v34, 0.0  ;;  %v664_v44 = vadd.f32 %v1288_v24, %v625_v35 }
 0x106   : > { %890 = vst.msk [vmem:[%s1278_s7 + $0xf8] sm:$0xff] %vm858_vm3, %v1147_v31  ;;  %872 = vst.msk [vmem:[%s1278_s7 + $0x68] sm:$0xff] %vm858_vm3, %v511_v32  ;;  %v646_v45 = vadd.f32 %v1288_v24, %v607_v36  ;;  %v1076_v46 = vpack.c.bf16 %v679_v38, %v679_v38  ;;  %v693_v47 = vmax.f32 %v661_v39, 0.0  ;;  %v680_v48 = vmax.f32 %v648_v40, 0.0 }
 0x107   : > { %851 = vst.msk [vmem:[%s1324_s14 + $0x64] sm:$0xf] %vm825_vm4, %v1087_v27  ;;  %v662_v49 = vadd.f32 %v1288_v24, %v623_v41  ;;  %v1092_v50 = vpack.c.bf16 %v695_v42, %v695_v42  ;;  %v1074_v22 = vpack.c.bf16 %v677_v43, %v677_v43  ;;  %v696_v51 = vmax.f32 %v664_v44, 0.0 }
 0x108   : > { %888 = vst.msk [vmem:[%s1278_s7 + $0xe8] sm:$0xff] %vm858_vm3, %v575_v37  ;;  %v678_v52 = vmax.f32 %v646_v45, 0.0  ;;  %v1090_v53 = vpack.c.bf16 %v693_v47, %v693_v47  ;;  %v1077_v54 = vpack.c.bf16 %v680_v48, %v680_v48 }
 0x109   : > { %840 = vst.msk [vmem:[%s1324_s14 + $0x38] sm:$0xf] %vm825_vm4, %v1076_v46  ;;  %v694_v55 = vmax.f32 %v662_v49, 0.0  ;;  %856 = vst.msk [vmem:[%s1324_s14 + $0x78] sm:$0xf] %vm825_vm4, %v1092_v50  ;;  %v1093_v56 = vpack.c.bf16 %v696_v51, %v696_v51 }
 0x10a   : > { %838 = vst.msk [vmem:[%s1324_s14 + $0x30] sm:$0xf] %vm825_vm4, %v1074_v22  ;;  %v1075_v57 = vpack.c.bf16 %v678_v52, %v678_v52  ;;  %854 = vst.msk [vmem:[%s1324_s14 + $0x70] sm:$0xf] %vm825_vm4, %v1090_v53 }
 0x10b   : > { %841 = vst.msk [vmem:[%s1324_s14 + $0x3c] sm:$0xf] %vm825_vm4, %v1077_v54  ;;  %v1091_v24 = vpack.c.bf16 %v694_v55, %v694_v55  ;;  %857 = vst.msk [vmem:[%s1324_s14 + $0x7c] sm:$0xf] %vm825_vm4, %v1093_v56 }
 0x10c   : > { %839 = vst.msk [vmem:[%s1324_s14 + $0x34] sm:$0xf] %vm825_vm4, %v1075_v57 }
 0x10d   : > { %855 = vst.msk [vmem:[%s1324_s14 + $0x74] sm:$0xf] %vm825_vm4, %v1091_v24 }
 0x10e PF: > { %s16_s18 = sadd.s32 1, %s1185_s18  }
 0x10f   : > { %p13_p4 = scmp.ge.s32.totalorder %s16_s18, 4  }
 0x111   :  { %15 = sbr.rel (!%p13_p4) target bundleno = 1 (0x1), region = 78 }

// kernel: resnet_stem_forward.7
= control target key start
LH: loop header
LB: loop body
LE: loop exit
PB: predicated region body
PF: predicated region fallthrough
CT: control target
= control target key end

     0   :  { %s2547_s15 = smov 0   ;;  %s3031_s0 = inlined_call_operand.vmem [shape: bf16[512,576], index: 0, kind: input, shape index: {}]   ;;  %s3032_s1 = inlined_call_operand.vmem [shape: bf16[576,64], index: 1, kind: input, shape index: {}]   ;;  %s3033_s2 = inlined_call_operand.vmem [shape: f32[1,64], index: 2, kind: input, shape index: {}]   ;;  %s3034_s3 = inlined_call_operand.vmem [shape: f32[1,64], index: 3, kind: input, shape index: {}]   ;;  %s3035_s4 = inlined_call_operand.vmem [shape: bf16[512,64], index: 4, kind: output, shape index: {}]  }
   0x1 LB: > { %s1848_s16 = sadd.s32 4294967295, %s2520_s15   ;;  %p1852_p0 = scmp.ge.s32.totalorder %s2520_s15, 1  ;;  %s2520_s15 = sphi %s2547_s15, %s14_s15  }
   0x2   : > { %p164_p1 = scmp.lt.s32.totalorder %s2520_s15, 3 }
   0x4   : > { %p165_p2 = pnand %p1852_p0, %p164_p1 }
   0x5   : > { %v2366_v0 = vld [vmem:[%s3032_s1 + $0x40] sm:$0xff] (!%p165_p2)   ;;  %s1853_s19 = sshll.u32 (!%p165_p2), %s1848_s16, 5  ;;  %v2368_v2 = vld [vmem:[%s3032_s1 + $0x48] sm:$0xff] (!%p165_p2)   ;;  %v2370_v4 = vld [vmem:[%s3032_s1 + $0x50] sm:$0xff] (!%p165_p2)   ;;  %vm989_vm0 = vcmask (!%p165_p2), 523264   ;;  %vm1759_vm1 = vcmask (!%p165_p2), 519168  }
   0x6   : > { %168 = sbr.rel (%p165_p2) target bundleno = 420 (0x1a4), region = 36  ;;  %v2367_v1 = vld [vmem:[%s3032_s1] sm:$0xff] (!%p165_p2)   ;;  %2057 = vmatprep.subr.bf16.mxu0 (!%p165_p2), %v2366_v0  ;;  %2341 = vmatprep.subr.bf16.mxu1 (!%p165_p2), %v2366_v0  ;;  %p192_p3 = scmp.lt.s32.totalorder (!%p165_p2), %s1853_s19, 63  ;;  %v2369_v3 = vld [vmem:[%s3032_s1 + $0x8] sm:$0xff] (!%p165_p2)   ;;  %v2371_v5 = vld [vmem:[%s3032_s1 + $0x10] sm:$0xff] (!%p165_p2)  }
   0x7   : > { %2058 = vmatpush3.bf16.msra.mxu0 (!%p165_p2), %v2367_v1  ;;  %2349 = vmatpush3.bf16.msra.mxu1 (!%p165_p2), %v2367_v1  ;;  %v2372_v6 = vld [vmem:[%s3032_s1 + $0x58] sm:$0xff] (!%p165_p2)   ;;  %v2374_v8 = vld [vmem:[%s3032_s1 + $0x60] sm:$0xff] (!%p165_p2)   ;;  %v2376_v10 = vld [vmem:[%s3032_s1 + $0x68] sm:$0xff] (!%p165_p2)  }
   0x8   : > { %2059 = vmatprep.subr.bf16.mxu0 (!%p165_p2), %v2368_v2  ;;  %2342 = vmatprep.subr.bf16.mxu1 (!%p165_p2), %v2368_v2  ;;  %v2373_v7 = vld [vmem:[%s3032_s1 + $0x18] sm:$0xff] (!%p165_p2)   ;;  %v2375_v9 = vld [vmem:[%s3032_s1 + $0x20] sm:$0xff] (!%p165_p2)   ;;  %v2377_v13 = vld [vmem:[%s3032_s1 + $0x28] sm:$0xff] (!%p165_p2)  }
   0x9   : > { %v2378_v14 = vld [vmem:[%s3032_s1 + $0x70] sm:$0xff] (!%p165_p2)   ;;  %v2380_v16 = vld [vmem:[%s3032_s1 + $0x78] sm:$0xff] (!%p165_p2)   ;;  %v2388_v18 = vld [vmem:[%s3032_s1 + $0xc0] sm:$0xff] (!%p165_p2)  }
   0xa   : > { %v2379_v15 = vld [vmem:[%s3032_s1 + $0x30] sm:$0xff] (!%p165_p2)   ;;  %v2381_v17 = vld [vmem:[%s3032_s1 + $0x38] sm:$0xff] (!%p165_p2)   ;;  %v2391_v19 = vld [vmem:[%s3032_s1 + $0x100] sm:$0xff] (!%p165_p2)  }
   0xb   : > { %2060 = vmatpush3.bf16.msra.mxu0 (!%p165_p2), %v2369_v3  ;;  %2350 = vmatpush3.bf16.msra.mxu1 (!%p165_p2), %v2369_v3  ;;  %v2389_v22 = vld [vmem:[%s3032_s1 + $0x80] sm:$0xff] (!%p165_p2)   ;;  %v2390_v23 = vld [vmem:[%s3032_s1 + $0xc8] sm:$0xff] (!%p165_p2)   ;;  %v2399_v28 = vld [vmem:[%s3032_s1 + $0xd0] sm:$0xff] (!%p165_p2)  }
   0xc   : > { %2061 = vmatprep.subr.bf16.mxu0 (!%p165_p2), %v2370_v4  ;;  %2343 = vmatprep.subr.bf16.mxu1 (!%p165_p2), %v2370_v4  ;;  %v2392_v26 = vld [vmem:[%s3032_s1 + $0x88] sm:$0xff] (!%p165_p2)   ;;  %v2400_v30 = vld [vmem:[%s3032_s1 + $0x90] sm:$0xff] (!%p165_p2)   ;;  %v2401_v31 = vld [vmem:[%s3032_s1 + $0xd8] sm:$0xff] (!%p165_p2)  }
   0xd   : > { %s3037_s19 = smov (!%p192_p3, %s1853_s19), 63  ;;  %v2402_v34 = vld [vmem:[%s3032_s1 + $0x98] sm:$0xff]   ;;  %v2422_v35 = vld [vmem:[%s3032_s1 + $0x108] sm:$0xff]   ;;  %v2409_v37 = vld [vmem:[%s3032_s1 + $0xe0] sm:$0xff]  }
   0xe   : > { %s2357_s6 = smul.u32 20, %s3037_s19  ;;  %v2410_v39 = vld [vmem:[%s3032_s1 + $0xa0] sm:$0xff]   ;;  %v2411_v40 = vld [vmem:[%s3032_s1 + $0xe8] sm:$0xff]   ;;  %v2419_v46 = vld [vmem:[%s3032_s1 + $0xf0] sm:$0xff]   ;;  %s1856_s27 = sshll.u32 %s3037_s19, 2 }
   0xf   : > { %2062 = vmatpush3.bf16.msra.mxu0 %v2371_v5  ;;  %2351 = vmatpush3.bf16.msra.mxu1 %v2371_v5  ;;  %v2412_v43 = vld [vmem:[%s3032_s1 + $0xa8] sm:$0xff]   ;;  %v2442_v47 = vld [vmem:[%s3032_s1 + $0x110] sm:$0xff]   ;;  %v2421_v49 = vld [vmem:[%s3032_s1 + $0xf8] sm:$0xff]   ;;  %s2862_s30 = scalar_lea.vmem %s3035_s4, %s1856_s27 }
  0x10   : > { %2063 = vmatprep.subr.bf16.mxu0 %v2372_v6  ;;  %2344 = vmatprep.subr.bf16.mxu1 %v2372_v6  ;;  %s2588_s13 = scalar_lea.vmem %s3031_s0, %s2357_s6  ;;  %v2420_v48 = vld [vmem:[%s3032_s1 + $0xb0] sm:$0xff]   ;;  %v2423_v52 = vld [vmem:[%s3032_s1 + $0xb8] sm:$0xff]  }
  0x11   : > { %v2384_v11 = vld [vmem:[%s2588_s13 + $0x4] ss:$20 sps:$4 sm:$0xff]   ;;  %v2382_v20 = vld [vmem:[%s2588_s13] ss:$20 sps:$4 sm:$0xff]   ;;  %v2397_v27 = vld [vmem:[%s2588_s13 + $0x28] ss:$20 sps:$4 sm:$0xff]  }
  0x12   : > { %v2387_v12 = vld [vmem:[%s2588_s13 + $0x1e4] ss:$20 sps:$4 sm:$0xff]   ;;  %1070 = vmatprep.mubr.bf16.mxu0 %v2384_v11  ;;  %v2385_v21 = vld [vmem:[%s2588_s13 + $0x1e0] ss:$20 sps:$4 sm:$0xff]   ;;  %v2398_v29 = vld [vmem:[%s2588_s13 + $0x208] ss:$20 sps:$4 sm:$0xff]  }
  0x13   : > { %2064 = vmatpush3.bf16.msra.mxu0 %v2373_v7  ;;  %2352 = vmatpush3.bf16.msra.mxu1 %v2373_v7  ;;  %v2393_v24 = vld [vmem:[%s2588_s13 + $0x2c] ss:$20 sps:$4 sm:$0xff]   ;;  %v2403_v32 = vld [vmem:[%s2588_s13 + $0x54] ss:$20 sps:$4 sm:$0xff]   ;;  %v2407_v36 = vld [vmem:[%s2588_s13 + $0x50] ss:$20 sps:$4 sm:$0xff]  }
  0x14   : > { %2065 = vmatprep.subr.bf16.mxu0 %v2374_v8  ;;  %2345 = vmatprep.subr.bf16.mxu1 %v2374_v8  ;;  %v2395_v25 = vld [vmem:[%s2588_s13 + $0x20c] ss:$20 sps:$4 sm:$0xff]   ;;  %v2405_v33 = vld [vmem:[%s2588_s13 + $0x234] ss:$20 sps:$4 sm:$0xff]   ;;  %v2408_v38 = vld [vmem:[%s2588_s13 + $0x230] ss:$20 sps:$4 sm:$0xff]  }
  0x15   : > { %1166 = vmatprep.mubr.bf16.mxu1 %v2387_v12  ;;  %v2413_v41 = vld [vmem:[%s2588_s13 + $0x7c] ss:$20 sps:$4 sm:$0xff]   ;;  %v2417_v44 = vld [vmem:[%s2588_s13 + $0x78] ss:$20 sps:$4 sm:$0xff]   ;;  %v2429_v54 = vld [vmem:[%s2588_s13 + $0xa0] ss:$20 sps:$4 sm:$0xff]  }
  0x16   : > { %v2415_v42 = vld [vmem:[%s2588_s13 + $0x25c] ss:$20 sps:$4 sm:$0xff]   ;;  %v2418_v45 = vld [vmem:[%s2588_s13 + $0x258] ss:$20 sps:$4 sm:$0xff]   ;;  %v2432_v57 = vld [vmem:[%s2588_s13 + $0x34] ss:$20 sps:$4 sm:$0xff]  }
  0x17   : > { %2066 = vmatpush3.bf16.msra.mxu0 %v2375_v9  ;;  %2353 = vmatpush3.bf16.msra.mxu1 %v2375_v9  ;;  %v2424_v50 = vld [vmem:[%s2588_s13 + $0xa4] ss:$20 sps:$4 sm:$0xff]   ;;  %v2428_v51 = vld [vmem:[%s2588_s13 + $0xc] ss:$20 sps:$4 sm:$0xff]   ;;  %v2426_v53 = vld [vmem:[%s2588_s13 + $0x8] ss:$20 sps:$4 sm:$0xff]  }
  0x18   : > { %2067 = vmatprep.subr.bf16.mxu0 %v2376_v10  ;;  %2346 = vmatprep.subr.bf16.mxu1 %v2376_v10  ;;  %v2430_v55 = vld [vmem:[%s2588_s13 + $0xcc] ss:$20 sps:$4 sm:$0xff]   ;;  %v2461_v56 = vld [vmem:[%s3032_s1 + $0x118] sm:$0xff]   ;;  %v2435_v59 = vld [vmem:[%s2588_s13 + $0x30] ss:$20 sps:$4 sm:$0xff]  }
  0x19   : > { %v2434_v58 = vld [vmem:[%s2588_s13 + $0xc8] ss:$20 sps:$4 sm:$0xff]   ;;  %v2440_v62 = vld [vmem:[%s2588_s13 + $0xf0] ss:$20 sps:$4 sm:$0xff]   ;;  %v2441_v63 = vld [vmem:[%s2588_s13 + $0x58] ss:$20 sps:$4 sm:$0xff]  }
  0x1a   : > { %v2436_v60 = vld [vmem:[%s2588_s13 + $0xf4] ss:$20 sps:$4 sm:$0xff]   ;;  %v2438_v61 = vld [vmem:[%s2588_s13 + $0x5c] ss:$20 sps:$4 sm:$0xff]   ;;  %v2445_v1 = vld [vmem:[%s2588_s13 + $0x84] ss:$20 sps:$4 sm:$0xff]  }
  0x1b   : > { %2068 = vmatpush3.bf16.msra.mxu0 %v2377_v13  ;;  %2354 = vmatpush3.bf16.msra.mxu1 %v2377_v13  ;;  %v2443_v0 = vld [vmem:[%s2588_s13 + $0x11c] ss:$20 sps:$4 sm:$0xff]   ;;  %v2447_v2 = vld [vmem:[%s2588_s13 + $0x118] ss:$20 sps:$4 sm:$0xff]   ;;  %v2448_v3 = vld [vmem:[%s2588_s13 + $0x80] ss:$20 sps:$4 sm:$0xff]  }
  0x1c   : > { %2069 = vmatprep.subr.bf16.mxu0 %v2378_v14  ;;  %2347 = vmatprep.subr.bf16.mxu1 %v2378_v14  ;;  %v2449_v4 = vld [vmem:[%s2588_s13 + $0x144] ss:$20 sps:$4 sm:$0xff]   ;;  %v2451_v5 = vld [vmem:[%s2588_s13 + $0xac] ss:$20 sps:$4 sm:$0xff]   ;;  %v2454_v7 = vld [vmem:[%s2588_s13 + $0xa8] ss:$20 sps:$4 sm:$0xff]  }
  0x1d   : > { %v2453_v6 = vld [vmem:[%s2588_s13 + $0x140] ss:$20 sps:$4 sm:$0xff]   ;;  %v2459_v10 = vld [vmem:[%s2588_s13 + $0x168] ss:$20 sps:$4 sm:$0xff]   ;;  %v2460_v11 = vld [vmem:[%s2588_s13 + $0xd0] ss:$20 sps:$4 sm:$0xff]  }
  0x1e   : > { %v2455_v8 = vld [vmem:[%s2588_s13 + $0x16c] ss:$20 sps:$4 sm:$0xff]   ;;  %v2457_v9 = vld [vmem:[%s2588_s13 + $0xd4] ss:$20 sps:$4 sm:$0xff]   ;;  %v2464_v13 = vld [vmem:[%s2588_s13 + $0xfc] ss:$20 sps:$4 sm:$0xff]  }
  0x1f   : > { %2070 = vmatpush3.bf16.msra.mxu0 %v2379_v15  ;;  %2355 = vmatpush3.bf16.msra.mxu1 %v2379_v15  ;;  %v2462_v12 = vld [vmem:[%s2588_s13 + $0x194] ss:$20 sps:$4 sm:$0xff]   ;;  %v2466_v14 = vld [vmem:[%s2588_s13 + $0x190] ss:$20 sps:$4 sm:$0xff]   ;;  %v2467_v15 = vld [vmem:[%s2588_s13 + $0xf8] ss:$20 sps:$4 sm:$0xff]  }
  0x20   : > { %2071 = vmatprep.subr.bf16.mxu0 %v2380_v16  ;;  %2348 = vmatprep.subr.bf16.mxu1 %v2380_v16  ;;  %v2468_v16 = vld [vmem:[%s2588_s13 + $0x1bc] ss:$20 sps:$4 sm:$0xff]  }
  0x23   : > { %2072 = vmatpush3.bf16.msra.mxu0 %v2381_v17  ;;  %2356 = vmatpush3.bf16.msra.mxu1 %v2381_v17  ;;  %v2470_v17 = vld [vmem:[%s2588_s13 + $0x124] ss:$20 sps:$4 sm:$0xff]  }
  0x24   : > { %2169 = vmatprep.subr.bf16.mxu1 %v2388_v18  ;;  %2301 = vmatprep.subr.bf16.mxu0 %v2391_v19  ;;  %v2472_v18 = vld [vmem:[%s2588_s13 + $0x1b8] ss:$20 sps:$4 sm:$0xff]  }
  0x26   : > { %1071 = vmatmul.mubr.bf16.vlgmr.msra.gmra.mrb[0].mxu0 %v2382_v20  ;;  %1167 = vmatmul.mubr.bf16.vlgmr.msra.gmra.mrb[0].mxu1 %v2385_v21  ;;  %v2474_v20 = vld [vmem:[%s2588_s13 + $0x14c] ss:$20 sps:$4 sm:$0xff]   ;;  %v2476_v21 = vld [vmem:[%s2588_s13 + $0x10] ss:$20 sps:$4 sm:$0xff]  }
  0x27   : > { %2170 = vmatpush3.bf16.msra.mxu1 %v2389_v22  ;;  %2302 = vmatpush3.bf16.msra.mxu0 %v2391_v19  ;;  %v2473_v19 = vld [vmem:[%s2588_s13 + $0x120] ss:$20 sps:$4 sm:$0xff]   ;;  %v2477_v22 = vld [vmem:[%s2588_s13 + $0x148] ss:$20 sps:$4 sm:$0xff]  }
  0x28   : > { %2171 = vmatprep.subr.bf16.mxu1 %v2390_v23  ;;  %1078 = vmatprep.mubr.bf16.mxu0 %v2393_v24  ;;  %v2478_v23 = vld [vmem:[%s2588_s13 + $0x38] ss:$20 sps:$4 sm:$0xff]   ;;  %v2479_v24 = vld [vmem:[%s2588_s13 + $0x174] ss:$20 sps:$4 sm:$0xff]  }
  0x29   : > { %1174 = vmatprep.mubr.bf16.mxu1 %v2395_v25  ;;  %2303 = vmatprep.subr.bf16.mxu0 %v2422_v35  ;;  %v2481_v25 = vld [vmem:[%s2588_s13 + $0x60] ss:$20 sps:$4 sm:$0xff]  }
  0x2b   : > { %2172 = vmatpush3.bf16.msra.mxu1 %v2392_v26  ;;  %2304 = vmatpush3.bf16.msra.mxu0 %v2422_v35  ;;  %v2482_v26 = vld [vmem:[%s2588_s13 + $0x170] ss:$20 sps:$4 sm:$0xff]   ;;  %v2493_v35 = vld [vmem:[%s2588_s13 + $0x128] ss:$20 sps:$4 sm:$0xff]  }
  0x2c   : > { %2173 = vmatprep.subr.bf16.mxu1 %v2399_v28  ;;  %2305 = vmatprep.subr.bf16.mxu0 %v2442_v47  ;;  %v2484_v28 = vld [vmem:[%s2588_s13 + $0x19c] ss:$20 sps:$4 sm:$0xff]  }
  0x2e   : > { %1079 = vmatmul.mubr.bf16.gmra.mrb[4].mxu0 %v2397_v27  ;;  %1175 = vmatmul.mubr.bf16.gmra.mrb[4].mxu1 %v2398_v29  ;;  %v2483_v27 = vld [vmem:[%s2588_s13 + $0x88] ss:$20 sps:$4 sm:$0xff]   ;;  %v2486_v29 = vld [vmem:[%s2588_s13 + $0xb0] ss:$20 sps:$4 sm:$0xff]  }
  0x2f   : > { %2174 = vmatpush3.bf16.msra.mxu1 %v2400_v30  ;;  %1086 = vmatprep.mubr.bf16.mxu0 %v2403_v32  ;;  %v2487_v30 = vld [vmem:[%s2588_s13 + $0x198] ss:$20 sps:$4 sm:$0xff]  }
  0x30   : > { %2175 = vmatprep.subr.bf16.mxu1 %v2401_v31  ;;  %1182 = vmatprep.mubr.bf16.mxu1 %v2405_v33  ;;  %v2488_v31 = vld [vmem:[%s2588_s13 + $0xd8] ss:$20 sps:$4 sm:$0xff]   ;;  %v2491_v33 = vld [vmem:[%s2588_s13 + $0x100] ss:$20 sps:$4 sm:$0xff]  }
  0x31   : > { %2306 = vmatpush3.bf16.msra.mxu0 %v2442_v47  ;;  %v2489_v32 = vld [vmem:[%s2588_s13 + $0x1c4] ss:$20 sps:$4 sm:$0xff]  }
  0x32   : > { %2307 = vmatprep.subr.bf16.mxu0 %v2461_v56  ;;  %v2508_v47 = vld [vmem:[%s2588_s13 + $0x218] ss:$20 sps:$4 sm:$0xff]  }
  0x33   : > { %2176 = vmatpush3.bf16.msra.mxu1 %v2402_v34  ;;  %v2492_v34 = vld [vmem:[%s2588_s13 + $0x1c0] ss:$20 sps:$4 sm:$0xff]  }
  0x34   : > { %2177 = vmatprep.subr.bf16.mxu1 %v2409_v37  ;;  %v2496_v37 = vld [vmem:[%s2588_s13 + $0x150] ss:$20 sps:$4 sm:$0xff]  }
  0x35   : > { %2308 = vmatpush3.bf16.msra.mxu0 %v2461_v56 }
  0x36   : > { %1087 = vmatmul.mubr.bf16.gmra.mrb[8].mxu0 %v2407_v36  ;;  %1183 = vmatmul.mubr.bf16.gmra.mrb[8].mxu1 %v2408_v38  ;;  %v2494_v36 = vld [vmem:[%s2588_s13 + $0x1ec] ss:$20 sps:$4 sm:$0xff]   ;;  %v2497_v38 = vld [vmem:[%s2588_s13 + $0x1e8] ss:$20 sps:$4 sm:$0xff]  }
  0x37   : > { %2178 = vmatpush3.bf16.msra.mxu1 %v2410_v39  ;;  %1094 = vmatprep.mubr.bf16.mxu0 %v2413_v41  ;;  %v2498_v39 = vld [vmem:[%s2588_s13 + $0x178] ss:$20 sps:$4 sm:$0xff]   ;;  %v2501_v41 = vld [vmem:[%s2588_s13 + $0x1a0] ss:$20 sps:$4 sm:$0xff]  }
  0x38   : > { %2179 = vmatprep.subr.bf16.mxu1 %v2411_v40  ;;  %1190 = vmatprep.mubr.bf16.mxu1 %v2415_v42  ;;  %v2499_v40 = vld [vmem:[%s2588_s13 + $0x214] ss:$20 sps:$4 sm:$0xff]   ;;  %v2502_v42 = vld [vmem:[%s2588_s13 + $0x210] ss:$20 sps:$4 sm:$0xff]  }
  0x3b   : > { %2180 = vmatpush3.bf16.msra.mxu1 %v2412_v43  ;;  %v2503_v43 = vld [vmem:[%s2588_s13 + $0x1c8] ss:$20 sps:$4 sm:$0xff]  }
  0x3c   : > { %2181 = vmatprep.subr.bf16.mxu1 %v2419_v46  ;;  %v2507_v46 = vld [vmem:[%s2588_s13 + $0x238] ss:$20 sps:$4 sm:$0xff]  }
  0x3e   : > { %1095 = vmatmul.mubr.bf16.gmra.mrb[12].mxu0 %v2417_v44  ;;  %1191 = vmatmul.mubr.bf16.gmra.mrb[12].mxu1 %v2418_v45  ;;  %v2504_v44 = vld [vmem:[%s2588_s13 + $0x23c] ss:$20 sps:$4 sm:$0xff]  }
  0x3f   : > { %2182 = vmatpush3.bf16.msra.mxu1 %v2420_v48  ;;  %1102 = vmatprep.mubr.bf16.mxu0 %v2424_v50  ;;  %v2506_v45 = vld [vmem:[%s2588_s13 + $0x1f0] ss:$20 sps:$4 sm:$0xff]   ;;  %v2512_v50 = vld [vmem:[%s2588_s13 + $0x260] ss:$20 sps:$4 sm:$0xff]  }
  0x40   : > { %2183 = vmatprep.subr.bf16.mxu1 %v2421_v49  ;;  %1231 = vmatprep.mubr.bf16.mxu1 %v2428_v51  ;;  %v2509_v48 = vld [vmem:[%s2588_s13 + $0x264] ss:$20 sps:$4 sm:$0xff]   ;;  %v2511_v49 = vld [vmem:[%s2588_s13 + $0x240] ss:$20 sps:$4 sm:$0xff]   ;;  %v2513_v51 = vld [vmem:[%s2588_s13 + $0x268] ss:$20 sps:$4 sm:$0xff]  }
  0x43   : > { %2184 = vmatpush3.bf16.msra.mxu1 %v2423_v52 }
  0x46   : > { %1103 = vmatmul.mubr.bf16.gmra.mrb[16].mxu0 %v2429_v54  ;;  %1232 = vmatmul.mubr.bf16.vlgmr.msra.gmra.mrb[16].mxu1 %v2426_v53 }
  0x47   : > { %1110 = vmatprep.mubr.bf16.mxu0 %v2430_v55  ;;  %1239 = vmatprep.mubr.bf16.mxu1 %v2432_v57 }
  0x4e   : > { %1111 = vmatmul.mubr.bf16.gmra.mrb[20].mxu0 %v2434_v58  ;;  %1240 = vmatmul.mubr.bf16.gmra.mrb[20].mxu1 %v2435_v59 }
  0x4f   : > { %1118 = vmatprep.mubr.bf16.mxu0 %v2436_v60  ;;  %1247 = vmatprep.mubr.bf16.mxu1 %v2438_v61 }
  0x56   : > { %1119 = vmatmul.mubr.bf16.gmra.mrb[24].mxu0 %v2440_v62  ;;  %1248 = vmatmul.mubr.bf16.gmra.mrb[24].mxu1 %v2441_v63 }
  0x57   : > { %1126 = vmatprep.mubr.bf16.mxu0 %v2443_v0  ;;  %1255 = vmatprep.mubr.bf16.mxu1 %v2445_v1 }
  0x5e   : > { %1127 = vmatmul.mubr.bf16.gmra.mrb[28].mxu0 %v2447_v2  ;;  %1256 = vmatmul.mubr.bf16.gmra.mrb[28].mxu1 %v2448_v3 }
  0x5f   : > { %1134 = vmatprep.mubr.bf16.mxu0 %v2449_v4  ;;  %1263 = vmatprep.mubr.bf16.mxu1 %v2451_v5 }
  0x66   : > { %1135 = vmatmul.mubr.bf16.gmra.mrb[32].mxu0 %v2453_v6  ;;  %1264 = vmatmul.mubr.bf16.gmra.mrb[32].mxu1 %v2454_v7 }
  0x67   : > { %1142 = vmatprep.mubr.bf16.mxu0 %v2455_v8  ;;  %1271 = vmatprep.mubr.bf16.mxu1 %v2457_v9 }
  0x6e   : > { %1143 = vmatmul.mubr.bf16.gmra.mrb[36].mxu0 %v2459_v10  ;;  %1272 = vmatmul.mubr.bf16.gmra.mrb[36].mxu1 %v2460_v11 }
  0x6f   : > { %1150 = vmatprep.mubr.bf16.mxu0 %v2462_v12  ;;  %1279 = vmatprep.mubr.bf16.mxu1 %v2464_v13 }
  0x76   : > { %1151 = vmatmul.mubr.bf16.gmra.mrb[40].mxu0 %v2466_v14  ;;  %1280 = vmatmul.mubr.bf16.gmra.mrb[40].mxu1 %v2467_v15 }
  0x77   : > { %1158 = vmatprep.mubr.bf16.mxu0 %v2468_v16  ;;  %1287 = vmatprep.mubr.bf16.mxu1 %v2470_v17 }
  0x7e   : > { %1159 = vmatmul.mubr.bf16.gmra.mrb[44].mxu0 %v2472_v18  ;;  %1288 = vmatmul.mubr.bf16.gmra.mrb[44].mxu1 %v2473_v19 }
  0x7f   : > { %1295 = vmatprep.mubr.bf16.mxu1 %v2474_v20  ;;  %2309 = vmatprep.mubr.msk.bf16.mxu0 %vm989_vm0, %v2476_v21 }
  0x86   : > { %1296 = vmatmul.mubr.bf16.gmra.mrb[48].mxu1 %v2477_v22  ;;  %2310 = vmatmul.mubr.msk.bf16.vlgmr.msra.gmra.mrb[48].mxu0 %vm989_vm0, %v2478_v23 }
  0x87   : > { %1303 = vmatprep.mubr.bf16.mxu1 %v2479_v24  ;;  %2313 = vmatprep.mubr.msk.bf16.mxu0 %vm989_vm0, %v2481_v25 }
  0x8e   : > { %1304 = vmatmul.mubr.bf16.gmra.mrb[52].mxu1 %v2482_v26  ;;  %2314 = vmatmul.mubr.msk.bf16.gmra.mrb[52].mxu0 %vm989_vm0, %v2483_v27 }
  0x8f   : > { %1311 = vmatprep.mubr.bf16.mxu1 %v2484_v28  ;;  %2317 = vmatprep.mubr.msk.bf16.mxu0 %vm989_vm0, %v2486_v29 }
  0x96   : > { %1312 = vmatmul.mubr.bf16.gmra.mrb[56].mxu1 %v2487_v30  ;;  %2318 = vmatmul.mubr.msk.bf16.gmra.mrb[56].mxu0 %vm989_vm0, %v2488_v31 }
  0x97   : > { %1319 = vmatprep.mubr.bf16.mxu1 %v2489_v32  ;;  %2321 = vmatprep.mubr.msk.bf16.mxu0 %vm989_vm0, %v2491_v33 }
  0x9e   : > { %1320 = vmatmul.mubr.bf16.gmra.mrb[60].mxu1 %v2492_v34  ;;  %2322 = vmatmul.mubr.msk.bf16.gmra.mrb[60].mxu0 %vm989_vm0, %v2493_v35 }
  0x9f   : > { %1327 = vmatprep.mubr.bf16.mxu1 %v2494_v36  ;;  %2325 = vmatprep.mubr.msk.bf16.mxu0 %vm989_vm0, %v2496_v37 }
  0xa6   : > { %1328 = vmatmul.mubr.bf16.gmra.mrb[64].mxu1 %v2497_v38  ;;  %2326 = vmatmul.mubr.msk.bf16.gmra.mrb[64].mxu0 %vm989_vm0, %v2498_v39 }
  0xa7   : > { %1335 = vmatprep.mubr.bf16.mxu1 %v2499_v40  ;;  %2329 = vmatprep.mubr.msk.bf16.mxu0 %vm989_vm0, %v2501_v41 }
  0xae   : > { %1336 = vmatmul.mubr.bf16.gmra.mrb[68].mxu1 %v2502_v42  ;;  %2330 = vmatmul.mubr.msk.bf16.gmra.mrb[68].mxu0 %vm989_vm0, %v2503_v43 }
  0xaf   : > { %1343 = vmatprep.mubr.bf16.mxu1 %v2504_v44  ;;  %2333 = vmatprep.mubr.msk.bf16.mxu0 %vm989_vm0, %v2506_v45 }
  0xb6   : > { %1344 = vmatmul.mubr.bf16.gmra.mrb[72].mxu1 %v2507_v46  ;;  %2334 = vmatmul.mubr.msk.bf16.gmra.mrb[72].mxu0 %vm989_vm0, %v2508_v47 }
  0xb7   : > { %1351 = vmatprep.mubr.bf16.mxu1 %v2509_v48  ;;  %2337 = vmatprep.mubr.msk.bf16.mxu0 %vm989_vm0, %v2511_v49 }
  0xbe   : > { %1352 = vmatmul.mubr.bf16.gmra.mrb[76].mxu1 %v2512_v50  ;;  %2338 = vmatmul.mubr.msk.bf16.gmra.mrb[76].mxu0 %vm989_vm0, %v2513_v51 }
  0xf9   : > { %v2145_v52 = vpop.f32.mrb[0].mxu1  ;;  %v2073_v53 = vpop.f32.mrb[0].mxu0 }
  0xfa   : > { %v2146_v54 = vpop.f32.mrb[1].mxu1  ;;  %v2074_v55 = vpop.f32.mrb[1].mxu0 }
  0xfb   : > { %v2767_v56 = vadd.f32 %v2146_v54, %v2145_v52  ;;  %v2148_v57 = vpop.f32.mrb[2].mxu1  ;;  %v2075_v58 = vadd.f32 %v2074_v55, %v2073_v53  ;;  %v2076_v59 = vpop.f32.mrb[2].mxu0 }
  0xfc   : > { %v2149_v60 = vpop.f32.mrb[3].mxu1  ;;  %v2077_v61 = vpop.f32.mrb[3].mxu0 }
  0xfd   : > { %v2769_v62 = vadd.f32 %v2149_v60, %v2148_v57  ;;  %v2078_v63 = vadd.f32 %v2077_v61, %v2076_v59 }
 0x101   : > { %v2151_v0 = vpop.f32.mrb[4].mxu1  ;;  %v2079_v1 = vpop.f32.mrb[4].mxu0 }
 0x102   : > { %v2152_v2 = vpop.f32.mrb[5].mxu1  ;;  %v2080_v3 = vpop.f32.mrb[5].mxu0 }
 0x103   : > { %v2771_v4 = vadd.f32 %v2152_v2, %v2151_v0  ;;  %v2154_v5 = vpop.f32.mrb[6].mxu1  ;;  %v2081_v6 = vadd.f32 %v2080_v3, %v2079_v1  ;;  %v2082_v7 = vpop.f32.mrb[6].mxu0 }
 0x104   : > { %v2155_v8 = vpop.f32.mrb[7].mxu1  ;;  %v2083_v9 = vpop.f32.mrb[7].mxu0 }
 0x105   : > { %v2773_v10 = vadd.f32 %v2155_v8, %v2154_v5  ;;  %v2084_v11 = vadd.f32 %v2083_v9, %v2082_v7 }
 0x109   : > { %v2157_v12 = vpop.f32.mrb[8].mxu1  ;;  %v2085_v13 = vpop.f32.mrb[8].mxu0 }
 0x10a   : > { %v2158_v14 = vpop.f32.mrb[9].mxu1  ;;  %v2086_v15 = vpop.f32.mrb[9].mxu0 }
 0x10b   : > { %v2775_v16 = vadd.f32 %v2158_v14, %v2157_v12  ;;  %v2160_v17 = vpop.f32.mrb[10].mxu1  ;;  %v2087_v18 = vadd.f32 %v2086_v15, %v2085_v13  ;;  %v2088_v19 = vpop.f32.mrb[10].mxu0 }
 0x10c   : > { %v2161_v20 = vpop.f32.mrb[11].mxu1  ;;  %v2089_v21 = vpop.f32.mrb[11].mxu0 }
 0x10d   : > { %v2777_v22 = vadd.f32 %v2161_v20, %v2160_v17  ;;  %v2090_v23 = vadd.f32 %v2089_v21, %v2088_v19 }
 0x111   : > { %v2163_v24 = vpop.f32.mrb[12].mxu1  ;;  %v2091_v25 = vpop.f32.mrb[12].mxu0 }
 0x112   : > { %v2164_v26 = vpop.f32.mrb[13].mxu1  ;;  %v2092_v27 = vpop.f32.mrb[13].mxu0 }
 0x113   : > { %v2779_v28 = vadd.f32 %v2164_v26, %v2163_v24  ;;  %v2166_v29 = vpop.f32.mrb[14].mxu1  ;;  %v2093_v30 = vadd.f32 %v2092_v27, %v2091_v25  ;;  %v2094_v31 = vpop.f32.mrb[14].mxu0 }
 0x114   : > { %v2167_v32 = vpop.f32.mrb[15].mxu1  ;;  %v2095_v33 = vpop.f32.mrb[15].mxu0 }
 0x115   : > { %v2781_v34 = vadd.f32 %v2167_v32, %v2166_v29  ;;  %v2096_v35 = vadd.f32 %v2095_v33, %v2094_v31 }
 0x119   : > { %v2185_v36 = vpop.f32.mrb[16].mxu1  ;;  %v2097_v37 = vpop.f32.mrb[16].mxu0 }
 0x11a   : > { %v2186_v38 = vpop.f32.mrb[17].mxu1  ;;  %v2098_v39 = vpop.f32.mrb[17].mxu0 }
 0x11b   : > { %v2187_v40 = vadd.f32 %v2186_v38, %v2185_v36  ;;  %v2188_v41 = vpop.f32.mrb[18].mxu1  ;;  %v2099_v42 = vadd.f32 %v2098_v39, %v2097_v37  ;;  %v2100_v43 = vpop.f32.mrb[18].mxu0 }
 0x11c   : > { %v2189_v44 = vpop.f32.mrb[19].mxu1  ;;  %v2101_v45 = vpop.f32.mrb[19].mxu0 }
 0x11d   : > { %v2190_v46 = vadd.f32 %v2189_v44, %v2188_v41  ;;  %v2102_v47 = vadd.f32 %v2101_v45, %v2100_v43  ;;  %v2783_v48 = vadd.f32 %v2187_v40, %v2075_v58 }
 0x11f   : > { %v2785_v49 = vadd.f32 %v2190_v46, %v2078_v63 }
 0x121   : > { %v2191_v50 = vpop.f32.mrb[20].mxu1  ;;  %v2103_v51 = vpop.f32.mrb[20].mxu0 }
 0x122   : > { %v2192_v52 = vpop.f32.mrb[21].mxu1  ;;  %v2104_v53 = vpop.f32.mrb[21].mxu0 }
 0x123   : > { %v2193_v54 = vadd.f32 %v2192_v52, %v2191_v50  ;;  %v2194_v55 = vpop.f32.mrb[22].mxu1  ;;  %v2105_v57 = vadd.f32 %v2104_v53, %v2103_v51  ;;  %v2106_v59 = vpop.f32.mrb[22].mxu0 }
 0x124   : > { %v2195_v60 = vpop.f32.mrb[23].mxu1  ;;  %v2107_v61 = vpop.f32.mrb[23].mxu0 }
 0x125   : > { %v2196_v0 = vadd.f32 %v2195_v60, %v2194_v55  ;;  %v2108_v1 = vadd.f32 %v2107_v61, %v2106_v59  ;;  %v2787_v2 = vadd.f32 %v2193_v54, %v2081_v6 }
 0x127   : > { %v2789_v3 = vadd.f32 %v2196_v0, %v2084_v11 }
 0x129   : > { %v2197_v58 = vpop.f32.mrb[24].mxu1  ;;  %v2109_v5 = vpop.f32.mrb[24].mxu0 }
 0x12a   : > { %v2198_v63 = vpop.f32.mrb[25].mxu1  ;;  %v2110_v7 = vpop.f32.mrb[25].mxu0 }
 0x12b   : > { %v2199_v8 = vadd.f32 %v2198_v63, %v2197_v58  ;;  %v2200_v9 = vpop.f32.mrb[26].mxu1  ;;  %v2111_v12 = vadd.f32 %v2110_v7, %v2109_v5  ;;  %v2112_v13 = vpop.f32.mrb[26].mxu0 }
 0x12c   : > { %v2201_v14 = vpop.f32.mrb[27].mxu1  ;;  %v2113_v15 = vpop.f32.mrb[27].mxu0 }
 0x12d   : > { %v2202_v17 = vadd.f32 %v2201_v14, %v2200_v9  ;;  %v2114_v19 = vadd.f32 %v2113_v15, %v2112_v13  ;;  %v2791_v20 = vadd.f32 %v2199_v8, %v2087_v18 }
 0x12f   : > { %v2793_v21 = vadd.f32 %v2202_v17, %v2090_v23 }
 0x131   : > { %v2203_v6 = vpop.f32.mrb[28].mxu1  ;;  %v2115_v24 = vpop.f32.mrb[28].mxu0 }
 0x132   : > { %v2204_v11 = vpop.f32.mrb[29].mxu1  ;;  %v2116_v25 = vpop.f32.mrb[29].mxu0 }
 0x133   : > { %v2205_v26 = vadd.f32 %v2204_v11, %v2203_v6  ;;  %v2206_v27 = vpop.f32.mrb[30].mxu1  ;;  %v2117_v29 = vadd.f32 %v2116_v25, %v2115_v24  ;;  %v2118_v31 = vpop.f32.mrb[30].mxu0 }
 0x134   : > { %v2207_v32 = vpop.f32.mrb[31].mxu1  ;;  %v2119_v33 = vpop.f32.mrb[31].mxu0 }
 0x135   : > { %v2208_v36 = vadd.f32 %v2207_v32, %v2206_v27  ;;  %v2120_v37 = vadd.f32 %v2119_v33, %v2118_v31  ;;  %v2795_v38 = vadd.f32 %v2205_v26, %v2093_v30 }
 0x137   : > { %v2797_v39 = vadd.f32 %v2208_v36, %v2096_v35 }
 0x139   : > { %v2209_v18 = vpop.f32.mrb[32].mxu1  ;;  %v2121_v40 = vpop.f32.mrb[32].mxu0 }
 0x13a   : > { %v2210_v23 = vpop.f32.mrb[33].mxu1  ;;  %v2122_v41 = vpop.f32.mrb[33].mxu0 }
 0x13b   : > { %v2211_v43 = vadd.f32 %v2210_v23, %v2209_v18  ;;  %v2212_v44 = vpop.f32.mrb[34].mxu1  ;;  %v2799_v45 = vadd.f32 %v2122_v41, %v2121_v40  ;;  %v2124_v46 = vpop.f32.mrb[34].mxu0 }
 0x13c   : > { %v2213_v50 = vpop.f32.mrb[35].mxu1  ;;  %v2125_v51 = vpop.f32.mrb[35].mxu0 }
 0x13d   : > { %v2214_v52 = vadd.f32 %v2213_v50, %v2212_v44  ;;  %v2801_v53 = vadd.f32 %v2125_v51, %v2124_v46  ;;  %v2803_v54 = vadd.f32 %v2211_v43, %v2099_v42 }
 0x13f   : > { %v2805_v30 = vadd.f32 %v2214_v52, %v2102_v47 }
 0x141   : > { %v2215_v35 = vpop.f32.mrb[36].mxu1  ;;  %v2127_v55 = vpop.f32.mrb[36].mxu0 }
 0x142   : > { %v2216_v59 = vpop.f32.mrb[37].mxu1  ;;  %v2128_v60 = vpop.f32.mrb[37].mxu0 }
 0x143   : > { %v2217_v61 = vadd.f32 %v2216_v59, %v2215_v35  ;;  %v2218_v0 = vpop.f32.mrb[38].mxu1  ;;  %v2807_v58 = vadd.f32 %v2128_v60, %v2127_v55  ;;  %v2130_v5 = vpop.f32.mrb[38].mxu0  ;;  %v2834_v59 = vld [vmem:[%s3033_s2] ss:$0 sm:$0xff] }
 0x144   : > { %v2219_v63 = vpop.f32.mrb[39].mxu1  ;;  %v2131_v7 = vpop.f32.mrb[39].mxu0 }
 0x145   : > { %v2220_v8 = vadd.f32 %v2219_v63, %v2218_v0  ;;  %v2809_v9 = vadd.f32 %v2131_v7, %v2130_v5  ;;  %v2811_v13 = vadd.f32 %v2217_v61, %v2105_v57  ;;  %v2840_v5 = vld [vmem:[%s3034_s3] ss:$0 sm:$0xff] }
 0x147   : > { %v2813_v42 = vadd.f32 %v2220_v8, %v2108_v1 }
 0x149   : > { %v2221_v47 = vpop.f32.mrb[40].mxu1  ;;  %v2133_v14 = vpop.f32.mrb[40].mxu0 }
 0x14a   : > { %v2222_v15 = vpop.f32.mrb[41].mxu1  ;;  %v2134_v17 = vpop.f32.mrb[41].mxu0 }
 0x14b   : > { %v2223_v6 = vadd.f32 %v2222_v15, %v2221_v47  ;;  %v2224_v24 = vpop.f32.mrb[42].mxu1  ;;  %v2815_v11 = vadd.f32 %v2134_v17, %v2133_v14  ;;  %v2136_v25 = vpop.f32.mrb[42].mxu0 }
 0x14c   : > { %v2225_v26 = vpop.f32.mrb[43].mxu1  ;;  %v2137_v27 = vpop.f32.mrb[43].mxu0 }
 0x14d   : > { %v2226_v31 = vadd.f32 %v2225_v26, %v2224_v24  ;;  %v2817_v32 = vadd.f32 %v2137_v27, %v2136_v25  ;;  %v2819_v33 = vadd.f32 %v2223_v6, %v2111_v12 }
 0x14f   : > { %v2821_v57 = vadd.f32 %v2226_v31, %v2114_v19 }
 0x151   : > { %v2227_v1 = vpop.f32.mrb[44].mxu1  ;;  %v2139_v36 = vpop.f32.mrb[44].mxu0 }
 0x152   : > { %v2228_v18 = vpop.f32.mrb[45].mxu1  ;;  %v2140_v40 = vpop.f32.mrb[45].mxu0 }
 0x153   : > { %v2229_v23 = vadd.f32 %v2228_v18, %v2227_v1  ;;  %v2230_v41 = vpop.f32.mrb[46].mxu1  ;;  %v2823_v43 = vadd.f32 %v2140_v40, %v2139_v36  ;;  %v2142_v44 = vpop.f32.mrb[46].mxu0 }
 0x154   : > { %v2231_v46 = vpop.f32.mrb[47].mxu1  ;;  %v2143_v50 = vpop.f32.mrb[47].mxu0 }
 0x155   : > { %v2232_v51 = vadd.f32 %v2231_v46, %v2230_v41  ;;  %v2825_v52 = vadd.f32 %v2143_v50, %v2142_v44  ;;  %v2827_v35 = vadd.f32 %v2229_v23, %v2117_v29 }
 0x157   : > { %v2829_v12 = vadd.f32 %v2232_v51, %v2120_v37 }
 0x159   : > { %v2233_v19 = vpop.f32.mrb[48].mxu1  ;;  %v2311_v55 = vpop.f32.mrb[48].mxu0 }
 0x15a   : > { %v1403_v60 = vadd.f32 %v2311_v55, %v2787_v2  ;;  %v2234_v61 = vpop.f32.mrb[49].mxu1  ;;  %v1394_v0 = vpop.f32.mrb[49].mxu0 }
 0x15b   : > { %v2235_v29 = vadd.f32 %v2234_v61, %v2233_v19  ;;  %v1395_v37 = vadd.f32 %v1394_v0, %v2783_v48  ;;  %v2236_v63 = vpop.f32.mrb[50].mxu1  ;;  %v2312_v7 = vpop.f32.mrb[50].mxu0 }
 0x15c   : > { %v1530_v8 = vmul.f32 %v2834_v59, %v1403_v60  ;;  %v1406_v47 = vadd.f32 %v2312_v7, %v2789_v3  ;;  %v2237_v14 = vpop.f32.mrb[51].mxu1  ;;  %v1397_v15 = vpop.f32.mrb[51].mxu0 }
 0x15d   : > { %v1528_v2 = vmul.f32 %v2834_v59, %v1395_v37  ;;  %v2238_v17 = vadd.f32 %v2237_v14, %v2236_v63  ;;  %v1398_v6 = vadd.f32 %v1397_v15, %v2785_v49  ;;  %v2848_v24 = vadd.f32 %v2235_v29, %v2799_v45 }
 0x15e   : > { %v1569_v25 = vadd.f32 %v2840_v5, %v1530_v8  ;;  %v1531_v48 = vmul.f32 %v2834_v59, %v1406_v47 }
 0x15f   : > { %v1567_v26 = vadd.f32 %v2840_v5, %v1528_v2  ;;  %v1529_v27 = vmul.f32 %v2834_v59, %v1398_v6  ;;  %v2856_v3 = vadd.f32 %v2238_v17, %v2801_v53 }
 0x160   : > { %v1601_v31 = vmax.f32 %v1569_v25, 0.0  ;;  %v1570_v1 = vadd.f32 %v2840_v5, %v1531_v48 }
 0x161   : > { %v1599_v49 = vmax.f32 %v1567_v26, 0.0  ;;  %v1568_v45 = vadd.f32 %v2840_v5, %v1529_v27  ;;  %v2239_v36 = vpop.f32.mrb[52].mxu1  ;;  %v2315_v18 = vpop.f32.mrb[52].mxu0 }
 0x162   : > { %v2027_v40 = vpack.c.bf16 %v1601_v31, %v1601_v31  ;;  %v1602_v23 = vmax.f32 %v1570_v1, 0.0  ;;  %v1419_v53 = vadd.f32 %v2315_v18, %v2795_v38  ;;  %v2240_v41 = vpop.f32.mrb[53].mxu1  ;;  %v1410_v44 = vpop.f32.mrb[53].mxu0 }
 0x163   : > { %v2025_v46 = vpack.c.bf16 %v1599_v49, %v1599_v49  ;;  %v1600_v50 = vmax.f32 %v1568_v45, 0.0  ;;  %v2241_v51 = vadd.f32 %v2240_v41, %v2239_v36  ;;  %v1411_v19 = vadd.f32 %v1410_v44, %v2791_v20  ;;  %v2242_v55 = vpop.f32.mrb[54].mxu1  ;;  %v2316_v60 = vpop.f32.mrb[54].mxu0 }
 0x164   : > { %1762 = vst.msk [vmem:[%s2862_s30 + $0x8] sm:$0xf] %vm1759_vm1, %v2027_v40  ;;  %v2028_v61 = vpack.c.bf16 %v1602_v23, %v1602_v23  ;;  %v1534_v0 = vmul.f32 %v2834_v59, %v1419_v53  ;;  %v1422_v29 = vadd.f32 %v2316_v60, %v2797_v39  ;;  %v2243_v37 = vpop.f32.mrb[55].mxu1  ;;  %v1413_v38 = vpop.f32.mrb[55].mxu0 }
 0x165   : > { %1760 = vst.msk [vmem:[%s2862_s30] sm:$0xf] %vm1759_vm1, %v2025_v46  ;;  %v2026_v63 = vpack.c.bf16 %v1600_v50, %v1600_v50  ;;  %v1532_v7 = vmul.f32 %v2834_v59, %v1411_v19  ;;  %v2244_v8 = vadd.f32 %v2243_v37, %v2242_v55  ;;  %v1414_v20 = vadd.f32 %v1413_v38, %v2793_v21 }
 0x166   : > { %1763 = vst.msk [vmem:[%s2862_s30 + $0xc] sm:$0xf] %vm1759_vm1, %v2028_v61  ;;  %v1573_v47 = vadd.f32 %v2840_v5, %v1534_v0  ;;  %v1535_v14 = vmul.f32 %v2834_v59, %v1422_v29  ;;  %v2880_v15 = vadd.f32 %v2241_v51, %v2807_v58 }
 0x167   : > { %1761 = vst.msk [vmem:[%s2862_s30 + $0x4] sm:$0xf] %vm1759_vm1, %v2026_v63  ;;  %v1571_v39 = vadd.f32 %v2840_v5, %v1532_v7  ;;  %v1533_v2 = vmul.f32 %v2834_v59, %v1414_v20  ;;  %v2887_v17 = vadd.f32 %v2244_v8, %v2809_v9 }
 0x168   : > { %v1605_v6 = vmax.f32 %v1573_v47, 0.0  ;;  %v1574_v21 = vadd.f32 %v2840_v5, %v1535_v14 }
 0x169   : > { %v1603_v25 = vmax.f32 %v1571_v39, 0.0  ;;  %v1572_v48 = vadd.f32 %v2840_v5, %v1533_v2  ;;  %v2245_v26 = vpop.f32.mrb[56].mxu1  ;;  %v2319_v27 = vpop.f32.mrb[56].mxu0 }
 0x16a   : > { %v2031_v58 = vpack.c.bf16 %v1605_v6, %v1605_v6  ;;  %v1606_v31 = vmax.f32 %v1574_v21, 0.0  ;;  %v1435_v1 = vadd.f32 %v2319_v27, %v2811_v13  ;;  %v2246_v49 = vpop.f32.mrb[57].mxu1  ;;  %v1426_v45 = vpop.f32.mrb[57].mxu0 }
 0x16b   : > { %v2029_v36 = vpack.c.bf16 %v1603_v25, %v1603_v25  ;;  %v1604_v18 = vmax.f32 %v1572_v48, 0.0  ;;  %v2247_v9 = vadd.f32 %v2246_v49, %v2245_v26  ;;  %v1427_v40 = vadd.f32 %v1426_v45, %v2803_v54  ;;  %v2248_v23 = vpop.f32.mrb[58].mxu1  ;;  %v2320_v53 = vpop.f32.mrb[58].mxu0 }
 0x16c   : > { %1766 = vst.msk [vmem:[%s2862_s30 + $0x18] sm:$0xf] %vm1759_vm1, %v2031_v58  ;;  %v2032_v41 = vpack.c.bf16 %v1606_v31, %v1606_v31  ;;  %v1538_v44 = vmul.f32 %v2834_v59, %v1435_v1  ;;  %v1438_v46 = vadd.f32 %v2320_v53, %v2813_v42  ;;  %v2249_v50 = vpop.f32.mrb[59].mxu1  ;;  %v1429_v13 = vpop.f32.mrb[59].mxu0 }
 0x16d   : > { %1764 = vst.msk [vmem:[%s2862_s30 + $0x10] sm:$0xf] %vm1759_vm1, %v2029_v36  ;;  %v2030_v51 = vpack.c.bf16 %v1604_v18, %v1604_v18  ;;  %v1536_v19 = vmul.f32 %v2834_v59, %v1427_v40  ;;  %v2250_v55 = vadd.f32 %v2249_v50, %v2248_v23  ;;  %v1430_v54 = vadd.f32 %v1429_v13, %v2805_v30 }
 0x16e   : > { %1767 = vst.msk [vmem:[%s2862_s30 + $0x1c] sm:$0xf] %vm1759_vm1, %v2032_v41  ;;  %v1577_v60 = vadd.f32 %v2840_v5, %v1538_v44  ;;  %v1539_v61 = vmul.f32 %v2834_v59, %v1438_v46  ;;  %v2906_v0 = vadd.f32 %v2247_v9, %v2815_v11 }
 0x16f   : > { %1765 = vst.msk [vmem:[%s2862_s30 + $0x14] sm:$0xf] %vm1759_vm1, %v2030_v51  ;;  %v1575_v42 = vadd.f32 %v2840_v5, %v1536_v19  ;;  %v1537_v29 = vmul.f32 %v2834_v59, %v1430_v54  ;;  %v2913_v37 = vadd.f32 %v2250_v55, %v2817_v32 }
 0x170   : > { %v1609_v38 = vmax.f32 %v1577_v60, 0.0  ;;  %v1578_v30 = vadd.f32 %v2840_v5, %v1539_v61 }
 0x171   : > { %v1607_v63 = vmax.f32 %v1575_v42, 0.0  ;;  %v1576_v7 = vadd.f32 %v2840_v5, %v1537_v29  ;;  %v2251_v8 = vpop.f32.mrb[60].mxu1  ;;  %v2323_v20 = vpop.f32.mrb[60].mxu0 }
 0x172   : > { %v2035_v11 = vpack.c.bf16 %v1609_v38, %v1609_v38  ;;  %v1610_v47 = vmax.f32 %v1578_v30, 0.0  ;;  %v1451_v14 = vadd.f32 %v2323_v20, %v2827_v35  ;;  %v2252_v39 = vpop.f32.mrb[61].mxu1  ;;  %v1442_v2 = vpop.f32.mrb[61].mxu0 }
 0x173   : > { %v2033_v6 = vpack.c.bf16 %v1607_v63, %v1607_v63  ;;  %v1608_v21 = vmax.f32 %v1576_v7, 0.0  ;;  %v2253_v32 = vadd.f32 %v2252_v39, %v2251_v8  ;;  %v1443_v25 = vadd.f32 %v1442_v2, %v2819_v33  ;;  %v2254_v48 = vpop.f32.mrb[62].mxu1  ;;  %v2324_v26 = vpop.f32.mrb[62].mxu0 }
 0x174   : > { %1770 = vst.msk [vmem:[%s2862_s30 + $0x28] sm:$0xf] %vm1759_vm1, %v2035_v11  ;;  %v2036_v27 = vpack.c.bf16 %v1610_v47, %v1610_v47  ;;  %v1542_v58 = vmul.f32 %v2834_v59, %v1451_v14  ;;  %v1454_v31 = vadd.f32 %v2324_v26, %v2829_v12  ;;  %v2255_v1 = vpop.f32.mrb[63].mxu1  ;;  %v1445_v35 = vpop.f32.mrb[63].mxu0 }
 0x175   : > { %1768 = vst.msk [vmem:[%s2862_s30 + $0x20] sm:$0xf] %vm1759_vm1, %v2033_v6  ;;  %v2034_v49 = vpack.c.bf16 %v1608_v21, %v1608_v21  ;;  %v1540_v45 = vmul.f32 %v2834_v59, %v1443_v25  ;;  %v2256_v36 = vadd.f32 %v2255_v1, %v2254_v48  ;;  %v1446_v33 = vadd.f32 %v1445_v35, %v2821_v57 }
 0x176   : > { %1771 = vst.msk [vmem:[%s2862_s30 + $0x2c] sm:$0xf] %vm1759_vm1, %v2036_v27  ;;  %v1581_v18 = vadd.f32 %v2840_v5, %v1542_v58  ;;  %v1543_v9 = vmul.f32 %v2834_v59, %v1454_v31  ;;  %v1322_v40 = vadd.f32 %v2253_v32, %v2823_v43 }
 0x177   : > { %1769 = vst.msk [vmem:[%s2862_s30 + $0x24] sm:$0xf] %vm1759_vm1, %v2034_v49  ;;  %v1579_v12 = vadd.f32 %v2840_v5, %v1540_v45  ;;  %v1541_v23 = vmul.f32 %v2834_v59, %v1446_v33  ;;  %v1325_v53 = vadd.f32 %v2256_v36, %v2825_v52 }
 0x178   : > { %v1613_v41 = vmax.f32 %v1581_v18, 0.0  ;;  %v1582_v44 = vadd.f32 %v2840_v5, %v1543_v9 }
 0x179   : > { %v1611_v57 = vmax.f32 %v1579_v12, 0.0  ;;  %v1580_v46 = vadd.f32 %v2840_v5, %v1541_v23  ;;  %v2257_v50 = vpop.f32.mrb[64].mxu1  ;;  %v2327_v13 = vpop.f32.mrb[64].mxu0 }
 0x17a   : > { %v2039_v51 = vpack.c.bf16 %v1613_v41, %v1613_v41  ;;  %v1614_v19 = vmax.f32 %v1582_v44, 0.0  ;;  %v1467_v43 = vadd.f32 %v2327_v13, %v2880_v15  ;;  %v2258_v55 = vpop.f32.mrb[65].mxu1  ;;  %v1458_v54 = vpop.f32.mrb[65].mxu0 }
 0x17b   : > { %v2037_v60 = vpack.c.bf16 %v1611_v57, %v1611_v57  ;;  %v1612_v61 = vmax.f32 %v1580_v46, 0.0  ;;  %v2259_v52 = vadd.f32 %v2258_v55, %v2257_v50  ;;  %v1459_v42 = vadd.f32 %v1458_v54, %v2848_v24  ;;  %v2260_v29 = vpop.f32.mrb[66].mxu1  ;;  %v2328_v38 = vpop.f32.mrb[66].mxu0 }
 0x17c   : > { %1774 = vst.msk [vmem:[%s2862_s30 + $0x38] sm:$0xf] %vm1759_vm1, %v2039_v51  ;;  %v2040_v30 = vpack.c.bf16 %v1614_v19, %v1614_v19  ;;  %v1546_v63 = vmul.f32 %v2834_v59, %v1467_v43  ;;  %v1470_v7 = vadd.f32 %v2328_v38, %v2887_v17  ;;  %v2261_v8 = vpop.f32.mrb[67].mxu1  ;;  %v1461_v15 = vpop.f32.mrb[67].mxu0 }
 0x17d   : > { %1772 = vst.msk [vmem:[%s2862_s30 + $0x30] sm:$0xf] %vm1759_vm1, %v2037_v60  ;;  %v2038_v20 = vpack.c.bf16 %v1612_v61, %v1612_v61  ;;  %v1544_v11 = vmul.f32 %v2834_v59, %v1459_v42  ;;  %v2262_v47 = vadd.f32 %v2261_v8, %v2260_v29  ;;  %v1462_v24 = vadd.f32 %v1461_v15, %v2856_v3 }
 0x17e   : > { %1775 = vst.msk [vmem:[%s2862_s30 + $0x3c] sm:$0xf] %vm1759_vm1, %v2040_v30  ;;  %v1585_v14 = vadd.f32 %v2840_v5, %v1546_v63  ;;  %v1547_v39 = vmul.f32 %v2834_v59, %v1470_v7  ;;  %v1330_v2 = vadd.f32 %v2259_v52, %v2767_v56 }
 0x17f   : > { %1773 = vst.msk [vmem:[%s2862_s30 + $0x34] sm:$0xf] %vm1759_vm1, %v2038_v20  ;;  %v1583_v17 = vadd.f32 %v2840_v5, %v1544_v11  ;;  %v1545_v6 = vmul.f32 %v2834_v59, %v1462_v24  ;;  %v2959_v21 = vadd.f32 %v2262_v47, %v2769_v62 }
 0x180   : > { %v1617_v32 = vmax.f32 %v1585_v14, 0.0  ;;  %v1586_v3 = vadd.f32 %v2840_v5, %v1547_v39 }
 0x181   : > { %v1615_v25 = vmax.f32 %v1583_v17, 0.0  ;;  %v1584_v48 = vadd.f32 %v2840_v5, %v1545_v6  ;;  %v2263_v26 = vpop.f32.mrb[68].mxu1  ;;  %v2331_v27 = vpop.f32.mrb[68].mxu0 }
 0x182   : > { %v2043_v58 = vpack.c.bf16 %v1617_v32, %v1617_v32  ;;  %v1618_v56 = vmax.f32 %v1586_v3, 0.0  ;;  %v1483_v31 = vadd.f32 %v2331_v27, %v1322_v40  ;;  %v2264_v1 = vpop.f32.mrb[69].mxu1  ;;  %v1474_v35 = vpop.f32.mrb[69].mxu0 }
 0x183   : > { %v2041_v49 = vpack.c.bf16 %v1615_v25, %v1615_v25  ;;  %v1616_v45 = vmax.f32 %v1584_v48, 0.0  ;;  %v2265_v62 = vadd.f32 %v2264_v1, %v2263_v26  ;;  %v1475_v36 = vadd.f32 %v1474_v35, %v2906_v0  ;;  %v2266_v33 = vpop.f32.mrb[70].mxu1  ;;  %v2332_v18 = vpop.f32.mrb[70].mxu0 }
 0x184   : > { %1778 = vst.msk [vmem:[%s2862_s30 + $0x48] sm:$0xf] %vm1759_vm1, %v2043_v58  ;;  %v2044_v9 = vpack.c.bf16 %v1618_v56, %v1618_v56  ;;  %v1550_v12 = vmul.f32 %v2834_v59, %v1483_v31  ;;  %v1486_v23 = vadd.f32 %v2332_v18, %v1325_v53  ;;  %v2267_v41 = vpop.f32.mrb[71].mxu1  ;;  %v1477_v44 = vpop.f32.mrb[71].mxu0 }
 0x185   : > { %1776 = vst.msk [vmem:[%s2862_s30 + $0x40] sm:$0xf] %vm1759_vm1, %v2041_v49  ;;  %v2042_v40 = vpack.c.bf16 %v1616_v45, %v1616_v45  ;;  %v1548_v57 = vmul.f32 %v2834_v59, %v1475_v36  ;;  %v2268_v46 = vadd.f32 %v2267_v41, %v2266_v33  ;;  %v1478_v50 = vadd.f32 %v1477_v44, %v2913_v37 }
 0x186   : > { %1779 = vst.msk [vmem:[%s2862_s30 + $0x4c] sm:$0xf] %vm1759_vm1, %v2044_v9  ;;  %v1589_v0 = vadd.f32 %v2840_v5, %v1550_v12  ;;  %v1551_v13 = vmul.f32 %v2834_v59, %v1486_v23  ;;  %v1338_v51 = vadd.f32 %v2265_v62, %v2771_v4 }
 0x187   : > { %1777 = vst.msk [vmem:[%s2862_s30 + $0x44] sm:$0xf] %vm1759_vm1, %v2042_v40  ;;  %v1587_v53 = vadd.f32 %v2840_v5, %v1548_v57  ;;  %v1549_v19 = vmul.f32 %v2834_v59, %v1478_v50  ;;  %v1341_v43 = vadd.f32 %v2268_v46, %v2773_v10 }
 0x188   : > { %v1621_v55 = vmax.f32 %v1589_v0, 0.0  ;;  %v1590_v54 = vadd.f32 %v2840_v5, %v1551_v13 }
 0x189   : > { %v1619_v37 = vmax.f32 %v1587_v53, 0.0  ;;  %v1588_v60 = vadd.f32 %v2840_v5, %v1549_v19  ;;  %v2269_v61 = vpop.f32.mrb[72].mxu1  ;;  %v2335_v52 = vpop.f32.mrb[72].mxu0 }
 0x18a   : > { %v2047_v42 = vpack.c.bf16 %v1621_v55, %v1621_v55  ;;  %v1622_v29 = vmax.f32 %v1590_v54, 0.0  ;;  %v1499_v4 = vadd.f32 %v2335_v52, %v1338_v51  ;;  %v2270_v38 = vpop.f32.mrb[73].mxu1  ;;  %v1490_v30 = vpop.f32.mrb[73].mxu0 }
 0x18b   : > { %v2045_v63 = vpack.c.bf16 %v1619_v37, %v1619_v37  ;;  %v1620_v7 = vmax.f32 %v1588_v60, 0.0  ;;  %v2271_v8 = vadd.f32 %v2270_v38, %v2269_v61  ;;  %v1491_v10 = vadd.f32 %v1490_v30, %v1330_v2  ;;  %v2272_v15 = vpop.f32.mrb[74].mxu1  ;;  %v2336_v20 = vpop.f32.mrb[74].mxu0 }
 0x18c   : > { %1782 = vst.msk [vmem:[%s2862_s30 + $0x58] sm:$0xf] %vm1759_vm1, %v2047_v42  ;;  %v2048_v11 = vpack.c.bf16 %v1622_v29, %v1622_v29  ;;  %v1554_v47 = vmul.f32 %v2834_v59, %v1499_v4  ;;  %v1502_v24 = vadd.f32 %v2336_v20, %v1341_v43  ;;  %v2273_v14 = vpop.f32.mrb[75].mxu1  ;;  %v1493_v39 = vpop.f32.mrb[75].mxu0 }
 0x18d   : > { %1780 = vst.msk [vmem:[%s2862_s30 + $0x50] sm:$0xf] %vm1759_vm1, %v2045_v63  ;;  %v2046_v17 = vpack.c.bf16 %v1620_v7, %v1620_v7  ;;  %v1552_v6 = vmul.f32 %v2834_v59, %v1491_v10  ;;  %v2274_v32 = vadd.f32 %v2273_v14, %v2272_v15  ;;  %v1494_v3 = vadd.f32 %v1493_v39, %v2959_v21 }
 0x18e   : > { %1783 = vst.msk [vmem:[%s2862_s30 + $0x5c] sm:$0xf] %vm1759_vm1, %v2048_v11  ;;  %v1593_v2 = vadd.f32 %v2840_v5, %v1554_v47  ;;  %v1555_v25 = vmul.f32 %v2834_v59, %v1502_v24  ;;  %v1346_v48 = vadd.f32 %v2271_v8, %v2775_v16 }
 0x18f   : > { %1781 = vst.msk [vmem:[%s2862_s30 + $0x54] sm:$0xf] %vm1759_vm1, %v2046_v17  ;;  %v1591_v26 = vadd.f32 %v2840_v5, %v1552_v6  ;;  %v1553_v27 = vmul.f32 %v2834_v59, %v1494_v3  ;;  %v1349_v58 = vadd.f32 %v2274_v32, %v2777_v22 }
 0x190   : > { %v1625_v56 = vmax.f32 %v1593_v2, 0.0  ;;  %v1594_v21 = vadd.f32 %v2840_v5, %v1555_v25 }
 0x191   : > { %v1623_v31 = vmax.f32 %v1591_v26, 0.0  ;;  %v1592_v1 = vadd.f32 %v2840_v5, %v1553_v27  ;;  %v2275_v35 = vpop.f32.mrb[76].mxu1  ;;  %v2339_v49 = vpop.f32.mrb[76].mxu0 }
 0x192   : > { %v2051_v45 = vpack.c.bf16 %v1625_v56, %v1625_v56  ;;  %v1626_v16 = vmax.f32 %v1594_v21, 0.0  ;;  %v2276_v62 = vpop.f32.mrb[77].mxu1  ;;  %v1506_v36 = vpop.f32.mrb[77].mxu0 }
 0x193   : > { %v2049_v33 = vpack.c.bf16 %v1623_v31, %v1623_v31  ;;  %v1624_v18 = vmax.f32 %v1592_v1, 0.0  ;;  %v2277_v9 = vadd.f32 %v2276_v62, %v2275_v35  ;;  %v1507_v22 = vadd.f32 %v1506_v36, %v1346_v48  ;;  %v2278_v12 = vpop.f32.mrb[78].mxu1  ;;  %v2340_v23 = vpop.f32.mrb[78].mxu0 }
 0x194   : > { %1786 = vst.msk [vmem:[%s2862_s30 + $0x68] sm:$0xf] %vm1759_vm1, %v2051_v45  ;;  %v2052_v41 = vpack.c.bf16 %v1626_v16, %v1626_v16  ;;  %v2279_v44 = vpop.f32.mrb[79].mxu1  ;;  %v1509_v40 = vpop.f32.mrb[79].mxu0 }
 0x195   : > { %1784 = vst.msk [vmem:[%s2862_s30 + $0x60] sm:$0xf] %vm1759_vm1, %v2049_v33  ;;  %v2050_v57 = vpack.c.bf16 %v1624_v18, %v1624_v18  ;;  %v1354_v46 = vadd.f32 %v2277_v9, %v2779_v28  ;;  %v1556_v50 = vmul.f32 %v2834_v59, %v1507_v22  ;;  %v2280_v0 = vadd.f32 %v2279_v44, %v2278_v12 }
 0x196   : > { %1787 = vst.msk [vmem:[%s2862_s30 + $0x6c] sm:$0xf] %vm1759_vm1, %v2052_v41  ;;  %v1510_v13 = vadd.f32 %v1509_v40, %v1349_v58 }
 0x197   : > { %1785 = vst.msk [vmem:[%s2862_s30 + $0x64] sm:$0xf] %vm1759_vm1, %v2050_v57  ;;  %v1515_v51 = vadd.f32 %v2339_v49, %v1354_v46  ;;  %v1595_v53 = vadd.f32 %v2840_v5, %v1556_v50  ;;  %v1357_v19 = vadd.f32 %v2280_v0, %v2781_v34 }
 0x198   : > { %v1557_v43 = vmul.f32 %v2834_v59, %v1510_v13 }
 0x199   : > { %v1558_v28 = vmul.f32 %v2834_v59, %v1515_v51  ;;  %v1627_v55 = vmax.f32 %v1595_v53, 0.0  ;;  %v1518_v54 = vadd.f32 %v2340_v23, %v1357_v19 }
 0x19a   : > { %v1596_v37 = vadd.f32 %v2840_v5, %v1557_v43 }
 0x19b   : > { %v1597_v60 = vadd.f32 %v2840_v5, %v1558_v28  ;;  %v2053_v61 = vpack.c.bf16 %v1627_v55, %v1627_v55  ;;  %v1559_v52 = vmul.f32 %v2834_v59, %v1518_v54 }
 0x19c   : > { %v1628_v42 = vmax.f32 %v1596_v37, 0.0 }
 0x19d   : > { %v1629_v29 = vmax.f32 %v1597_v60, 0.0  ;;  %1788 = vst.msk [vmem:[%s2862_s30 + $0x70] sm:$0xf] %vm1759_vm1, %v2053_v61  ;;  %v1598_v34 = vadd.f32 %v2840_v5, %v1559_v52 }
 0x19e   : > { %v2054_v4 = vpack.c.bf16 %v1628_v42, %v1628_v42 }
 0x19f   : > { %v2055_v38 = vpack.c.bf16 %v1629_v29, %v1629_v29  ;;  %v1630_v30 = vmax.f32 %v1598_v34, 0.0 }
 0x1a0   : > { %1789 = vst.msk [vmem:[%s2862_s30 + $0x74] sm:$0xf] %vm1759_vm1, %v2054_v4 }
 0x1a1   : > { %1790 = vst.msk [vmem:[%s2862_s30 + $0x78] sm:$0xf] %vm1759_vm1, %v2055_v38  ;;  %v2056_v63 = vpack.c.bf16 %v1630_v30, %v1630_v30 }
 0x1a3   : > { %1791 = vst.msk [vmem:[%s2862_s30 + $0x7c] sm:$0xf] %vm1759_vm1, %v2056_v63 }
 0x1a4 PF: > { %s14_s15 = sadd.s32 1, %s2520_s15  }
 0x1a5   : > { %p11_p4 = scmp.ge.s32.totalorder %s14_s15, 4  }
 0x1a7   :  { %13 = sbr.rel (!%p11_p4) target bundleno = 1 (0x1), region = 66 }

// kernel: resnet_stem_forward.8
= control target key start
LH: loop header
LB: loop body
LE: loop exit
PB: predicated region body
PF: predicated region fallthrough
CT: control target
= control target key end

     0   :  { %s2647_s18 = smov 0   ;;  %s3205_s0 = inlined_call_operand.vmem [shape: bf16[512,576], index: 0, kind: input, shape index: {}]   ;;  %s3206_s1 = inlined_call_operand.vmem [shape: bf16[576,64], index: 1, kind: input, shape index: {}]   ;;  %s3207_s2 = inlined_call_operand.vmem [shape: f32[512,64], index: 2, kind: input, shape index: {}]   ;;  %s3208_s3 = inlined_call_operand.vmem [shape: f32[1,64], index: 3, kind: input, shape index: {}]   ;;  %s3209_s4 = inlined_call_operand.vmem [shape: f32[1,64], index: 4, kind: input, shape index: {}]   ;;  %s3210_s5 = inlined_call_operand.vmem [shape: bf16[512,64], index: 5, kind: output, shape index: {}]  }
   0x1 LB: > { %s1941_s19 = sadd.s32 4294967295, %s2615_s18   ;;  %p1945_p0 = scmp.ge.s32.totalorder %s2615_s18, 1  ;;  %s2615_s18 = sphi %s2647_s18, %s15_s18  }
   0x2   : > { %p200_p1 = scmp.lt.s32.totalorder %s2615_s18, 3 }
   0x4   : > { %p201_p2 = pnand %p1945_p0, %p200_p1 }
   0x5   : > { %v2461_v0 = vld [vmem:[%s3206_s1 + $0x40] sm:$0xff] (!%p201_p2)   ;;  %s1946_s22 = sshll.u32 (!%p201_p2), %s1941_s19, 5  ;;  %v2463_v2 = vld [vmem:[%s3206_s1 + $0x48] sm:$0xff] (!%p201_p2)   ;;  %v2465_v4 = vld [vmem:[%s3206_s1 + $0x50] sm:$0xff] (!%p201_p2)   ;;  %vm1070_vm0 = vcmask (!%p201_p2), 523264   ;;  %vm1840_vm1 = vcmask (!%p201_p2), 519168  }
   0x6   : > { %204 = sbr.rel (%p201_p2) target bundleno = 420 (0x1a4), region = 40  ;;  %v2462_v1 = vld [vmem:[%s3206_s1] sm:$0xff] (!%p201_p2)   ;;  %2152 = vmatprep.subr.bf16.mxu0 (!%p201_p2), %v2461_v0  ;;  %2436 = vmatprep.subr.bf16.mxu1 (!%p201_p2), %v2461_v0  ;;  %p235_p3 = scmp.lt.s32.totalorder (!%p201_p2), %s1946_s22, 63  ;;  %v2464_v3 = vld [vmem:[%s3206_s1 + $0x8] sm:$0xff] (!%p201_p2)   ;;  %v2466_v5 = vld [vmem:[%s3206_s1 + $0x10] sm:$0xff] (!%p201_p2)  }
   0x7   : > { %2153 = vmatpush3.bf16.msra.mxu0 (!%p201_p2), %v2462_v1  ;;  %2444 = vmatpush3.bf16.msra.mxu1 (!%p201_p2), %v2462_v1  ;;  %v2467_v6 = vld [vmem:[%s3206_s1 + $0x58] sm:$0xff] (!%p201_p2)   ;;  %v2469_v8 = vld [vmem:[%s3206_s1 + $0x60] sm:$0xff] (!%p201_p2)   ;;  %v2471_v10 = vld [vmem:[%s3206_s1 + $0x68] sm:$0xff] (!%p201_p2)  }
   0x8   : > { %2154 = vmatprep.subr.bf16.mxu0 (!%p201_p2), %v2463_v2  ;;  %2437 = vmatprep.subr.bf16.mxu1 (!%p201_p2), %v2463_v2  ;;  %v2468_v7 = vld [vmem:[%s3206_s1 + $0x18] sm:$0xff] (!%p201_p2)   ;;  %v2470_v9 = vld [vmem:[%s3206_s1 + $0x20] sm:$0xff] (!%p201_p2)   ;;  %v2472_v13 = vld [vmem:[%s3206_s1 + $0x28] sm:$0xff] (!%p201_p2)  }
   0x9   : > { %v2473_v14 = vld [vmem:[%s3206_s1 + $0x70] sm:$0xff] (!%p201_p2)   ;;  %v2475_v16 = vld [vmem:[%s3206_s1 + $0x78] sm:$0xff] (!%p201_p2)   ;;  %v2483_v18 = vld [vmem:[%s3206_s1 + $0xc0] sm:$0xff] (!%p201_p2)  }
   0xa   : > { %v2474_v15 = vld [vmem:[%s3206_s1 + $0x30] sm:$0xff] (!%p201_p2)   ;;  %v2476_v17 = vld [vmem:[%s3206_s1 + $0x38] sm:$0xff] (!%p201_p2)   ;;  %v2486_v19 = vld [vmem:[%s3206_s1 + $0x100] sm:$0xff] (!%p201_p2)  }
   0xb   : > { %2155 = vmatpush3.bf16.msra.mxu0 (!%p201_p2), %v2464_v3  ;;  %2445 = vmatpush3.bf16.msra.mxu1 (!%p201_p2), %v2464_v3  ;;  %v2484_v22 = vld [vmem:[%s3206_s1 + $0x80] sm:$0xff] (!%p201_p2)   ;;  %v2485_v23 = vld [vmem:[%s3206_s1 + $0xc8] sm:$0xff] (!%p201_p2)   ;;  %v2494_v28 = vld [vmem:[%s3206_s1 + $0xd0] sm:$0xff] (!%p201_p2)  }
   0xc   : > { %2156 = vmatprep.subr.bf16.mxu0 (!%p201_p2), %v2465_v4  ;;  %2438 = vmatprep.subr.bf16.mxu1 (!%p201_p2), %v2465_v4  ;;  %v2487_v26 = vld [vmem:[%s3206_s1 + $0x88] sm:$0xff] (!%p201_p2)   ;;  %v2495_v30 = vld [vmem:[%s3206_s1 + $0x90] sm:$0xff] (!%p201_p2)   ;;  %v2496_v31 = vld [vmem:[%s3206_s1 + $0xd8] sm:$0xff] (!%p201_p2)  }
   0xd   : > { %s3212_s22 = smov (!%p235_p3, %s1946_s22), 63  ;;  %v2497_v34 = vld [vmem:[%s3206_s1 + $0x98] sm:$0xff]   ;;  %v2517_v35 = vld [vmem:[%s3206_s1 + $0x108] sm:$0xff]   ;;  %v2504_v37 = vld [vmem:[%s3206_s1 + $0xe0] sm:$0xff]  }
   0xe   : > { %s2452_s10 = smul.u32 20, %s3212_s22  ;;  %v2505_v39 = vld [vmem:[%s3206_s1 + $0xa0] sm:$0xff]   ;;  %v2506_v40 = vld [vmem:[%s3206_s1 + $0xe8] sm:$0xff]   ;;  %v2514_v46 = vld [vmem:[%s3206_s1 + $0xf0] sm:$0xff]   ;;  %s1951_s12 = sshll.u32 %s3212_s22, 2 }
   0xf   : > { %2157 = vmatpush3.bf16.msra.mxu0 %v2466_v5  ;;  %2446 = vmatpush3.bf16.msra.mxu1 %v2466_v5  ;;  %v2507_v43 = vld [vmem:[%s3206_s1 + $0xa8] sm:$0xff]   ;;  %v2537_v47 = vld [vmem:[%s3206_s1 + $0x110] sm:$0xff]   ;;  %v2516_v49 = vld [vmem:[%s3206_s1 + $0xf8] sm:$0xff]   ;;  %s3021_s15 = scalar_lea.vmem %s3210_s5, %s1951_s12 }
  0x10   : > { %2158 = vmatprep.subr.bf16.mxu0 %v2467_v6  ;;  %2439 = vmatprep.subr.bf16.mxu1 %v2467_v6  ;;  %s2688_s17 = scalar_lea.vmem %s3205_s0, %s2452_s10  ;;  %v2515_v48 = vld [vmem:[%s3206_s1 + $0xb0] sm:$0xff]   ;;  %v2518_v52 = vld [vmem:[%s3206_s1 + $0xb8] sm:$0xff]  }
  0x11   : > { %v2479_v11 = vld [vmem:[%s2688_s17 + $0x4] ss:$20 sps:$4 sm:$0xff]   ;;  %v2477_v20 = vld [vmem:[%s2688_s17] ss:$20 sps:$4 sm:$0xff]   ;;  %v2492_v27 = vld [vmem:[%s2688_s17 + $0x28] ss:$20 sps:$4 sm:$0xff]  }
  0x12   : > { %v2482_v12 = vld [vmem:[%s2688_s17 + $0x1e4] ss:$20 sps:$4 sm:$0xff]   ;;  %1151 = vmatprep.mubr.bf16.mxu0 %v2479_v11  ;;  %v2480_v21 = vld [vmem:[%s2688_s17 + $0x1e0] ss:$20 sps:$4 sm:$0xff]   ;;  %v2493_v29 = vld [vmem:[%s2688_s17 + $0x208] ss:$20 sps:$4 sm:$0xff]  }
  0x13   : > { %2159 = vmatpush3.bf16.msra.mxu0 %v2468_v7  ;;  %2447 = vmatpush3.bf16.msra.mxu1 %v2468_v7  ;;  %v2488_v24 = vld [vmem:[%s2688_s17 + $0x2c] ss:$20 sps:$4 sm:$0xff]   ;;  %v2498_v32 = vld [vmem:[%s2688_s17 + $0x54] ss:$20 sps:$4 sm:$0xff]   ;;  %v2502_v36 = vld [vmem:[%s2688_s17 + $0x50] ss:$20 sps:$4 sm:$0xff]  }
  0x14   : > { %2160 = vmatprep.subr.bf16.mxu0 %v2469_v8  ;;  %2440 = vmatprep.subr.bf16.mxu1 %v2469_v8  ;;  %v2490_v25 = vld [vmem:[%s2688_s17 + $0x20c] ss:$20 sps:$4 sm:$0xff]   ;;  %v2500_v33 = vld [vmem:[%s2688_s17 + $0x234] ss:$20 sps:$4 sm:$0xff]   ;;  %v2503_v38 = vld [vmem:[%s2688_s17 + $0x230] ss:$20 sps:$4 sm:$0xff]  }
  0x15   : > { %1247 = vmatprep.mubr.bf16.mxu1 %v2482_v12  ;;  %v2508_v41 = vld [vmem:[%s2688_s17 + $0x7c] ss:$20 sps:$4 sm:$0xff]   ;;  %v2512_v44 = vld [vmem:[%s2688_s17 + $0x78] ss:$20 sps:$4 sm:$0xff]   ;;  %v2524_v54 = vld [vmem:[%s2688_s17 + $0xa0] ss:$20 sps:$4 sm:$0xff]  }
  0x16   : > { %v2510_v42 = vld [vmem:[%s2688_s17 + $0x25c] ss:$20 sps:$4 sm:$0xff]   ;;  %v2513_v45 = vld [vmem:[%s2688_s17 + $0x258] ss:$20 sps:$4 sm:$0xff]   ;;  %v2527_v57 = vld [vmem:[%s2688_s17 + $0x34] ss:$20 sps:$4 sm:$0xff]  }
  0x17   : > { %2161 = vmatpush3.bf16.msra.mxu0 %v2470_v9  ;;  %2448 = vmatpush3.bf16.msra.mxu1 %v2470_v9  ;;  %v2519_v50 = vld [vmem:[%s2688_s17 + $0xa4] ss:$20 sps:$4 sm:$0xff]   ;;  %v2523_v51 = vld [vmem:[%s2688_s17 + $0xc] ss:$20 sps:$4 sm:$0xff]   ;;  %v2521_v53 = vld [vmem:[%s2688_s17 + $0x8] ss:$20 sps:$4 sm:$0xff]  }
  0x18   : > { %2162 = vmatprep.subr.bf16.mxu0 %v2471_v10  ;;  %2441 = vmatprep.subr.bf16.mxu1 %v2471_v10  ;;  %v2525_v55 = vld [vmem:[%s2688_s17 + $0xcc] ss:$20 sps:$4 sm:$0xff]   ;;  %v2556_v56 = vld [vmem:[%s3206_s1 + $0x118] sm:$0xff]   ;;  %v2530_v59 = vld [vmem:[%s2688_s17 + $0x30] ss:$20 sps:$4 sm:$0xff]  }
  0x19   : > { %v2529_v58 = vld [vmem:[%s2688_s17 + $0xc8] ss:$20 sps:$4 sm:$0xff]   ;;  %v2535_v62 = vld [vmem:[%s2688_s17 + $0xf0] ss:$20 sps:$4 sm:$0xff]   ;;  %v2536_v63 = vld [vmem:[%s2688_s17 + $0x58] ss:$20 sps:$4 sm:$0xff]  }
  0x1a   : > { %v2531_v60 = vld [vmem:[%s2688_s17 + $0xf4] ss:$20 sps:$4 sm:$0xff]   ;;  %v2533_v61 = vld [vmem:[%s2688_s17 + $0x5c] ss:$20 sps:$4 sm:$0xff]   ;;  %v2540_v1 = vld [vmem:[%s2688_s17 + $0x84] ss:$20 sps:$4 sm:$0xff]  }
  0x1b   : > { %2163 = vmatpush3.bf16.msra.mxu0 %v2472_v13  ;;  %2449 = vmatpush3.bf16.msra.mxu1 %v2472_v13  ;;  %v2538_v0 = vld [vmem:[%s2688_s17 + $0x11c] ss:$20 sps:$4 sm:$0xff]   ;;  %v2542_v2 = vld [vmem:[%s2688_s17 + $0x118] ss:$20 sps:$4 sm:$0xff]   ;;  %v2543_v3 = vld [vmem:[%s2688_s17 + $0x80] ss:$20 sps:$4 sm:$0xff]  }
  0x1c   : > { %2164 = vmatprep.subr.bf16.mxu0 %v2473_v14  ;;  %2442 = vmatprep.subr.bf16.mxu1 %v2473_v14  ;;  %v2544_v4 = vld [vmem:[%s2688_s17 + $0x144] ss:$20 sps:$4 sm:$0xff]   ;;  %v2546_v5 = vld [vmem:[%s2688_s17 + $0xac] ss:$20 sps:$4 sm:$0xff]   ;;  %v2549_v7 = vld [vmem:[%s2688_s17 + $0xa8] ss:$20 sps:$4 sm:$0xff]  }
  0x1d   : > { %v2548_v6 = vld [vmem:[%s2688_s17 + $0x140] ss:$20 sps:$4 sm:$0xff]   ;;  %v2554_v10 = vld [vmem:[%s2688_s17 + $0x168] ss:$20 sps:$4 sm:$0xff]   ;;  %v2555_v11 = vld [vmem:[%s2688_s17 + $0xd0] ss:$20 sps:$4 sm:$0xff]  }
  0x1e   : > { %v2550_v8 = vld [vmem:[%s2688_s17 + $0x16c] ss:$20 sps:$4 sm:$0xff]   ;;  %v2552_v9 = vld [vmem:[%s2688_s17 + $0xd4] ss:$20 sps:$4 sm:$0xff]   ;;  %v2559_v13 = vld [vmem:[%s2688_s17 + $0xfc] ss:$20 sps:$4 sm:$0xff]  }
  0x1f   : > { %2165 = vmatpush3.bf16.msra.mxu0 %v2474_v15  ;;  %2450 = vmatpush3.bf16.msra.mxu1 %v2474_v15  ;;  %v2557_v12 = vld [vmem:[%s2688_s17 + $0x194] ss:$20 sps:$4 sm:$0xff]   ;;  %v2561_v14 = vld [vmem:[%s2688_s17 + $0x190] ss:$20 sps:$4 sm:$0xff]   ;;  %v2562_v15 = vld [vmem:[%s2688_s17 + $0xf8] ss:$20 sps:$4 sm:$0xff]  }
  0x20   : > { %2166 = vmatprep.subr.bf16.mxu0 %v2475_v16  ;;  %2443 = vmatprep.subr.bf16.mxu1 %v2475_v16  ;;  %v2563_v16 = vld [vmem:[%s2688_s17 + $0x1bc] ss:$20 sps:$4 sm:$0xff]  }
  0x23   : > { %2167 = vmatpush3.bf16.msra.mxu0 %v2476_v17  ;;  %2451 = vmatpush3.bf16.msra.mxu1 %v2476_v17  ;;  %v2565_v17 = vld [vmem:[%s2688_s17 + $0x124] ss:$20 sps:$4 sm:$0xff]  }
  0x24   : > { %2264 = vmatprep.subr.bf16.mxu1 %v2483_v18  ;;  %2396 = vmatprep.subr.bf16.mxu0 %v2486_v19  ;;  %v2567_v18 = vld [vmem:[%s2688_s17 + $0x1b8] ss:$20 sps:$4 sm:$0xff]  }
  0x26   : > { %1152 = vmatmul.mubr.bf16.vlgmr.msra.gmra.mrb[0].mxu0 %v2477_v20  ;;  %1248 = vmatmul.mubr.bf16.vlgmr.msra.gmra.mrb[0].mxu1 %v2480_v21  ;;  %v2569_v20 = vld [vmem:[%s2688_s17 + $0x14c] ss:$20 sps:$4 sm:$0xff]   ;;  %v2571_v21 = vld [vmem:[%s2688_s17 + $0x10] ss:$20 sps:$4 sm:$0xff]  }
  0x27   : > { %2265 = vmatpush3.bf16.msra.mxu1 %v2484_v22  ;;  %2397 = vmatpush3.bf16.msra.mxu0 %v2486_v19  ;;  %v2568_v19 = vld [vmem:[%s2688_s17 + $0x120] ss:$20 sps:$4 sm:$0xff]   ;;  %v2572_v22 = vld [vmem:[%s2688_s17 + $0x148] ss:$20 sps:$4 sm:$0xff]  }
  0x28   : > { %2266 = vmatprep.subr.bf16.mxu1 %v2485_v23  ;;  %1159 = vmatprep.mubr.bf16.mxu0 %v2488_v24  ;;  %v2573_v23 = vld [vmem:[%s2688_s17 + $0x38] ss:$20 sps:$4 sm:$0xff]   ;;  %v2574_v24 = vld [vmem:[%s2688_s17 + $0x174] ss:$20 sps:$4 sm:$0xff]  }
  0x29   : > { %1255 = vmatprep.mubr.bf16.mxu1 %v2490_v25  ;;  %2398 = vmatprep.subr.bf16.mxu0 %v2517_v35  ;;  %v2576_v25 = vld [vmem:[%s2688_s17 + $0x60] ss:$20 sps:$4 sm:$0xff]  }
  0x2b   : > { %2267 = vmatpush3.bf16.msra.mxu1 %v2487_v26  ;;  %2399 = vmatpush3.bf16.msra.mxu0 %v2517_v35  ;;  %v2577_v26 = vld [vmem:[%s2688_s17 + $0x170] ss:$20 sps:$4 sm:$0xff]   ;;  %v2588_v35 = vld [vmem:[%s2688_s17 + $0x128] ss:$20 sps:$4 sm:$0xff]  }
  0x2c   : > { %2268 = vmatprep.subr.bf16.mxu1 %v2494_v28  ;;  %2400 = vmatprep.subr.bf16.mxu0 %v2537_v47  ;;  %v2579_v28 = vld [vmem:[%s2688_s17 + $0x19c] ss:$20 sps:$4 sm:$0xff]  }
  0x2e   : > { %1160 = vmatmul.mubr.bf16.gmra.mrb[4].mxu0 %v2492_v27  ;;  %1256 = vmatmul.mubr.bf16.gmra.mrb[4].mxu1 %v2493_v29  ;;  %v2578_v27 = vld [vmem:[%s2688_s17 + $0x88] ss:$20 sps:$4 sm:$0xff]   ;;  %v2581_v29 = vld [vmem:[%s2688_s17 + $0xb0] ss:$20 sps:$4 sm:$0xff]  }
  0x2f   : > { %2269 = vmatpush3.bf16.msra.mxu1 %v2495_v30  ;;  %1167 = vmatprep.mubr.bf16.mxu0 %v2498_v32  ;;  %v2582_v30 = vld [vmem:[%s2688_s17 + $0x198] ss:$20 sps:$4 sm:$0xff]  }
  0x30   : > { %2270 = vmatprep.subr.bf16.mxu1 %v2496_v31  ;;  %1263 = vmatprep.mubr.bf16.mxu1 %v2500_v33  ;;  %v2583_v31 = vld [vmem:[%s2688_s17 + $0xd8] ss:$20 sps:$4 sm:$0xff]   ;;  %v2586_v33 = vld [vmem:[%s2688_s17 + $0x100] ss:$20 sps:$4 sm:$0xff]  }
  0x31   : > { %2401 = vmatpush3.bf16.msra.mxu0 %v2537_v47  ;;  %v2584_v32 = vld [vmem:[%s2688_s17 + $0x1c4] ss:$20 sps:$4 sm:$0xff]  }
  0x32   : > { %2402 = vmatprep.subr.bf16.mxu0 %v2556_v56  ;;  %v2603_v47 = vld [vmem:[%s2688_s17 + $0x218] ss:$20 sps:$4 sm:$0xff]  }
  0x33   : > { %2271 = vmatpush3.bf16.msra.mxu1 %v2497_v34  ;;  %v2587_v34 = vld [vmem:[%s2688_s17 + $0x1c0] ss:$20 sps:$4 sm:$0xff]  }
  0x34   : > { %2272 = vmatprep.subr.bf16.mxu1 %v2504_v37  ;;  %v2591_v37 = vld [vmem:[%s2688_s17 + $0x150] ss:$20 sps:$4 sm:$0xff]  }
  0x35   : > { %2403 = vmatpush3.bf16.msra.mxu0 %v2556_v56 }
  0x36   : > { %1168 = vmatmul.mubr.bf16.gmra.mrb[8].mxu0 %v2502_v36  ;;  %1264 = vmatmul.mubr.bf16.gmra.mrb[8].mxu1 %v2503_v38  ;;  %v2589_v36 = vld [vmem:[%s2688_s17 + $0x1ec] ss:$20 sps:$4 sm:$0xff]   ;;  %v2592_v38 = vld [vmem:[%s2688_s17 + $0x1e8] ss:$20 sps:$4 sm:$0xff]  }
  0x37   : > { %2273 = vmatpush3.bf16.msra.mxu1 %v2505_v39  ;;  %1175 = vmatprep.mubr.bf16.mxu0 %v2508_v41  ;;  %v2593_v39 = vld [vmem:[%s2688_s17 + $0x178] ss:$20 sps:$4 sm:$0xff]   ;;  %v2596_v41 = vld [vmem:[%s2688_s17 + $0x1a0] ss:$20 sps:$4 sm:$0xff]  }
  0x38   : > { %2274 = vmatprep.subr.bf16.mxu1 %v2506_v40  ;;  %1271 = vmatprep.mubr.bf16.mxu1 %v2510_v42  ;;  %v2594_v40 = vld [vmem:[%s2688_s17 + $0x214] ss:$20 sps:$4 sm:$0xff]   ;;  %v2597_v42 = vld [vmem:[%s2688_s17 + $0x210] ss:$20 sps:$4 sm:$0xff]  }
  0x3b   : > { %2275 = vmatpush3.bf16.msra.mxu1 %v2507_v43  ;;  %v2598_v43 = vld [vmem:[%s2688_s17 + $0x1c8] ss:$20 sps:$4 sm:$0xff]  }
  0x3c   : > { %2276 = vmatprep.subr.bf16.mxu1 %v2514_v46  ;;  %v2602_v46 = vld [vmem:[%s2688_s17 + $0x238] ss:$20 sps:$4 sm:$0xff]  }
  0x3e   : > { %1176 = vmatmul.mubr.bf16.gmra.mrb[12].mxu0 %v2512_v44  ;;  %1272 = vmatmul.mubr.bf16.gmra.mrb[12].mxu1 %v2513_v45  ;;  %v2599_v44 = vld [vmem:[%s2688_s17 + $0x23c] ss:$20 sps:$4 sm:$0xff]  }
  0x3f   : > { %2277 = vmatpush3.bf16.msra.mxu1 %v2515_v48  ;;  %1183 = vmatprep.mubr.bf16.mxu0 %v2519_v50  ;;  %v2601_v45 = vld [vmem:[%s2688_s17 + $0x1f0] ss:$20 sps:$4 sm:$0xff]   ;;  %v2607_v50 = vld [vmem:[%s2688_s17 + $0x260] ss:$20 sps:$4 sm:$0xff]  }
  0x40   : > { %2278 = vmatprep.subr.bf16.mxu1 %v2516_v49  ;;  %1312 = vmatprep.mubr.bf16.mxu1 %v2523_v51  ;;  %v2604_v48 = vld [vmem:[%s2688_s17 + $0x264] ss:$20 sps:$4 sm:$0xff]   ;;  %v2606_v49 = vld [vmem:[%s2688_s17 + $0x240] ss:$20 sps:$4 sm:$0xff]   ;;  %v2608_v51 = vld [vmem:[%s2688_s17 + $0x268] ss:$20 sps:$4 sm:$0xff]  }
  0x41   : > { %s1949_s17 = sshll.u32 %s3212_s22, 3 }
  0x42   : > { %s2893_s7 = scalar_lea.vmem %s3207_s2, %s1949_s17 }
  0x43   : > { %2279 = vmatpush3.bf16.msra.mxu1 %v2518_v52 }
  0x46   : > { %1184 = vmatmul.mubr.bf16.gmra.mrb[16].mxu0 %v2524_v54  ;;  %1313 = vmatmul.mubr.bf16.vlgmr.msra.gmra.mrb[16].mxu1 %v2521_v53 }
  0x47   : > { %1191 = vmatprep.mubr.bf16.mxu0 %v2525_v55  ;;  %1320 = vmatprep.mubr.bf16.mxu1 %v2527_v57 }
  0x4e   : > { %1192 = vmatmul.mubr.bf16.gmra.mrb[20].mxu0 %v2529_v58  ;;  %1321 = vmatmul.mubr.bf16.gmra.mrb[20].mxu1 %v2530_v59 }
  0x4f   : > { %1199 = vmatprep.mubr.bf16.mxu0 %v2531_v60  ;;  %1328 = vmatprep.mubr.bf16.mxu1 %v2533_v61 }
  0x56   : > { %1200 = vmatmul.mubr.bf16.gmra.mrb[24].mxu0 %v2535_v62  ;;  %1329 = vmatmul.mubr.bf16.gmra.mrb[24].mxu1 %v2536_v63 }
  0x57   : > { %1207 = vmatprep.mubr.bf16.mxu0 %v2538_v0  ;;  %1336 = vmatprep.mubr.bf16.mxu1 %v2540_v1 }
  0x5e   : > { %1208 = vmatmul.mubr.bf16.gmra.mrb[28].mxu0 %v2542_v2  ;;  %1337 = vmatmul.mubr.bf16.gmra.mrb[28].mxu1 %v2543_v3 }
  0x5f   : > { %1215 = vmatprep.mubr.bf16.mxu0 %v2544_v4  ;;  %1344 = vmatprep.mubr.bf16.mxu1 %v2546_v5 }
  0x66   : > { %1216 = vmatmul.mubr.bf16.gmra.mrb[32].mxu0 %v2548_v6  ;;  %1345 = vmatmul.mubr.bf16.gmra.mrb[32].mxu1 %v2549_v7 }
  0x67   : > { %1223 = vmatprep.mubr.bf16.mxu0 %v2550_v8  ;;  %1352 = vmatprep.mubr.bf16.mxu1 %v2552_v9 }
  0x6e   : > { %1224 = vmatmul.mubr.bf16.gmra.mrb[36].mxu0 %v2554_v10  ;;  %1353 = vmatmul.mubr.bf16.gmra.mrb[36].mxu1 %v2555_v11 }
  0x6f   : > { %1231 = vmatprep.mubr.bf16.mxu0 %v2557_v12  ;;  %1360 = vmatprep.mubr.bf16.mxu1 %v2559_v13 }
  0x76   : > { %1232 = vmatmul.mubr.bf16.gmra.mrb[40].mxu0 %v2561_v14  ;;  %1361 = vmatmul.mubr.bf16.gmra.mrb[40].mxu1 %v2562_v15 }
  0x77   : > { %1239 = vmatprep.mubr.bf16.mxu0 %v2563_v16  ;;  %1368 = vmatprep.mubr.bf16.mxu1 %v2565_v17 }
  0x7e   : > { %1240 = vmatmul.mubr.bf16.gmra.mrb[44].mxu0 %v2567_v18  ;;  %1369 = vmatmul.mubr.bf16.gmra.mrb[44].mxu1 %v2568_v19 }
  0x7f   : > { %1376 = vmatprep.mubr.bf16.mxu1 %v2569_v20  ;;  %2404 = vmatprep.mubr.msk.bf16.mxu0 %vm1070_vm0, %v2571_v21 }
  0x86   : > { %1377 = vmatmul.mubr.bf16.gmra.mrb[48].mxu1 %v2572_v22  ;;  %2405 = vmatmul.mubr.msk.bf16.vlgmr.msra.gmra.mrb[48].mxu0 %vm1070_vm0, %v2573_v23 }
  0x87   : > { %1384 = vmatprep.mubr.bf16.mxu1 %v2574_v24  ;;  %2408 = vmatprep.mubr.msk.bf16.mxu0 %vm1070_vm0, %v2576_v25 }
  0x8e   : > { %1385 = vmatmul.mubr.bf16.gmra.mrb[52].mxu1 %v2577_v26  ;;  %2409 = vmatmul.mubr.msk.bf16.gmra.mrb[52].mxu0 %vm1070_vm0, %v2578_v27 }
  0x8f   : > { %1392 = vmatprep.mubr.bf16.mxu1 %v2579_v28  ;;  %2412 = vmatprep.mubr.msk.bf16.mxu0 %vm1070_vm0, %v2581_v29 }
  0x96   : > { %1393 = vmatmul.mubr.bf16.gmra.mrb[56].mxu1 %v2582_v30  ;;  %2413 = vmatmul.mubr.msk.bf16.gmra.mrb[56].mxu0 %vm1070_vm0, %v2583_v31 }
  0x97   : > { %1400 = vmatprep.mubr.bf16.mxu1 %v2584_v32  ;;  %2416 = vmatprep.mubr.msk.bf16.mxu0 %vm1070_vm0, %v2586_v33 }
  0x9e   : > { %1401 = vmatmul.mubr.bf16.gmra.mrb[60].mxu1 %v2587_v34  ;;  %2417 = vmatmul.mubr.msk.bf16.gmra.mrb[60].mxu0 %vm1070_vm0, %v2588_v35 }
  0x9f   : > { %1408 = vmatprep.mubr.bf16.mxu1 %v2589_v36  ;;  %2420 = vmatprep.mubr.msk.bf16.mxu0 %vm1070_vm0, %v2591_v37  ;;  %v422_v36 = vld [vmem:[%s2893_s7] sm:$0xff] }
  0xa6   : > { %1409 = vmatmul.mubr.bf16.gmra.mrb[64].mxu1 %v2592_v38  ;;  %2421 = vmatmul.mubr.msk.bf16.gmra.mrb[64].mxu0 %vm1070_vm0, %v2593_v39  ;;  %v423_v39 = vld [vmem:[%s2893_s7 + $0x8] sm:$0xff] }
  0xa7   : > { %1416 = vmatprep.mubr.bf16.mxu1 %v2594_v40  ;;  %2424 = vmatprep.mubr.msk.bf16.mxu0 %vm1070_vm0, %v2596_v41 }
  0xae   : > { %1417 = vmatmul.mubr.bf16.gmra.mrb[68].mxu1 %v2597_v42  ;;  %2425 = vmatmul.mubr.msk.bf16.gmra.mrb[68].mxu0 %vm1070_vm0, %v2598_v43 }
  0xaf   : > { %1424 = vmatprep.mubr.bf16.mxu1 %v2599_v44  ;;  %2428 = vmatprep.mubr.msk.bf16.mxu0 %vm1070_vm0, %v2601_v45 }
  0xb6   : > { %1425 = vmatmul.mubr.bf16.gmra.mrb[72].mxu1 %v2602_v46  ;;  %2429 = vmatmul.mubr.msk.bf16.gmra.mrb[72].mxu0 %vm1070_vm0, %v2603_v47 }
  0xb7   : > { %1432 = vmatprep.mubr.bf16.mxu1 %v2604_v48  ;;  %2432 = vmatprep.mubr.msk.bf16.mxu0 %vm1070_vm0, %v2606_v49 }
  0xbe   : > { %1433 = vmatmul.mubr.bf16.gmra.mrb[76].mxu1 %v2607_v50  ;;  %2433 = vmatmul.mubr.msk.bf16.gmra.mrb[76].mxu0 %vm1070_vm0, %v2608_v51 }
  0xf9   : > { %v2240_v52 = vpop.f32.mrb[0].mxu1  ;;  %v2168_v53 = vpop.f32.mrb[0].mxu0 }
  0xfa   : > { %v2241_v54 = vpop.f32.mrb[1].mxu1  ;;  %v2169_v55 = vpop.f32.mrb[1].mxu0 }
  0xfb   : > { %v2867_v56 = vadd.f32 %v2241_v54, %v2240_v52  ;;  %v2243_v57 = vpop.f32.mrb[2].mxu1  ;;  %v2170_v58 = vadd.f32 %v2169_v55, %v2168_v53  ;;  %v2171_v59 = vpop.f32.mrb[2].mxu0  ;;  %v424_v54 = vld [vmem:[%s2893_s7 + $0x10] sm:$0xff] }
  0xfc   : > { %v2244_v60 = vpop.f32.mrb[3].mxu1  ;;  %v2172_v61 = vpop.f32.mrb[3].mxu0 }
  0xfd   : > { %v2869_v62 = vadd.f32 %v2244_v60, %v2243_v57  ;;  %v2173_v63 = vadd.f32 %v2172_v61, %v2171_v59  ;;  %v1154_v42 = vadd.f32 %v2170_v58, %v422_v36  ;;  %v425_v58 = vld [vmem:[%s2893_s7 + $0x18] sm:$0xff] }
  0xff   : > { %v1157_v49 = vadd.f32 %v2173_v63, %v423_v39 }
 0x101   : > { %v2246_v0 = vpop.f32.mrb[4].mxu1  ;;  %v2174_v1 = vpop.f32.mrb[4].mxu0 }
 0x102   : > { %v2247_v2 = vpop.f32.mrb[5].mxu1  ;;  %v2175_v3 = vpop.f32.mrb[5].mxu0 }
 0x103   : > { %v2871_v4 = vadd.f32 %v2247_v2, %v2246_v0  ;;  %v2249_v5 = vpop.f32.mrb[6].mxu1  ;;  %v2176_v6 = vadd.f32 %v2175_v3, %v2174_v1  ;;  %v2177_v7 = vpop.f32.mrb[6].mxu0 }
 0x104   : > { %v2250_v8 = vpop.f32.mrb[7].mxu1  ;;  %v2178_v9 = vpop.f32.mrb[7].mxu0 }
 0x105   : > { %v2873_v10 = vadd.f32 %v2250_v8, %v2249_v5  ;;  %v2179_v11 = vadd.f32 %v2178_v9, %v2177_v7  ;;  %v1162_v61 = vadd.f32 %v2176_v6, %v424_v54  ;;  %v427_v6 = vld [vmem:[%s2893_s7 + $0x28] sm:$0xff] }
 0x107   : > { %v1165_v7 = vadd.f32 %v2179_v11, %v425_v58 }
 0x109   : > { %v2252_v12 = vpop.f32.mrb[8].mxu1  ;;  %v2180_v13 = vpop.f32.mrb[8].mxu0 }
 0x10a   : > { %v2253_v14 = vpop.f32.mrb[9].mxu1  ;;  %v2181_v15 = vpop.f32.mrb[9].mxu0 }
 0x10b   : > { %v2875_v16 = vadd.f32 %v2253_v14, %v2252_v12  ;;  %v2255_v17 = vpop.f32.mrb[10].mxu1  ;;  %v2182_v18 = vadd.f32 %v2181_v15, %v2180_v13  ;;  %v2183_v19 = vpop.f32.mrb[10].mxu0  ;;  %v426_v14 = vld [vmem:[%s2893_s7 + $0x20] sm:$0xff] }
 0x10c   : > { %v2256_v20 = vpop.f32.mrb[11].mxu1  ;;  %v2184_v21 = vpop.f32.mrb[11].mxu0 }
 0x10d   : > { %v2877_v22 = vadd.f32 %v2256_v20, %v2255_v17  ;;  %v2879_v23 = vadd.f32 %v2184_v21, %v2183_v19  ;;  %v1170_v21 = vadd.f32 %v2182_v18, %v426_v14  ;;  %v429_v18 = vld [vmem:[%s2893_s7 + $0x38] sm:$0xff] }
 0x111   : > { %v2258_v24 = vpop.f32.mrb[12].mxu1  ;;  %v2186_v25 = vpop.f32.mrb[12].mxu0 }
 0x112   : > { %v2259_v26 = vpop.f32.mrb[13].mxu1  ;;  %v2187_v27 = vpop.f32.mrb[13].mxu0 }
 0x113   : > { %v2881_v28 = vadd.f32 %v2259_v26, %v2258_v24  ;;  %v2261_v29 = vpop.f32.mrb[14].mxu1  ;;  %v2883_v30 = vadd.f32 %v2187_v27, %v2186_v25  ;;  %v2189_v31 = vpop.f32.mrb[14].mxu0 }
 0x114   : > { %v2262_v32 = vpop.f32.mrb[15].mxu1  ;;  %v2190_v33 = vpop.f32.mrb[15].mxu0 }
 0x115   : > { %v2886_v34 = vadd.f32 %v2262_v32, %v2261_v29  ;;  %v2888_v35 = vadd.f32 %v2190_v33, %v2189_v31  ;;  %v1173_v31 = vadd.f32 %v2879_v23, %v427_v6 }
 0x119   : > { %v2280_v37 = vpop.f32.mrb[16].mxu1  ;;  %v2192_v38 = vpop.f32.mrb[16].mxu0 }
 0x11a   : > { %v2281_v40 = vpop.f32.mrb[17].mxu1  ;;  %v2193_v41 = vpop.f32.mrb[17].mxu0 }
 0x11b   : > { %v2282_v43 = vadd.f32 %v2281_v40, %v2280_v37  ;;  %v2283_v44 = vpop.f32.mrb[18].mxu1  ;;  %v2897_v45 = vadd.f32 %v2193_v41, %v2192_v38  ;;  %v2195_v46 = vpop.f32.mrb[18].mxu0  ;;  %v428_v38 = vld [vmem:[%s2893_s7 + $0x30] sm:$0xff] }
 0x11c   : > { %v2284_v47 = vpop.f32.mrb[19].mxu1  ;;  %v2196_v48 = vpop.f32.mrb[19].mxu0 }
 0x11d   : > { %v2285_v50 = vadd.f32 %v2284_v47, %v2283_v44  ;;  %v2899_v51 = vadd.f32 %v2196_v48, %v2195_v46  ;;  %v2901_v52 = vadd.f32 %v2282_v43, %v1154_v42  ;;  %v1178_v43 = vadd.f32 %v2883_v30, %v428_v38  ;;  %v431_v30 = vld [vmem:[%s2893_s7 + $0x48] sm:$0xff] }
 0x11f   : > { %v2903_v53 = vadd.f32 %v2285_v50, %v1157_v49  ;;  %v1181_v50 = vadd.f32 %v2888_v35, %v429_v18 }
 0x121   : > { %v2286_v55 = vpop.f32.mrb[20].mxu1  ;;  %v2198_v57 = vpop.f32.mrb[20].mxu0 }
 0x122   : > { %v2287_v59 = vpop.f32.mrb[21].mxu1  ;;  %v2199_v60 = vpop.f32.mrb[21].mxu0 }
 0x123   : > { %v2288_v0 = vadd.f32 %v2287_v59, %v2286_v55  ;;  %v2289_v1 = vpop.f32.mrb[22].mxu1  ;;  %v2907_v2 = vadd.f32 %v2199_v60, %v2198_v57  ;;  %v2201_v63 = vpop.f32.mrb[22].mxu0  ;;  %v430_v59 = vld [vmem:[%s2893_s7 + $0x40] sm:$0xff] }
 0x124   : > { %v2290_v3 = vpop.f32.mrb[23].mxu1  ;;  %v2202_v5 = vpop.f32.mrb[23].mxu0 }
 0x125   : > { %v2291_v8 = vadd.f32 %v2290_v3, %v2289_v1  ;;  %v2909_v9 = vadd.f32 %v2202_v5, %v2201_v63  ;;  %v2911_v12 = vadd.f32 %v2288_v0, %v1162_v61  ;;  %v1186_v63 = vadd.f32 %v2897_v45, %v430_v59  ;;  %v433_v45 = vld [vmem:[%s2893_s7 + $0x58] sm:$0xff] }
 0x127   : > { %v2913_v13 = vadd.f32 %v2291_v8, %v1165_v7  ;;  %v1197_v18 = vadd.f32 %v2909_v9, %v433_v45 }
 0x129   : > { %v2292_v15 = vpop.f32.mrb[24].mxu1  ;;  %v2204_v17 = vpop.f32.mrb[24].mxu0 }
 0x12a   : > { %v2293_v19 = vpop.f32.mrb[25].mxu1  ;;  %v2205_v20 = vpop.f32.mrb[25].mxu0 }
 0x12b   : > { %v2294_v24 = vadd.f32 %v2293_v19, %v2292_v15  ;;  %v2295_v25 = vpop.f32.mrb[26].mxu1  ;;  %v2917_v26 = vadd.f32 %v2205_v20, %v2204_v17  ;;  %v2207_v11 = vpop.f32.mrb[26].mxu0  ;;  %v1189_v15 = vadd.f32 %v2899_v51, %v431_v30 }
 0x12c   : > { %v2296_v27 = vpop.f32.mrb[27].mxu1  ;;  %v2208_v29 = vpop.f32.mrb[27].mxu0 }
 0x12d   : > { %v2297_v32 = vadd.f32 %v2296_v27, %v2295_v25  ;;  %v2920_v33 = vadd.f32 %v2208_v29, %v2207_v11  ;;  %v2922_v36 = vadd.f32 %v2294_v24, %v1170_v21  ;;  %v432_v21 = vld [vmem:[%s2893_s7 + $0x50] sm:$0xff] }
 0x12e   : > { %v1194_v29 = vadd.f32 %v2907_v2, %v432_v21  ;;  %v435_v2 = vld [vmem:[%s2893_s7 + $0x68] sm:$0xff] }
 0x12f   : > { %v2924_v37 = vadd.f32 %v2297_v32, %v1173_v31 }
 0x131   : > { %v2298_v39 = vpop.f32.mrb[28].mxu1  ;;  %v2210_v40 = vpop.f32.mrb[28].mxu0 }
 0x132   : > { %v2299_v41 = vpop.f32.mrb[29].mxu1  ;;  %v2211_v42 = vpop.f32.mrb[29].mxu0 }
 0x133   : > { %v2300_v44 = vadd.f32 %v2299_v41, %v2298_v39  ;;  %v2301_v46 = vpop.f32.mrb[30].mxu1  ;;  %v2929_v23 = vadd.f32 %v2211_v42, %v2210_v40  ;;  %v2213_v47 = vpop.f32.mrb[30].mxu0 }
 0x134   : > { %v2302_v48 = vpop.f32.mrb[31].mxu1  ;;  %v2214_v49 = vpop.f32.mrb[31].mxu0 }
 0x135   : > { %v2303_v54 = vadd.f32 %v2302_v48, %v2301_v46  ;;  %v2932_v55 = vadd.f32 %v2214_v49, %v2213_v47  ;;  %v2934_v57 = vadd.f32 %v2300_v44, %v1178_v43  ;;  %v434_v46 = vld [vmem:[%s2893_s7 + $0x60] sm:$0xff] }
 0x137   : > { %v2936_v58 = vadd.f32 %v2303_v54, %v1181_v50  ;;  %v1202_v54 = vadd.f32 %v2917_v26, %v434_v46  ;;  %v437_v26 = vld [vmem:[%s2893_s7 + $0x78] sm:$0xff] }
 0x139   : > { %v2304_v60 = vpop.f32.mrb[32].mxu1  ;;  %v2216_v61 = vpop.f32.mrb[32].mxu0 }
 0x13a   : > { %v2305_v0 = vpop.f32.mrb[33].mxu1  ;;  %v2217_v1 = vpop.f32.mrb[33].mxu0 }
 0x13b   : > { %v2306_v3 = vadd.f32 %v2305_v0, %v2304_v60  ;;  %v2307_v5 = vpop.f32.mrb[34].mxu1  ;;  %v2941_v35 = vadd.f32 %v2217_v1, %v2216_v61  ;;  %v2219_v7 = vpop.f32.mrb[34].mxu0  ;;  %v1205_v1 = vadd.f32 %v2920_v33, %v435_v2 }
 0x13c   : > { %v2308_v8 = vpop.f32.mrb[35].mxu1  ;;  %v2220_v14 = vpop.f32.mrb[35].mxu0 }
 0x13d   : > { %v2309_v17 = vadd.f32 %v2308_v8, %v2307_v5  ;;  %v2944_v6 = vadd.f32 %v2220_v14, %v2219_v7  ;;  %v2946_v19 = vadd.f32 %v2306_v3, %v1186_v63  ;;  %v436_v8 = vld [vmem:[%s2893_s7 + $0x70] sm:$0xff] }
 0x13f   : > { %v2948_v20 = vadd.f32 %v2309_v17, %v1189_v15 }
 0x141   : > { %v2310_v24 = vpop.f32.mrb[36].mxu1  ;;  %v2222_v25 = vpop.f32.mrb[36].mxu0 }
 0x142   : > { %v2311_v11 = vpop.f32.mrb[37].mxu1  ;;  %v2223_v27 = vpop.f32.mrb[37].mxu0 }
 0x143   : > { %v2312_v31 = vadd.f32 %v2311_v11, %v2310_v24  ;;  %v2313_v32 = vpop.f32.mrb[38].mxu1  ;;  %v2953_v51 = vadd.f32 %v2223_v27, %v2222_v25  ;;  %v2225_v38 = vpop.f32.mrb[38].mxu0  ;;  %v1210_v24 = vadd.f32 %v2929_v23, %v436_v8 }
 0x144   : > { %v2314_v39 = vpop.f32.mrb[39].mxu1  ;;  %v2226_v40 = vpop.f32.mrb[39].mxu0 }
 0x145   : > { %v2315_v41 = vadd.f32 %v2314_v39, %v2313_v32  ;;  %v2956_v42 = vadd.f32 %v2226_v40, %v2225_v38  ;;  %v2958_v43 = vadd.f32 %v2312_v31, %v1194_v29  ;;  %v1213_v31 = vadd.f32 %v2932_v55, %v437_v26 }
 0x147   : > { %v2960_v44 = vadd.f32 %v2315_v41, %v1197_v18  ;;  %v438_v18 = vld [vmem:[%s2893_s7 + $0x80] sm:$0xff]  ;;  %v439_v41 = vld [vmem:[%s2893_s7 + $0x88] sm:$0xff] }
 0x149   : > { %v2316_v47 = vpop.f32.mrb[40].mxu1  ;;  %v2228_v48 = vpop.f32.mrb[40].mxu0 }
 0x14a   : > { %v2317_v49 = vpop.f32.mrb[41].mxu1  ;;  %v2229_v50 = vpop.f32.mrb[41].mxu0 }
 0x14b   : > { %v2318_v59 = vadd.f32 %v2317_v49, %v2316_v47  ;;  %v2319_v60 = vpop.f32.mrb[42].mxu1  ;;  %v2965_v9 = vadd.f32 %v2229_v50, %v2228_v48  ;;  %v2231_v61 = vpop.f32.mrb[42].mxu0  ;;  %v2991_v47 = vld [vmem:[%s3208_s3] ss:$0 sm:$0xff]  ;;  %v1218_v49 = vadd.f32 %v2941_v35, %v438_v18 }
 0x14c   : > { %v2320_v30 = vpop.f32.mrb[43].mxu1  ;;  %v2232_v0 = vpop.f32.mrb[43].mxu0  ;;  %v2998_v50 = vld [vmem:[%s3209_s4] ss:$0 sm:$0xff] }
 0x14d   : > { %v2321_v63 = vadd.f32 %v2320_v30, %v2319_v60  ;;  %v2968_v3 = vadd.f32 %v2232_v0, %v2231_v61  ;;  %v2970_v5 = vadd.f32 %v2318_v59, %v1202_v54  ;;  %v1221_v30 = vadd.f32 %v2944_v6, %v439_v41  ;;  %v440_v6 = vld [vmem:[%s2893_s7 + $0x90] sm:$0xff] }
 0x14f   : > { %v2972_v7 = vadd.f32 %v2321_v63, %v1205_v1 }
 0x151   : > { %v2322_v14 = vpop.f32.mrb[44].mxu1  ;;  %v2234_v15 = vpop.f32.mrb[44].mxu0 }
 0x152   : > { %v2323_v17 = vpop.f32.mrb[45].mxu1  ;;  %v2235_v21 = vpop.f32.mrb[45].mxu0 }
 0x153   : > { %v2324_v25 = vadd.f32 %v2323_v17, %v2322_v14  ;;  %v2325_v45 = vpop.f32.mrb[46].mxu1  ;;  %v2977_v33 = vadd.f32 %v2235_v21, %v2234_v15  ;;  %v2237_v11 = vpop.f32.mrb[46].mxu0 }
 0x154   : > { %v2326_v27 = vpop.f32.mrb[47].mxu1  ;;  %v2238_v29 = vpop.f32.mrb[47].mxu0 }
 0x155   : > { %v2327_v32 = vadd.f32 %v2326_v27, %v2325_v45  ;;  %v2980_v38 = vadd.f32 %v2238_v29, %v2237_v11  ;;  %v2982_v39 = vadd.f32 %v2324_v25, %v1210_v24  ;;  %v441_v45 = vld [vmem:[%s2893_s7 + $0x98] sm:$0xff] }
 0x157   : > { %v2984_v40 = vadd.f32 %v2327_v32, %v1213_v31  ;;  %v1226_v31 = vadd.f32 %v2953_v51, %v440_v6 }
 0x159   : > { %v2328_v46 = vpop.f32.mrb[48].mxu1  ;;  %v2406_v23 = vpop.f32.mrb[48].mxu0 }
 0x15a   : > { %v1484_v48 = vadd.f32 %v2406_v23, %v2911_v12  ;;  %v2329_v2 = vpop.f32.mrb[49].mxu1  ;;  %v1475_v55 = vpop.f32.mrb[49].mxu0 }
 0x15b   : > { %v2330_v54 = vadd.f32 %v2329_v2, %v2328_v46  ;;  %v1476_v59 = vadd.f32 %v1475_v55, %v2901_v52  ;;  %v2331_v60 = vpop.f32.mrb[50].mxu1  ;;  %v2407_v61 = vpop.f32.mrb[50].mxu0 }
 0x15c   : > { %v1611_v12 = vmul.f32 %v2991_v47, %v1484_v48  ;;  %v1487_v0 = vadd.f32 %v2407_v61, %v2913_v13  ;;  %v2332_v1 = vpop.f32.mrb[51].mxu1  ;;  %v1478_v35 = vpop.f32.mrb[51].mxu0 }
 0x15d   : > { %v1609_v63 = vmul.f32 %v2991_v47, %v1476_v59  ;;  %v2333_v8 = vadd.f32 %v2332_v1, %v2331_v60  ;;  %v1479_v14 = vadd.f32 %v1478_v35, %v2903_v53  ;;  %v3006_v15 = vadd.f32 %v2330_v54, %v1218_v49 }
 0x15e   : > { %v1650_v52 = vadd.f32 %v2998_v50, %v1611_v12  ;;  %v1612_v26 = vmul.f32 %v2991_v47, %v1487_v0  ;;  %v1229_v60 = vadd.f32 %v2956_v42, %v441_v45 }
 0x15f   : > { %v1648_v17 = vadd.f32 %v2998_v50, %v1609_v63  ;;  %v1610_v13 = vmul.f32 %v2991_v47, %v1479_v14  ;;  %v3014_v21 = vadd.f32 %v2333_v8, %v1221_v30 }
 0x160   : > { %v1682_v24 = vmax.f32 %v1650_v52, 0.0  ;;  %v1651_v25 = vadd.f32 %v2998_v50, %v1612_v26 }
 0x161   : > { %v1680_v53 = vmax.f32 %v1648_v17, 0.0  ;;  %v1649_v11 = vadd.f32 %v2998_v50, %v1610_v13  ;;  %v2334_v27 = vpop.f32.mrb[52].mxu1  ;;  %v2410_v29 = vpop.f32.mrb[52].mxu0  ;;  %v443_v17 = vld [vmem:[%s2893_s7 + $0xa8] sm:$0xff] }
 0x162   : > { %v2122_v32 = vpack.c.bf16 %v1682_v24, %v1682_v24  ;;  %v1683_v18 = vmax.f32 %v1651_v25, 0.0  ;;  %v1500_v41 = vadd.f32 %v2410_v29, %v2934_v57  ;;  %v2335_v46 = vpop.f32.mrb[53].mxu1  ;;  %v1491_v23 = vpop.f32.mrb[53].mxu0 }
 0x163   : > { %v2120_v48 = vpack.c.bf16 %v1680_v53, %v1680_v53  ;;  %v1681_v2 = vmax.f32 %v1649_v11, 0.0  ;;  %v2336_v55 = vadd.f32 %v2335_v46, %v2334_v27  ;;  %v1492_v49 = vadd.f32 %v1491_v23, %v2922_v36  ;;  %v2337_v54 = vpop.f32.mrb[54].mxu1  ;;  %v2411_v59 = vpop.f32.mrb[54].mxu0 }
 0x164   : > { %1843 = vst.msk [vmem:[%s3021_s15 + $0x8] sm:$0xf] %vm1840_vm1, %v2122_v32  ;;  %v2123_v51 = vpack.c.bf16 %v1683_v18, %v1683_v18  ;;  %v1615_v57 = vmul.f32 %v2991_v47, %v1500_v41  ;;  %v1503_v61 = vadd.f32 %v2411_v59, %v2936_v58  ;;  %v2338_v30 = vpop.f32.mrb[55].mxu1  ;;  %v1494_v12 = vpop.f32.mrb[55].mxu0  ;;  %v442_v58 = vld [vmem:[%s2893_s7 + $0xa0] sm:$0xff] }
 0x165   : > { %1841 = vst.msk [vmem:[%s3021_s15] sm:$0xf] %vm1840_vm1, %v2120_v48  ;;  %v2121_v0 = vpack.c.bf16 %v1681_v2, %v1681_v2  ;;  %v1613_v36 = vmul.f32 %v2991_v47, %v1492_v49  ;;  %v2339_v1 = vadd.f32 %v2338_v30, %v2337_v54  ;;  %v1495_v42 = vadd.f32 %v1494_v12, %v2924_v37 }
 0x166   : > { %1844 = vst.msk [vmem:[%s3021_s15 + $0xc] sm:$0xf] %vm1840_vm1, %v2123_v51  ;;  %v1654_v35 = vadd.f32 %v2998_v50, %v1615_v57  ;;  %v1616_v63 = vmul.f32 %v2991_v47, %v1503_v61  ;;  %v3040_v8 = vadd.f32 %v2336_v55, %v1226_v31  ;;  %v1234_v53 = vadd.f32 %v2965_v9, %v442_v58 }
 0x167   : > { %1842 = vst.msk [vmem:[%s3021_s15 + $0x4] sm:$0xf] %vm1840_vm1, %v2121_v0  ;;  %v1652_v14 = vadd.f32 %v2998_v50, %v1613_v36  ;;  %v1614_v52 = vmul.f32 %v2991_v47, %v1495_v42  ;;  %v3047_v26 = vadd.f32 %v2339_v1, %v1229_v60  ;;  %v1237_v55 = vadd.f32 %v2968_v3, %v443_v17  ;;  %v445_v42 = vld [vmem:[%s2893_s7 + $0xb8] sm:$0xff] }
 0x168   : > { %v1686_v6 = vmax.f32 %v1654_v35, 0.0  ;;  %v1655_v37 = vadd.f32 %v2998_v50, %v1616_v63 }
 0x169   : > { %v1684_v13 = vmax.f32 %v1652_v14, 0.0  ;;  %v1653_v24 = vadd.f32 %v2998_v50, %v1614_v52  ;;  %v2340_v25 = vpop.f32.mrb[56].mxu1  ;;  %v2414_v45 = vpop.f32.mrb[56].mxu0 }
 0x16a   : > { %v2126_v11 = vpack.c.bf16 %v1686_v6, %v1686_v6  ;;  %v1687_v27 = vmax.f32 %v1655_v37, 0.0  ;;  %v1516_v29 = vadd.f32 %v2414_v45, %v2958_v43  ;;  %v2341_v31 = vpop.f32.mrb[57].mxu1  ;;  %v1507_v32 = vpop.f32.mrb[57].mxu0 }
 0x16b   : > { %v2124_v18 = vpack.c.bf16 %v1684_v13, %v1684_v13  ;;  %v1685_v41 = vmax.f32 %v1653_v24, 0.0  ;;  %v2342_v46 = vadd.f32 %v2341_v31, %v2340_v25  ;;  %v1508_v23 = vadd.f32 %v1507_v32, %v2946_v19  ;;  %v2343_v48 = vpop.f32.mrb[58].mxu1  ;;  %v2415_v2 = vpop.f32.mrb[58].mxu0 }
 0x16c   : > { %1847 = vst.msk [vmem:[%s3021_s15 + $0x18] sm:$0xf] %vm1840_vm1, %v2126_v11  ;;  %v2127_v9 = vpack.c.bf16 %v1687_v27, %v1687_v27  ;;  %v1619_v43 = vmul.f32 %v2991_v47, %v1516_v29  ;;  %v1519_v49 = vadd.f32 %v2415_v2, %v2960_v44  ;;  %v2344_v54 = vpop.f32.mrb[59].mxu1  ;;  %v1510_v59 = vpop.f32.mrb[59].mxu0  ;;  %v444_v44 = vld [vmem:[%s2893_s7 + $0xb0] sm:$0xff]  ;;  %v1245_v31 = vadd.f32 %v2980_v38, %v445_v42 }
 0x16d   : > { %1845 = vst.msk [vmem:[%s3021_s15 + $0x10] sm:$0xf] %vm1840_vm1, %v2124_v18  ;;  %v2125_v60 = vpack.c.bf16 %v1685_v41, %v1685_v41  ;;  %v1617_v19 = vmul.f32 %v2991_v47, %v1508_v23  ;;  %v2345_v51 = vadd.f32 %v2344_v54, %v2343_v48  ;;  %v1511_v3 = vadd.f32 %v1510_v59, %v2948_v20 }
 0x16e   : > { %1848 = vst.msk [vmem:[%s3021_s15 + $0x1c] sm:$0xf] %vm1840_vm1, %v2127_v9  ;;  %v1658_v57 = vadd.f32 %v2998_v50, %v1619_v43  ;;  %v1620_v61 = vmul.f32 %v2991_v47, %v1519_v49  ;;  %v3068_v30 = vadd.f32 %v2342_v46, %v1234_v53  ;;  %v1242_v52 = vadd.f32 %v2977_v33, %v444_v44  ;;  %v446_v9 = vld [vmem:[%s2893_s7 + $0xc0] sm:$0xff] }
 0x16f   : > { %1846 = vst.msk [vmem:[%s3021_s15 + $0x14] sm:$0xf] %vm1840_vm1, %v2125_v60  ;;  %v1656_v12 = vadd.f32 %v2998_v50, %v1617_v19  ;;  %v1618_v0 = vmul.f32 %v2991_v47, %v1511_v3  ;;  %v3075_v36 = vadd.f32 %v2345_v51, %v1237_v55 }
 0x170   : > { %v1690_v1 = vmax.f32 %v1658_v57, 0.0  ;;  %v1659_v20 = vadd.f32 %v2998_v50, %v1620_v61  ;;  %v1250_v57 = vadd.f32 %v2867_v56, %v446_v9 }
 0x171   : > { %v1688_v35 = vmax.f32 %v1656_v12, 0.0  ;;  %v1657_v63 = vadd.f32 %v2998_v50, %v1618_v0  ;;  %v2346_v58 = vpop.f32.mrb[60].mxu1  ;;  %v2418_v14 = vpop.f32.mrb[60].mxu0 }
 0x172   : > { %v2130_v6 = vpack.c.bf16 %v1690_v1, %v1690_v1  ;;  %v1691_v37 = vmax.f32 %v1659_v20, 0.0  ;;  %v1532_v17 = vadd.f32 %v2418_v14, %v2982_v39  ;;  %v2347_v13 = vpop.f32.mrb[61].mxu1  ;;  %v1523_v24 = vpop.f32.mrb[61].mxu0 }
 0x173   : > { %v2128_v25 = vpack.c.bf16 %v1688_v35, %v1688_v35  ;;  %v1689_v45 = vmax.f32 %v1657_v63, 0.0  ;;  %v2348_v53 = vadd.f32 %v2347_v13, %v2346_v58  ;;  %v1524_v11 = vadd.f32 %v1523_v24, %v2970_v5  ;;  %v2349_v27 = vpop.f32.mrb[62].mxu1  ;;  %v2419_v29 = vpop.f32.mrb[62].mxu0 }
 0x174   : > { %1851 = vst.msk [vmem:[%s3021_s15 + $0x28] sm:$0xf] %vm1840_vm1, %v2130_v6  ;;  %v2131_v33 = vpack.c.bf16 %v1691_v37, %v1691_v37  ;;  %v1623_v39 = vmul.f32 %v2991_v47, %v1532_v17  ;;  %v1535_v32 = vadd.f32 %v2419_v29, %v2984_v40  ;;  %v2350_v18 = vpop.f32.mrb[63].mxu1  ;;  %v1526_v41 = vpop.f32.mrb[63].mxu0 }
 0x175   : > { %1849 = vst.msk [vmem:[%s3021_s15 + $0x20] sm:$0xf] %vm1840_vm1, %v2128_v25  ;;  %v2129_v46 = vpack.c.bf16 %v1689_v45, %v1689_v45  ;;  %v1621_v5 = vmul.f32 %v2991_v47, %v1524_v11  ;;  %v2351_v23 = vadd.f32 %v2350_v18, %v2349_v27  ;;  %v1527_v38 = vadd.f32 %v1526_v41, %v2972_v7  ;;  %v447_v7 = vld [vmem:[%s2893_s7 + $0xc8] sm:$0xff]  ;;  %v448_v11 = vld [vmem:[%s2893_s7 + $0xd0] sm:$0xff] }
 0x176   : > { %1852 = vst.msk [vmem:[%s3021_s15 + $0x2c] sm:$0xf] %vm1840_vm1, %v2131_v33  ;;  %v1662_v48 = vadd.f32 %v2998_v50, %v1623_v39  ;;  %v1624_v2 = vmul.f32 %v2991_v47, %v1535_v32  ;;  %v1403_v55 = vadd.f32 %v2348_v53, %v1242_v52  ;;  %v1253_v52 = vadd.f32 %v2869_v62, %v447_v7 }
 0x177   : > { %1850 = vst.msk [vmem:[%s3021_s15 + $0x24] sm:$0xf] %vm1840_vm1, %v2129_v46  ;;  %v1660_v40 = vadd.f32 %v2998_v50, %v1621_v5  ;;  %v1622_v43 = vmul.f32 %v2991_v47, %v1527_v38  ;;  %v3101_v49 = vadd.f32 %v2351_v23, %v1245_v31  ;;  %v1258_v46 = vadd.f32 %v2871_v4, %v448_v11 }
 0x178   : > { %v1694_v54 = vmax.f32 %v1662_v48, 0.0  ;;  %v1663_v59 = vadd.f32 %v2998_v50, %v1624_v2 }
 0x179   : > { %v1692_v60 = vmax.f32 %v1660_v40, 0.0  ;;  %v1661_v19 = vadd.f32 %v2998_v50, %v1622_v43  ;;  %v2352_v51 = vpop.f32.mrb[64].mxu1  ;;  %v2422_v3 = vpop.f32.mrb[64].mxu0 }
 0x17a   : > { %v2134_v61 = vpack.c.bf16 %v1694_v54, %v1694_v54  ;;  %v1695_v44 = vmax.f32 %v1663_v59, 0.0  ;;  %v1548_v12 = vadd.f32 %v2422_v3, %v3040_v8  ;;  %v2353_v0 = vpop.f32.mrb[65].mxu1  ;;  %v1539_v1 = vpop.f32.mrb[65].mxu0 }
 0x17b   : > { %v2132_v20 = vpack.c.bf16 %v1692_v60, %v1692_v60  ;;  %v1693_v42 = vmax.f32 %v1661_v19, 0.0  ;;  %v2354_v35 = vadd.f32 %v2353_v0, %v2352_v51  ;;  %v1540_v63 = vadd.f32 %v1539_v1, %v3006_v15  ;;  %v2355_v58 = vpop.f32.mrb[66].mxu1  ;;  %v2423_v14 = vpop.f32.mrb[66].mxu0  ;;  %v450_v1 = vld [vmem:[%s2893_s7 + $0xe0] sm:$0xff] }
 0x17c   : > { %1855 = vst.msk [vmem:[%s3021_s15 + $0x38] sm:$0xf] %vm1840_vm1, %v2134_v61  ;;  %v2135_v56 = vpack.c.bf16 %v1695_v44, %v1695_v44  ;;  %v1627_v8 = vmul.f32 %v2991_v47, %v1548_v12  ;;  %v1551_v6 = vadd.f32 %v2423_v14, %v3047_v26  ;;  %v2356_v37 = vpop.f32.mrb[67].mxu1  ;;  %v1542_v17 = vpop.f32.mrb[67].mxu0 }
 0x17d   : > { %1853 = vst.msk [vmem:[%s3021_s15 + $0x30] sm:$0xf] %vm1840_vm1, %v2132_v20  ;;  %v2133_v13 = vpack.c.bf16 %v1693_v42, %v1693_v42  ;;  %v1625_v15 = vmul.f32 %v2991_v47, %v1540_v63  ;;  %v2357_v24 = vadd.f32 %v2356_v37, %v2355_v58  ;;  %v1543_v62 = vadd.f32 %v1542_v17, %v3014_v21  ;;  %v449_v21 = vld [vmem:[%s2893_s7 + $0xd8] sm:$0xff]  ;;  %v451_v58 = vld [vmem:[%s2893_s7 + $0xe8] sm:$0xff] }
 0x17e   : > { %1856 = vst.msk [vmem:[%s3021_s15 + $0x3c] sm:$0xf] %vm1840_vm1, %v2135_v56  ;;  %v1666_v25 = vadd.f32 %v2998_v50, %v1627_v8  ;;  %v1628_v45 = vmul.f32 %v2991_v47, %v1551_v6  ;;  %v1411_v53 = vadd.f32 %v2354_v35, %v1250_v57  ;;  %v1261_v60 = vadd.f32 %v2873_v10, %v449_v21 }
 0x17f   : > { %1854 = vst.msk [vmem:[%s3021_s15 + $0x34] sm:$0xf] %vm1840_vm1, %v2133_v13  ;;  %v1664_v26 = vadd.f32 %v2998_v50, %v1625_v15  ;;  %v1626_v27 = vmul.f32 %v2991_v47, %v1543_v62  ;;  %v3127_v29 = vadd.f32 %v2357_v24, %v1253_v52  ;;  %v1266_v8 = vadd.f32 %v2875_v16, %v450_v1 }
 0x180   : > { %v1698_v31 = vmax.f32 %v1666_v25, 0.0  ;;  %v1667_v33 = vadd.f32 %v2998_v50, %v1628_v45 }
 0x181   : > { %v1696_v39 = vmax.f32 %v1664_v26, 0.0  ;;  %v1665_v32 = vadd.f32 %v2998_v50, %v1626_v27  ;;  %v2358_v18 = vpop.f32.mrb[68].mxu1  ;;  %v2426_v41 = vpop.f32.mrb[68].mxu0  ;;  %v1269_v27 = vadd.f32 %v2877_v22, %v451_v58 }
 0x182   : > { %v2138_v5 = vpack.c.bf16 %v1698_v31, %v1698_v31  ;;  %v1699_v23 = vmax.f32 %v1667_v33, 0.0  ;;  %v1564_v38 = vadd.f32 %v2426_v41, %v1403_v55  ;;  %v2359_v48 = vpop.f32.mrb[69].mxu1  ;;  %v1555_v2 = vpop.f32.mrb[69].mxu0 }
 0x183   : > { %v2136_v9 = vpack.c.bf16 %v1696_v39, %v1696_v39  ;;  %v1697_v40 = vmax.f32 %v1665_v32, 0.0  ;;  %v2360_v43 = vadd.f32 %v2359_v48, %v2358_v18  ;;  %v1556_v54 = vadd.f32 %v1555_v2, %v3068_v30  ;;  %v2361_v59 = vpop.f32.mrb[70].mxu1  ;;  %v2427_v7 = vpop.f32.mrb[70].mxu0 }
 0x184   : > { %1859 = vst.msk [vmem:[%s3021_s15 + $0x48] sm:$0xf] %vm1840_vm1, %v2138_v5  ;;  %v2139_v4 = vpack.c.bf16 %v1699_v23, %v1699_v23  ;;  %v1631_v55 = vmul.f32 %v2991_v47, %v1564_v38  ;;  %v1567_v19 = vadd.f32 %v2427_v7, %v3101_v49  ;;  %v2362_v51 = vpop.f32.mrb[71].mxu1  ;;  %v1558_v3 = vpop.f32.mrb[71].mxu0  ;;  %v452_v23 = vld [vmem:[%s2893_s7 + $0xf0] sm:$0xff] }
 0x185   : > { %1857 = vst.msk [vmem:[%s3021_s15 + $0x40] sm:$0xf] %vm1840_vm1, %v2136_v9  ;;  %v2137_v57 = vpack.c.bf16 %v1697_v40, %v1697_v40  ;;  %v1629_v30 = vmul.f32 %v2991_v47, %v1556_v54  ;;  %v2363_v61 = vadd.f32 %v2362_v51, %v2361_v59  ;;  %v1559_v10 = vadd.f32 %v1558_v3, %v3075_v36 }
 0x186   : > { %1860 = vst.msk [vmem:[%s3021_s15 + $0x4c] sm:$0xf] %vm1840_vm1, %v2139_v4  ;;  %v1670_v44 = vadd.f32 %v2998_v50, %v1631_v55  ;;  %v1632_v12 = vmul.f32 %v2991_v47, %v1567_v19  ;;  %v1419_v0 = vadd.f32 %v2360_v43, %v1258_v46  ;;  %v453_v43 = vld [vmem:[%s2893_s7 + $0xf8] sm:$0xff] }
 0x187   : > { %1858 = vst.msk [vmem:[%s3021_s15 + $0x44] sm:$0xf] %vm1840_vm1, %v2137_v57  ;;  %v1668_v49 = vadd.f32 %v2998_v50, %v1629_v30  ;;  %v1630_v20 = vmul.f32 %v2991_v47, %v1559_v10  ;;  %v1422_v42 = vadd.f32 %v2363_v61, %v1261_v60  ;;  %v1274_v60 = vadd.f32 %v2881_v28, %v452_v23 }
 0x188   : > { %v1702_v35 = vmax.f32 %v1670_v44, 0.0  ;;  %v1671_v63 = vadd.f32 %v2998_v50, %v1632_v12  ;;  %v1277_v12 = vadd.f32 %v2886_v34, %v453_v43 }
 0x189   : > { %v1700_v36 = vmax.f32 %v1668_v49, 0.0  ;;  %v1669_v14 = vadd.f32 %v2998_v50, %v1630_v20  ;;  %v2364_v52 = vpop.f32.mrb[72].mxu1  ;;  %v2430_v56 = vpop.f32.mrb[72].mxu0 }
 0x18a   : > { %v2142_v6 = vpack.c.bf16 %v1702_v35, %v1702_v35  ;;  %v1703_v37 = vmax.f32 %v1671_v63, 0.0  ;;  %v1580_v17 = vadd.f32 %v2430_v56, %v1419_v0  ;;  %v2365_v13 = vpop.f32.mrb[73].mxu1  ;;  %v1571_v15 = vpop.f32.mrb[73].mxu0 }
 0x18b   : > { %v2140_v24 = vpack.c.bf16 %v1700_v36, %v1700_v36  ;;  %v1701_v62 = vmax.f32 %v1669_v14, 0.0  ;;  %v2366_v25 = vadd.f32 %v2365_v13, %v2364_v52  ;;  %v1572_v45 = vadd.f32 %v1571_v15, %v1411_v53  ;;  %v2367_v11 = vpop.f32.mrb[74].mxu1  ;;  %v2431_v26 = vpop.f32.mrb[74].mxu0 }
 0x18c   : > { %1863 = vst.msk [vmem:[%s3021_s15 + $0x58] sm:$0xf] %vm1840_vm1, %v2142_v6  ;;  %v2143_v16 = vpack.c.bf16 %v1703_v37, %v1703_v37  ;;  %v1635_v31 = vmul.f32 %v2991_v47, %v1580_v17  ;;  %v1583_v33 = vadd.f32 %v2431_v26, %v1422_v42  ;;  %v2368_v21 = vpop.f32.mrb[75].mxu1  ;;  %v1574_v39 = vpop.f32.mrb[75].mxu0 }
 0x18d   : > { %1861 = vst.msk [vmem:[%s3021_s15 + $0x50] sm:$0xf] %vm1840_vm1, %v2140_v24  ;;  %v2141_v32 = vpack.c.bf16 %v1701_v62, %v1701_v62  ;;  %v1633_v53 = vmul.f32 %v2991_v47, %v1572_v45  ;;  %v2369_v18 = vadd.f32 %v2368_v21, %v2367_v11  ;;  %v1575_v41 = vadd.f32 %v1574_v39, %v3127_v29 }
 0x18e   : > { %1864 = vst.msk [vmem:[%s3021_s15 + $0x5c] sm:$0xf] %vm1840_vm1, %v2143_v16  ;;  %v1674_v22 = vadd.f32 %v2998_v50, %v1635_v31  ;;  %v1636_v46 = vmul.f32 %v2991_v47, %v1583_v33  ;;  %v1427_v5 = vadd.f32 %v2366_v25, %v1266_v8 }
 0x18f   : > { %1862 = vst.msk [vmem:[%s3021_s15 + $0x54] sm:$0xf] %vm1840_vm1, %v2141_v32  ;;  %v1672_v38 = vadd.f32 %v2998_v50, %v1633_v53  ;;  %v1634_v48 = vmul.f32 %v2991_v47, %v1575_v41  ;;  %v1430_v2 = vadd.f32 %v2369_v18, %v1269_v27 }
 0x190   : > { %v1706_v9 = vmax.f32 %v1674_v22, 0.0  ;;  %v1675_v40 = vadd.f32 %v2998_v50, %v1636_v46 }
 0x191   : > { %v1704_v29 = vmax.f32 %v1672_v38, 0.0  ;;  %v1673_v54 = vadd.f32 %v2998_v50, %v1634_v48  ;;  %v2370_v59 = vpop.f32.mrb[76].mxu1  ;;  %v2434_v7 = vpop.f32.mrb[76].mxu0 }
 0x192   : > { %v2146_v4 = vpack.c.bf16 %v1706_v9, %v1706_v9  ;;  %v1707_v55 = vmax.f32 %v1675_v40, 0.0  ;;  %v2371_v19 = vpop.f32.mrb[77].mxu1  ;;  %v1587_v51 = vpop.f32.mrb[77].mxu0 }
 0x193   : > { %v2144_v3 = vpack.c.bf16 %v1704_v29, %v1704_v29  ;;  %v1705_v57 = vmax.f32 %v1673_v54, 0.0  ;;  %v2372_v30 = vadd.f32 %v2371_v19, %v2370_v59  ;;  %v1588_v61 = vadd.f32 %v1587_v51, %v1427_v5  ;;  %v2373_v10 = vpop.f32.mrb[78].mxu1  ;;  %v2435_v44 = vpop.f32.mrb[78].mxu0 }
 0x194   : > { %1867 = vst.msk [vmem:[%s3021_s15 + $0x68] sm:$0xf] %vm1840_vm1, %v2146_v4  ;;  %v2147_v0 = vpack.c.bf16 %v1707_v55, %v1707_v55  ;;  %v2374_v1 = vpop.f32.mrb[79].mxu1  ;;  %v1590_v28 = vpop.f32.mrb[79].mxu0 }
 0x195   : > { %1865 = vst.msk [vmem:[%s3021_s15 + $0x60] sm:$0xf] %vm1840_vm1, %v2144_v3  ;;  %v2145_v49 = vpack.c.bf16 %v1705_v57, %v1705_v57  ;;  %v1435_v20 = vadd.f32 %v2372_v30, %v1274_v60  ;;  %v1637_v42 = vmul.f32 %v2991_v47, %v1588_v61  ;;  %v2375_v35 = vadd.f32 %v2374_v1, %v2373_v10 }
 0x196   : > { %1868 = vst.msk [vmem:[%s3021_s15 + $0x6c] sm:$0xf] %vm1840_vm1, %v2147_v0  ;;  %v1591_v63 = vadd.f32 %v1590_v28, %v1430_v2 }
 0x197   : > { %1866 = vst.msk [vmem:[%s3021_s15 + $0x64] sm:$0xf] %vm1840_vm1, %v2145_v49  ;;  %v1596_v58 = vadd.f32 %v2434_v7, %v1435_v20  ;;  %v1676_v34 = vadd.f32 %v2998_v50, %v1637_v42  ;;  %v1438_v36 = vadd.f32 %v2375_v35, %v1277_v12 }
 0x198   : > { %v1638_v14 = vmul.f32 %v2991_v47, %v1591_v63 }
 0x199   : > { %v1639_v52 = vmul.f32 %v2991_v47, %v1596_v58  ;;  %v1708_v56 = vmax.f32 %v1676_v34, 0.0  ;;  %v1599_v8 = vadd.f32 %v2435_v44, %v1438_v36 }
 0x19a   : > { %v1677_v6 = vadd.f32 %v2998_v50, %v1638_v14 }
 0x19b   : > { %v1678_v37 = vadd.f32 %v2998_v50, %v1639_v52  ;;  %v2148_v17 = vpack.c.bf16 %v1708_v56, %v1708_v56  ;;  %v1640_v13 = vmul.f32 %v2991_v47, %v1599_v8 }
 0x19c   : > { %v1709_v15 = vmax.f32 %v1677_v6, 0.0 }
 0x19d   : > { %v1710_v24 = vmax.f32 %v1678_v37, 0.0  ;;  %1869 = vst.msk [vmem:[%s3021_s15 + $0x70] sm:$0xf] %vm1840_vm1, %v2148_v17  ;;  %v1679_v62 = vadd.f32 %v2998_v50, %v1640_v13 }
 0x19e   : > { %v2149_v25 = vpack.c.bf16 %v1709_v15, %v1709_v15 }
 0x19f   : > { %v2150_v45 = vpack.c.bf16 %v1710_v24, %v1710_v24  ;;  %v1711_v11 = vmax.f32 %v1679_v62, 0.0 }
 0x1a0   : > { %1870 = vst.msk [vmem:[%s3021_s15 + $0x74] sm:$0xf] %vm1840_vm1, %v2149_v25 }
 0x1a1   : > { %1871 = vst.msk [vmem:[%s3021_s15 + $0x78] sm:$0xf] %vm1840_vm1, %v2150_v45  ;;  %v2151_v26 = vpack.c.bf16 %v1711_v11, %v1711_v11 }
 0x1a3   : > { %1872 = vst.msk [vmem:[%s3021_s15 + $0x7c] sm:$0xf] %vm1840_vm1, %v2151_v26 }
 0x1a4 PF: > { %s15_s18 = sadd.s32 1, %s2615_s18  }
 0x1a5   : > { %p12_p4 = scmp.ge.s32.totalorder %s15_s18, 4  }
 0x1a7   :  { %14 = sbr.rel (!%p12_p4) target bundleno = 1 (0x1), region = 73 }

// kernel: resnet_stem_forward.9
= control target key start
LH: loop header
LB: loop body
LE: loop exit
PB: predicated region body
PF: predicated region fallthrough
CT: control target
= control target key end

     0   :  { %vm700_vm0 = vcmask 523264   ;;  %s2329_s1 = inlined_call_operand.vmem [shape: bf16[576,256], index: 1, kind: input, shape index: {}]   ;;  %s2330_s0 = inlined_call_operand.vmem [shape: bf16[128,576], index: 0, kind: input, shape index: {}]   ;;  %s2331_s2 = inlined_call_operand.vmem [shape: f32[1,128], index: 2, kind: input, shape index: {}]   ;;  %s2332_s3 = inlined_call_operand.vmem [shape: f32[1,128], index: 3, kind: input, shape index: {}]   ;;  %s2333_s5 = inlined_call_operand.vmem [shape: f32[128,128], index: 5, kind: output, shape index: {1}]   ;;  %s2334_s4 = inlined_call_operand.vmem [shape: bf16[128,128], index: 4, kind: output, shape index: {0}]  }
   0x1   :  { %v1528_v0 = vld [vmem:[%s2329_s1 + $0x4] ss:$8 sps:$4 sm:$0xff]   ;;  %v1532_v2 = vld [vmem:[%s2329_s1] ss:$8 sps:$4 sm:$0xff]   ;;  %v1534_v4 = vld [vmem:[%s2329_s1 + $0x14] ss:$8 sps:$4 sm:$0xff]  }
   0x2   :  { %v1729_v1 = vld [vmem:[%s2329_s1 + $0x104] ss:$8 sps:$4 sm:$0xff]   ;;  %725 = vmatprep.subr.bf16.mxu1 %v1528_v0  ;;  %v1737_v3 = vld [vmem:[%s2329_s1 + $0x100] ss:$8 sps:$4 sm:$0xff]   ;;  %v1747_v5 = vld [vmem:[%s2329_s1 + $0x114] ss:$8 sps:$4 sm:$0xff]  }
   0x3   :  { %838 = vmatprep.subr.bf16.mxu0 %v1729_v1  ;;  %726 = vmatpush1.bf16.msra.mxu1 %v1532_v2  ;;  %v1538_v6 = vld [vmem:[%s2329_s1 + $0x10] ss:$8 sps:$4 sm:$0xff]   ;;  %v1540_v8 = vld [vmem:[%s2329_s1 + $0x24] ss:$8 sps:$4 sm:$0xff]   ;;  %v1544_v10 = vld [vmem:[%s2329_s1 + $0x20] ss:$8 sps:$4 sm:$0xff]  }
   0x4   :  { %839 = vmatpush1.bf16.msra.mxu0 %v1737_v3  ;;  %727 = vmatprep.subr.bf16.mxu1 %v1534_v4  ;;  %v1755_v7 = vld [vmem:[%s2329_s1 + $0x110] ss:$8 sps:$4 sm:$0xff]   ;;  %v1764_v9 = vld [vmem:[%s2329_s1 + $0x124] ss:$8 sps:$4 sm:$0xff]   ;;  %v1772_v11 = vld [vmem:[%s2329_s1 + $0x120] ss:$8 sps:$4 sm:$0xff]  }
   0x5   :  { %840 = vmatprep.subr.bf16.mxu0 %v1747_v5  ;;  %v1546_v12 = vld [vmem:[%s2329_s1 + $0x34] ss:$8 sps:$4 sm:$0xff]   ;;  %v1550_v14 = vld [vmem:[%s2329_s1 + $0x30] ss:$8 sps:$4 sm:$0xff]   ;;  %v1552_v16 = vld [vmem:[%s2329_s1 + $0x44] ss:$8 sps:$4 sm:$0xff]  }
   0x6   :  { %v1782_v13 = vld [vmem:[%s2329_s1 + $0x134] ss:$8 sps:$4 sm:$0xff]   ;;  %v1791_v15 = vld [vmem:[%s2329_s1 + $0x130] ss:$8 sps:$4 sm:$0xff]   ;;  %v1800_v17 = vld [vmem:[%s2329_s1 + $0x144] ss:$8 sps:$4 sm:$0xff]  }
   0x7   :  { %728 = vmatpush1.bf16.msra.mxu1 %v1538_v6  ;;  %v1556_v18 = vld [vmem:[%s2329_s1 + $0x40] ss:$8 sps:$4 sm:$0xff]   ;;  %v1558_v20 = vld [vmem:[%s2329_s1 + $0x54] ss:$8 sps:$4 sm:$0xff]   ;;  %v1562_v22 = vld [vmem:[%s2329_s1 + $0x50] ss:$8 sps:$4 sm:$0xff]  }
   0x8   :  { %841 = vmatpush1.bf16.msra.mxu0 %v1755_v7  ;;  %729 = vmatprep.subr.bf16.mxu1 %v1540_v8  ;;  %v1808_v19 = vld [vmem:[%s2329_s1 + $0x140] ss:$8 sps:$4 sm:$0xff]   ;;  %v1818_v21 = vld [vmem:[%s2329_s1 + $0x154] ss:$8 sps:$4 sm:$0xff]   ;;  %v1827_v23 = vld [vmem:[%s2329_s1 + $0x150] ss:$8 sps:$4 sm:$0xff]  }
   0x9   :  { %842 = vmatprep.subr.bf16.mxu0 %v1764_v9  ;;  %v1564_v24 = vld [vmem:[%s2329_s1 + $0x64] ss:$8 sps:$4 sm:$0xff]   ;;  %v1568_v26 = vld [vmem:[%s2329_s1 + $0x60] ss:$8 sps:$4 sm:$0xff]   ;;  %v1570_v28 = vld [vmem:[%s2329_s1 + $0x74] ss:$8 sps:$4 sm:$0xff]  }
   0xa   :  { %v1836_v25 = vld [vmem:[%s2329_s1 + $0x164] ss:$8 sps:$4 sm:$0xff]   ;;  %v1844_v27 = vld [vmem:[%s2329_s1 + $0x160] ss:$8 sps:$4 sm:$0xff]   ;;  %v1854_v29 = vld [vmem:[%s2329_s1 + $0x174] ss:$8 sps:$4 sm:$0xff]  }
   0xb   :  { %730 = vmatpush1.bf16.msra.mxu1 %v1544_v10  ;;  %v1574_v30 = vld [vmem:[%s2329_s1 + $0x70] ss:$8 sps:$4 sm:$0xff]   ;;  %v1576_v32 = vld [vmem:[%s2329_s1 + $0x84] ss:$8 sps:$4 sm:$0xff]   ;;  %v1580_v34 = vld [vmem:[%s2329_s1 + $0x80] ss:$8 sps:$4 sm:$0xff]  }
   0xc   :  { %843 = vmatpush1.bf16.msra.mxu0 %v1772_v11  ;;  %731 = vmatprep.subr.bf16.mxu1 %v1546_v12  ;;  %v1863_v31 = vld [vmem:[%s2329_s1 + $0x170] ss:$8 sps:$4 sm:$0xff]   ;;  %v1872_v33 = vld [vmem:[%s2329_s1 + $0x184] ss:$8 sps:$4 sm:$0xff]   ;;  %v1880_v35 = vld [vmem:[%s2329_s1 + $0x180] ss:$8 sps:$4 sm:$0xff]  }
   0xd   :  { %844 = vmatprep.subr.bf16.mxu0 %v1782_v13  ;;  %v1582_v36 = vld [vmem:[%s2329_s1 + $0x94] ss:$8 sps:$4 sm:$0xff]   ;;  %v1586_v38 = vld [vmem:[%s2329_s1 + $0x90] ss:$8 sps:$4 sm:$0xff]   ;;  %v1588_v40 = vld [vmem:[%s2329_s1 + $0xa4] ss:$8 sps:$4 sm:$0xff]  }
   0xe   :  { %v1890_v37 = vld [vmem:[%s2329_s1 + $0x194] ss:$8 sps:$4 sm:$0xff]   ;;  %v1899_v39 = vld [vmem:[%s2329_s1 + $0x190] ss:$8 sps:$4 sm:$0xff]   ;;  %v1908_v41 = vld [vmem:[%s2329_s1 + $0x1a4] ss:$8 sps:$4 sm:$0xff]  }
   0xf   :  { %732 = vmatpush1.bf16.msra.mxu1 %v1550_v14  ;;  %v1592_v42 = vld [vmem:[%s2329_s1 + $0xa0] ss:$8 sps:$4 sm:$0xff]   ;;  %v1594_v44 = vld [vmem:[%s2329_s1 + $0xb4] ss:$8 sps:$4 sm:$0xff]   ;;  %v1598_v46 = vld [vmem:[%s2329_s1 + $0xb0] ss:$8 sps:$4 sm:$0xff]  }
  0x10   :  { %845 = vmatpush1.bf16.msra.mxu0 %v1791_v15  ;;  %733 = vmatprep.subr.bf16.mxu1 %v1552_v16  ;;  %v1916_v43 = vld [vmem:[%s2329_s1 + $0x1a0] ss:$8 sps:$4 sm:$0xff]   ;;  %v1926_v45 = vld [vmem:[%s2329_s1 + $0x1b4] ss:$8 sps:$4 sm:$0xff]   ;;  %v1934_v47 = vld [vmem:[%s2329_s1 + $0x1b0] ss:$8 sps:$4 sm:$0xff]  }
  0x11   :  { %846 = vmatprep.subr.bf16.mxu0 %v1800_v17  ;;  %v1600_v48 = vld [vmem:[%s2329_s1 + $0xc4] ss:$8 sps:$4 sm:$0xff]   ;;  %v1604_v52 = vld [vmem:[%s2329_s1 + $0xc0] ss:$8 sps:$4 sm:$0xff]   ;;  %v1606_v54 = vld [vmem:[%s2329_s1 + $0xd4] ss:$8 sps:$4 sm:$0xff]  }
  0x12   :  { %v1626_v49 = vld [vmem:[%s2330_s0 + $0x4] ss:$20 sps:$4 sm:$0xff]   ;;  %v1629_v51 = vld [vmem:[%s2330_s0 + $0xc] ss:$20 sps:$4 sm:$0xff]   ;;  %v1968_v55 = vld [vmem:[%s2329_s1 + $0x1d4] ss:$8 sps:$4 sm:$0xff]  }
  0x13   :  { %734 = vmatpush1.bf16.msra.mxu1 %v1556_v18  ;;  %v1946_v50 = vld [vmem:[%s2329_s1 + $0x1c4] ss:$8 sps:$4 sm:$0xff]   ;;  %757 = vmatprep.mubr.bf16.mxu1 %v1626_v49  ;;  %v1959_v53 = vld [vmem:[%s2329_s1 + $0x1c0] ss:$8 sps:$4 sm:$0xff]   ;;  %v1610_v56 = vld [vmem:[%s2329_s1 + $0xd0] ss:$8 sps:$4 sm:$0xff]  }
  0x14   :  { %847 = vmatpush1.bf16.msra.mxu0 %v1808_v19  ;;  %735 = vmatprep.subr.bf16.mxu1 %v1558_v20  ;;  %v1977_v57 = vld [vmem:[%s2329_s1 + $0x1d0] ss:$8 sps:$4 sm:$0xff]   ;;  %v1612_v58 = vld [vmem:[%s2329_s1 + $0xe4] ss:$8 sps:$4 sm:$0xff]   ;;  %v1616_v60 = vld [vmem:[%s2329_s1 + $0xe0] ss:$8 sps:$4 sm:$0xff]  }
  0x15   :  { %848 = vmatprep.subr.bf16.mxu0 %v1818_v21  ;;  %870 = vmatprep.mubr.bf16.mxu0 %v1629_v51  ;;  %v1986_v59 = vld [vmem:[%s2329_s1 + $0x1e4] ss:$8 sps:$4 sm:$0xff]   ;;  %v1995_v61 = vld [vmem:[%s2329_s1 + $0x1e0] ss:$8 sps:$4 sm:$0xff]   ;;  %v1618_v62 = vld [vmem:[%s2329_s1 + $0xf4] ss:$8 sps:$4 sm:$0xff]  }
  0x16   :  { %v2004_v63 = vld [vmem:[%s2329_s1 + $0x1f4] ss:$8 sps:$4 sm:$0xff]   ;;  %v1622_v0 = vld [vmem:[%s2329_s1 + $0xf0] ss:$8 sps:$4 sm:$0xff]   ;;  %v1632_v4 = vld [vmem:[%s2329_s1 + $0x204] ss:$8 sps:$4 sm:$0xff]  }
  0x17   :  { %736 = vmatpush1.bf16.msra.mxu1 %v1562_v22  ;;  %v2013_v2 = vld [vmem:[%s2329_s1 + $0x1f0] ss:$8 sps:$4 sm:$0xff]   ;;  %v1624_v6 = vld [vmem:[%s2330_s0] ss:$20 sps:$4 sm:$0xff]   ;;  %v1627_v8 = vld [vmem:[%s2330_s0 + $0x8] ss:$20 sps:$4 sm:$0xff]  }
  0x18   :  { %849 = vmatpush1.bf16.msra.mxu0 %v1827_v23  ;;  %737 = vmatprep.subr.bf16.mxu1 %v1564_v24  ;;  %v1630_v10 = vld [vmem:[%s2329_s1 + $0x200] ss:$8 sps:$4 sm:$0xff]   ;;  %v1641_v16 = vld [vmem:[%s2329_s1 + $0x214] ss:$8 sps:$4 sm:$0xff]   ;;  %v1650_v18 = vld [vmem:[%s2329_s1 + $0x224] ss:$8 sps:$4 sm:$0xff]  }
  0x19   :  { %850 = vmatprep.subr.bf16.mxu0 %v1836_v25  ;;  %v1633_v12 = vld [vmem:[%s2330_s0 + $0x2c] ss:$20 sps:$4 sm:$0xff]   ;;  %v1635_v14 = vld [vmem:[%s2330_s0 + $0x34] ss:$20 sps:$4 sm:$0xff]   ;;  %v1644_v22 = vld [vmem:[%s2330_s0 + $0x5c] ss:$20 sps:$4 sm:$0xff]  }
  0x1a   :  { %v1637_v20 = vld [vmem:[%s2330_s0 + $0x28] ss:$20 sps:$4 sm:$0xff]  }
  0x1b   :  { %738 = vmatpush1.bf16.msra.mxu1 %v1568_v26  ;;  %v1648_v24 = vld [vmem:[%s2329_s1 + $0x220] ss:$8 sps:$4 sm:$0xff]   ;;  %v1646_v26 = vld [vmem:[%s2330_s0 + $0x50] ss:$20 sps:$4 sm:$0xff]  }
  0x1c   :  { %851 = vmatpush1.bf16.msra.mxu0 %v1844_v27  ;;  %739 = vmatprep.subr.bf16.mxu1 %v1570_v28  ;;  %v1647_v28 = vld [vmem:[%s2330_s0 + $0x58] ss:$20 sps:$4 sm:$0xff]  }
  0x1d   :  { %852 = vmatprep.subr.bf16.mxu0 %v1854_v29 }
  0x1f   :  { %740 = vmatpush1.bf16.msra.mxu1 %v1574_v30  ;;  %v1660_v30 = vld [vmem:[%s2330_s0 + $0xa4] ss:$20 sps:$4 sm:$0xff]  }
  0x20   :  { %853 = vmatpush1.bf16.msra.mxu0 %v1863_v31  ;;  %741 = vmatprep.subr.bf16.mxu1 %v1576_v32  ;;  %v1670_v32 = vld [vmem:[%s2330_s0 + $0xf0] ss:$20 sps:$4 sm:$0xff]  }
  0x21   :  { %854 = vmatprep.subr.bf16.mxu0 %v1872_v33 }
  0x23   :  { %742 = vmatpush1.bf16.msra.mxu1 %v1580_v34  ;;  %v1672_v34 = vld [vmem:[%s2330_s0 + $0x11c] ss:$20 sps:$4 sm:$0xff]  }
  0x24   :  { %855 = vmatpush1.bf16.msra.mxu0 %v1880_v35  ;;  %743 = vmatprep.subr.bf16.mxu1 %v1582_v36  ;;  %v1675_v36 = vld [vmem:[%s2330_s0 + $0x88] ss:$20 sps:$4 sm:$0xff]  }
  0x25   :  { %856 = vmatprep.subr.bf16.mxu0 %v1890_v37 }
  0x27   :  { %744 = vmatpush1.bf16.msra.mxu1 %v1586_v38  ;;  %v1676_v38 = vld [vmem:[%s2330_s0 + $0xa8] ss:$20 sps:$4 sm:$0xff]  }
  0x28   :  { %857 = vmatpush1.bf16.msra.mxu0 %v1899_v39  ;;  %745 = vmatprep.subr.bf16.mxu1 %v1588_v40  ;;  %v1680_v40 = vld [vmem:[%s2330_s0 + $0xd4] ss:$20 sps:$4 sm:$0xff]  }
  0x29   :  { %858 = vmatprep.subr.bf16.mxu0 %v1908_v41 }
  0x2b   :  { %746 = vmatpush1.bf16.msra.mxu1 %v1592_v42  ;;  %v1683_v42 = vld [vmem:[%s2330_s0 + $0xd8] ss:$20 sps:$4 sm:$0xff]  }
  0x2c   :  { %859 = vmatpush1.bf16.msra.mxu0 %v1916_v43  ;;  %747 = vmatprep.subr.bf16.mxu1 %v1594_v44  ;;  %v1686_v44 = vld [vmem:[%s2330_s0 + $0xf8] ss:$20 sps:$4 sm:$0xff]  }
  0x2d   :  { %860 = vmatprep.subr.bf16.mxu0 %v1926_v45 }
  0x2f   :  { %748 = vmatpush1.bf16.msra.mxu1 %v1598_v46  ;;  %v1688_v46 = vld [vmem:[%s2330_s0 + $0x124] ss:$20 sps:$4 sm:$0xff]  }
  0x30   :  { %861 = vmatpush1.bf16.msra.mxu0 %v1934_v47  ;;  %749 = vmatprep.subr.bf16.mxu1 %v1600_v48  ;;  %v1691_v48 = vld [vmem:[%s2330_s0 + $0x128] ss:$20 sps:$4 sm:$0xff]  }
  0x31   :  { %862 = vmatprep.subr.bf16.mxu0 %v1946_v50 }
  0x33   :  { %750 = vmatpush1.bf16.msra.mxu1 %v1604_v52 }
  0x34   :  { %863 = vmatpush1.bf16.msra.mxu0 %v1959_v53  ;;  %751 = vmatprep.subr.bf16.mxu1 %v1606_v54 }
  0x35   :  { %864 = vmatprep.subr.bf16.mxu0 %v1968_v55 }
  0x37   :  { %752 = vmatpush1.bf16.msra.mxu1 %v1610_v56 }
  0x38   :  { %865 = vmatpush1.bf16.msra.mxu0 %v1977_v57  ;;  %753 = vmatprep.subr.bf16.mxu1 %v1612_v58 }
  0x39   :  { %866 = vmatprep.subr.bf16.mxu0 %v1986_v59 }
  0x3b   :  { %754 = vmatpush1.bf16.msra.mxu1 %v1616_v60 }
  0x3c   :  { %867 = vmatpush1.bf16.msra.mxu0 %v1995_v61  ;;  %755 = vmatprep.subr.bf16.mxu1 %v1618_v62 }
  0x3d   :  { %868 = vmatprep.subr.bf16.mxu0 %v2004_v63 }
  0x3f   :  { %756 = vmatpush1.bf16.msra.mxu1 %v1622_v0 }
  0x40   :  { %869 = vmatpush1.bf16.msra.mxu0 %v2013_v2  ;;  %1431 = vmatprep.subr.bf16.mxu1 %v1729_v1  ;;  %v1639_v1 = vld [vmem:[%s2329_s1 + $0x210] ss:$8 sps:$4 sm:$0xff]  }
  0x41   :  { %951 = vmatprep.subr.bf16.mxu0 %v1632_v4  ;;  %v2214_v4 = vld [vmem:[%s2331_s2] ss:$0 sm:$0xff] }
  0x42   :  { %758 = vmatmul.mubr.bf16.vlgmr.msra.gmra.mrb[0].mxu1 %v1624_v6 }
  0x43   :  { %871 = vmatmul.mubr.bf16.vlgmr.msra.gmra.mrb[0].mxu0 %v1627_v8  ;;  %1447 = vmatpush1.bf16.msra.mxu1 %v1737_v3  ;;  %v1638_v3 = vld [vmem:[%s2330_s0 + $0x30] ss:$20 sps:$4 sm:$0xff]  }
  0x44   :  { %952 = vmatpush1.bf16.msra.mxu0 %v1630_v10  ;;  %1432 = vmatprep.subr.bf16.mxu1 %v1747_v5  ;;  %v1642_v5 = vld [vmem:[%s2330_s0 + $0x54] ss:$20 sps:$4 sm:$0xff]   ;;  %v2219_v10 = vld [vmem:[%s2332_s3] ss:$0 sm:$0xff] }
  0x45   :  { %767 = vmatprep.mubr.bf16.mxu1 %v1633_v12  ;;  %880 = vmatprep.mubr.bf16.mxu0 %v1635_v14 }
  0x46   :  { %953 = vmatprep.subr.bf16.mxu0 %v1641_v16 }
  0x47   :  { %1448 = vmatpush1.bf16.msra.mxu1 %v1755_v7  ;;  %v1659_v7 = vld [vmem:[%s2329_s1 + $0x234] ss:$8 sps:$4 sm:$0xff]  }
  0x48   :  { %954 = vmatpush1.bf16.msra.mxu0 %v1639_v1  ;;  %1433 = vmatprep.subr.bf16.mxu1 %v1764_v9  ;;  %v1657_v9 = vld [vmem:[%s2329_s1 + $0x230] ss:$8 sps:$4 sm:$0xff]  }
  0x49   :  { %955 = vmatprep.subr.bf16.mxu0 %v1650_v18 }
  0x4a   :  { %768 = vmatmul.mubr.bf16.gmra.mrb[4].mxu1 %v1637_v20 }
  0x4b   :  { %881 = vmatmul.mubr.bf16.gmra.mrb[4].mxu0 %v1638_v3  ;;  %1449 = vmatpush1.bf16.msra.mxu1 %v1772_v11  ;;  %v1651_v11 = vld [vmem:[%s2330_s0 + $0x7c] ss:$20 sps:$4 sm:$0xff]  }
  0x4c   :  { %777 = vmatprep.mubr.bf16.mxu1 %v1642_v5  ;;  %1434 = vmatprep.subr.bf16.mxu1 %v1782_v13  ;;  %v1653_v13 = vld [vmem:[%s2330_s0 + $0x84] ss:$20 sps:$4 sm:$0xff]  }
  0x4d   :  { %890 = vmatprep.mubr.bf16.mxu0 %v1644_v22  ;;  %956 = vmatpush1.bf16.msra.mxu0 %v1648_v24 }
  0x4e   :  { %957 = vmatprep.subr.bf16.mxu0 %v1659_v7 }
  0x4f   :  { %1450 = vmatpush1.bf16.msra.mxu1 %v1791_v15  ;;  %v1655_v15 = vld [vmem:[%s2330_s0 + $0x78] ss:$20 sps:$4 sm:$0xff]  }
  0x50   :  { %1435 = vmatprep.subr.bf16.mxu1 %v1800_v17  ;;  %v1656_v17 = vld [vmem:[%s2330_s0 + $0x80] ss:$20 sps:$4 sm:$0xff]  }
  0x51   :  { %958 = vmatpush1.bf16.msra.mxu0 %v1657_v9 }
  0x52   :  { %778 = vmatmul.mubr.bf16.gmra.mrb[8].mxu1 %v1646_v26 }
  0x53   :  { %891 = vmatmul.mubr.bf16.gmra.mrb[8].mxu0 %v1647_v28  ;;  %1451 = vmatpush1.bf16.msra.mxu1 %v1808_v19  ;;  %v1692_v19 = vmov 0  }
  0x54   :  { %787 = vmatprep.mubr.bf16.mxu1 %v1651_v11  ;;  %1436 = vmatprep.subr.bf16.mxu1 %v1818_v21  ;;  %v1662_v21 = vld [vmem:[%s2330_s0 + $0xa0] ss:$20 sps:$4 sm:$0xff]  }
  0x55   :  { %900 = vmatprep.mubr.bf16.mxu0 %v1653_v13 }
  0x57   :  { %1452 = vmatpush1.bf16.msra.mxu1 %v1827_v23  ;;  %v1663_v23 = vld [vmem:[%s2330_s0 + $0x10] ss:$20 sps:$4 sm:$0xff]  }
  0x58   :  { %1437 = vmatprep.subr.bf16.mxu1 %v1836_v25  ;;  %v1664_v25 = vld [vmem:[%s2330_s0 + $0xcc] ss:$20 sps:$4 sm:$0xff]  }
  0x5a   :  { %788 = vmatmul.mubr.bf16.gmra.mrb[12].mxu1 %v1655_v15 }
  0x5b   :  { %901 = vmatmul.mubr.bf16.gmra.mrb[12].mxu0 %v1656_v17  ;;  %1453 = vmatpush1.bf16.msra.mxu1 %v1844_v27  ;;  %v1666_v27 = vld [vmem:[%s2330_s0 + $0xc8] ss:$20 sps:$4 sm:$0xff]  }
  0x5c   :  { %797 = vmatprep.mubr.bf16.mxu1 %v1660_v30  ;;  %1438 = vmatprep.subr.bf16.mxu1 %v1854_v29  ;;  %v1667_v29 = vld [vmem:[%s2330_s0 + $0x38] ss:$20 sps:$4 sm:$0xff]  }
  0x5d   :  { %983 = vmatprep.mubr.bf16.mxu0 %v1692_v19 }
  0x5f   :  { %1454 = vmatpush1.bf16.msra.mxu1 %v1863_v31  ;;  %v1668_v31 = vld [vmem:[%s2330_s0 + $0xf4] ss:$20 sps:$4 sm:$0xff]  }
  0x60   :  { %1439 = vmatprep.subr.bf16.mxu1 %v1872_v33  ;;  %v1671_v33 = vld [vmem:[%s2330_s0 + $0x60] ss:$20 sps:$4 sm:$0xff]  }
  0x62   :  { %798 = vmatmul.mubr.bf16.gmra.mrb[16].mxu1 %v1662_v21 }
  0x63   :  { %1342 = vmatmul.mubr.msk.bf16.vlgmr.msra.gmra.mrb[0].mxu0 %vm700_vm0, %v1663_v23  ;;  %1455 = vmatpush1.bf16.msra.mxu1 %v1880_v35  ;;  %v1674_v35 = vld [vmem:[%s2330_s0 + $0x118] ss:$20 sps:$4 sm:$0xff]  }
  0x64   :  { %807 = vmatprep.mubr.bf16.mxu1 %v1664_v25  ;;  %1440 = vmatprep.subr.bf16.mxu1 %v1890_v37  ;;  %v1678_v37 = vld [vmem:[%s2330_s0 + $0xac] ss:$20 sps:$4 sm:$0xff]  }
  0x65   :  { %993 = vmatprep.mubr.bf16.mxu0 %v1692_v19 }
  0x67   :  { %1456 = vmatpush1.bf16.msra.mxu1 %v1899_v39  ;;  %v1679_v39 = vld [vmem:[%s2330_s0 + $0xb0] ss:$20 sps:$4 sm:$0xff]  }
  0x68   :  { %1441 = vmatprep.subr.bf16.mxu1 %v1908_v41  ;;  %v1682_v41 = vld [vmem:[%s2330_s0 + $0xd0] ss:$20 sps:$4 sm:$0xff]  }
  0x6a   :  { %808 = vmatmul.mubr.bf16.gmra.mrb[20].mxu1 %v1666_v27 }
  0x6b   :  { %1343 = vmatmul.mubr.msk.bf16.gmra.mrb[4].mxu0 %vm700_vm0, %v1667_v29  ;;  %1457 = vmatpush1.bf16.msra.mxu1 %v1916_v43  ;;  %v1684_v43 = vld [vmem:[%s2330_s0 + $0xfc] ss:$20 sps:$4 sm:$0xff]  }
  0x6c   :  { %817 = vmatprep.mubr.bf16.mxu1 %v1668_v31  ;;  %1442 = vmatprep.subr.bf16.mxu1 %v1926_v45  ;;  %v1687_v45 = vld [vmem:[%s2330_s0 + $0x100] ss:$20 sps:$4 sm:$0xff]  }
  0x6d   :  { %1003 = vmatprep.mubr.bf16.mxu0 %v1692_v19 }
  0x6f   :  { %1458 = vmatpush1.bf16.msra.mxu1 %v1934_v47  ;;  %v1690_v47 = vld [vmem:[%s2330_s0 + $0x120] ss:$20 sps:$4 sm:$0xff]  }
  0x70   :  { %1443 = vmatprep.subr.bf16.mxu1 %v1946_v50 }
  0x72   :  { %818 = vmatmul.mubr.bf16.gmra.mrb[24].mxu1 %v1670_v32 }
  0x73   :  { %1344 = vmatmul.mubr.msk.bf16.gmra.mrb[8].mxu0 %vm700_vm0, %v1671_v33  ;;  %1459 = vmatpush1.bf16.msra.mxu1 %v1959_v53 }
  0x74   :  { %827 = vmatprep.mubr.bf16.mxu1 %v1672_v34  ;;  %1444 = vmatprep.subr.bf16.mxu1 %v1968_v55 }
  0x75   :  { %1013 = vmatprep.mubr.bf16.mxu0 %v1692_v19 }
  0x77   :  { %1460 = vmatpush1.bf16.msra.mxu1 %v1977_v57 }
  0x78   :  { %1445 = vmatprep.subr.bf16.mxu1 %v1986_v59 }
  0x7a   :  { %828 = vmatmul.mubr.bf16.gmra.mrb[28].mxu1 %v1674_v35 }
  0x7b   :  { %1345 = vmatmul.mubr.msk.bf16.gmra.mrb[12].mxu0 %vm700_vm0, %v1675_v36  ;;  %1461 = vmatpush1.bf16.msra.mxu1 %v1995_v61 }
  0x7c   :  { %910 = vmatprep.mubr.bf16.mxu1 %v1678_v37  ;;  %1446 = vmatprep.subr.bf16.mxu1 %v2004_v63 }
  0x7d   :  { %1023 = vmatprep.mubr.bf16.mxu0 %v1692_v19 }
  0x7f   :  { %1462 = vmatpush1.bf16.msra.mxu1 %v2013_v2 }
  0x82   :  { %911 = vmatmul.mubr.bf16.vlgmr.msra.gmra.mrb[16].mxu1 %v1676_v38 }
  0x83   :  { %1346 = vmatmul.mubr.msk.bf16.gmra.mrb[16].mxu0 %vm700_vm0, %v1679_v39  ;;  %920 = vmatprep.mubr.bf16.mxu1 %v1680_v40 }
  0x84   :  { %1033 = vmatprep.mubr.bf16.mxu0 %v1692_v19 }
  0x8a   :  { %921 = vmatmul.mubr.bf16.gmra.mrb[20].mxu1 %v1682_v41 }
  0x8b   :  { %1347 = vmatmul.mubr.msk.bf16.gmra.mrb[20].mxu0 %vm700_vm0, %v1683_v42  ;;  %930 = vmatprep.mubr.bf16.mxu1 %v1684_v43 }
  0x8c   :  { %1043 = vmatprep.mubr.bf16.mxu0 %v1692_v19 }
  0x92   :  { %931 = vmatmul.mubr.bf16.gmra.mrb[24].mxu1 %v1686_v44 }
  0x93   :  { %1348 = vmatmul.mubr.msk.bf16.gmra.mrb[24].mxu0 %vm700_vm0, %v1687_v45  ;;  %940 = vmatprep.mubr.bf16.mxu1 %v1688_v46 }
  0x94   :  { %1053 = vmatprep.mubr.bf16.mxu0 %v1692_v19 }
  0x9a   :  { %941 = vmatmul.mubr.bf16.gmra.mrb[28].mxu1 %v1690_v47 }
  0x9b   :  { %1349 = vmatmul.mubr.msk.bf16.gmra.mrb[28].mxu0 %vm700_vm0, %v1691_v48 }
 0x115   :  { %v759_v49 = vpop.f32.mrb[0].mxu1 }
 0x116   :  { %v761_v50 = vpop.f32.mrb[1].mxu1 }
 0x117   :  { %v763_v51 = vpop.f32.mrb[2].mxu1 }
 0x118   :  { %v765_v52 = vpop.f32.mrb[3].mxu1 }
 0x11d   :  { %v769_v53 = vpop.f32.mrb[4].mxu1 }
 0x11e   :  { %v771_v54 = vpop.f32.mrb[5].mxu1 }
 0x11f   :  { %v773_v55 = vpop.f32.mrb[6].mxu1 }
 0x120   :  { %v775_v56 = vpop.f32.mrb[7].mxu1 }
 0x125   :  { %v779_v57 = vpop.f32.mrb[8].mxu1 }
 0x126   :  { %v781_v58 = vpop.f32.mrb[9].mxu1 }
 0x127   :  { %v783_v59 = vpop.f32.mrb[10].mxu1 }
 0x128   :  { %v785_v60 = vpop.f32.mrb[11].mxu1 }
 0x12d   :  { %v2203_v61 = vpop.f32.mrb[12].mxu1 }
 0x12e   :  { %v2205_v62 = vpop.f32.mrb[13].mxu1 }
 0x12f   :  { %v2207_v63 = vpop.f32.mrb[14].mxu1 }
 0x130   :  { %v2209_v0 = vpop.f32.mrb[15].mxu1 }
 0x136   :  { %v985_v2 = vpop.f32.mrb[0].mxu0 }
 0x137   :  { %v1463_v6 = vadd.f32 %v985_v2, %v759_v49  ;;  %v987_v8 = vpop.f32.mrb[1].mxu0 }
 0x138   :  { %v1464_v12 = vadd.f32 %v987_v8, %v761_v50  ;;  %v989_v14 = vpop.f32.mrb[2].mxu0 }
 0x139   :  { %v1071_v16 = vmul.f32 %v1463_v6, %v2214_v4  ;;  %v1465_v1 = vadd.f32 %v989_v14, %v763_v51  ;;  %v991_v18 = vpop.f32.mrb[3].mxu0 }
 0x13a   :  { %1206 = vst [vmem:[%s2333_s5] sm:$0xff] %v1464_v12  ;;  %v1466_v20 = vadd.f32 %v991_v18, %v765_v52 }
 0x13b   :  { %v1094_v3 = vadd.f32 %v2219_v10, %v1071_v16  ;;  %v1072_v5 = vmul.f32 %v1465_v1, %v2214_v4 }
 0x13c   :  { %1207 = vst [vmem:[%s2333_s5 + $0x8] sm:$0xff] %v1466_v20 }
 0x13d   :  { %v1095_v22 = vadd.f32 %v2219_v10, %v1072_v5  ;;  %v1110_v7 = vmax.f32 %v1094_v3, 0.0 }
 0x13e   :  { %v995_v24 = vpop.f32.mrb[4].mxu0 }
 0x13f   :  { %v1111_v9 = vmax.f32 %v1095_v22, 0.0  ;;  %v1467_v26 = vadd.f32 %v995_v24, %v769_v53  ;;  %v997_v28 = vpop.f32.mrb[5].mxu0 }
 0x140   :  { %v1468_v11 = vadd.f32 %v997_v28, %v771_v54  ;;  %v999_v13 = vpop.f32.mrb[6].mxu0 }
 0x141   :  { %v1387_v15 = vpack.c.bf16 %v1111_v9, %v1110_v7  ;;  %v1073_v17 = vmul.f32 %v1467_v26, %v2214_v4  ;;  %v1469_v30 = vadd.f32 %v999_v13, %v773_v55  ;;  %v1001_v19 = vpop.f32.mrb[7].mxu0 }
 0x142   :  { %1208 = vst [vmem:[%s2333_s5 + $0x10] sm:$0xff] %v1468_v11  ;;  %v1470_v21 = vadd.f32 %v1001_v19, %v775_v56 }
 0x143   :  { %1388 = vst [vmem:[%s2334_s4] sm:$0xff] %v1387_v15   ;;  %v1096_v23 = vadd.f32 %v2219_v10, %v1073_v17  ;;  %v1074_v25 = vmul.f32 %v1469_v30, %v2214_v4 }
 0x144   :  { %1209 = vst [vmem:[%s2333_s5 + $0x18] sm:$0xff] %v1470_v21 }
 0x145   :  { %v1097_v27 = vadd.f32 %v2219_v10, %v1074_v25  ;;  %v1112_v31 = vmax.f32 %v1096_v23, 0.0 }
 0x146   :  { %v1005_v29 = vpop.f32.mrb[8].mxu0 }
 0x147   :  { %v1113_v32 = vmax.f32 %v1097_v27, 0.0  ;;  %v1471_v33 = vadd.f32 %v1005_v29, %v779_v57  ;;  %v1007_v34 = vpop.f32.mrb[9].mxu0 }
 0x148   :  { %v1472_v35 = vadd.f32 %v1007_v34, %v781_v58  ;;  %v1009_v36 = vpop.f32.mrb[10].mxu0 }
 0x149   :  { %v1392_v37 = vpack.c.bf16 %v1113_v32, %v1112_v31  ;;  %v1075_v38 = vmul.f32 %v1471_v33, %v2214_v4  ;;  %v1473_v39 = vadd.f32 %v1009_v36, %v783_v59  ;;  %v1011_v40 = vpop.f32.mrb[11].mxu0 }
 0x14a   :  { %1210 = vst [vmem:[%s2333_s5 + $0x20] sm:$0xff] %v1472_v35  ;;  %v1474_v41 = vadd.f32 %v1011_v40, %v785_v60 }
 0x14b   :  { %1424 = vst [vmem:[%s2334_s4 + $0x8] sm:$0xff] %v1392_v37   ;;  %v1098_v42 = vadd.f32 %v2219_v10, %v1075_v38  ;;  %v1076_v43 = vmul.f32 %v1473_v39, %v2214_v4 }
 0x14c   :  { %1211 = vst [vmem:[%s2333_s5 + $0x28] sm:$0xff] %v1474_v41 }
 0x14d   :  { %v1099_v44 = vadd.f32 %v2219_v10, %v1076_v43  ;;  %v1114_v46 = vmax.f32 %v1098_v42, 0.0 }
 0x14e   :  { %v1015_v45 = vpop.f32.mrb[12].mxu0 }
 0x14f   :  { %v1115_v47 = vmax.f32 %v1099_v44, 0.0  ;;  %v1475_v48 = vadd.f32 %v1015_v45, %v2203_v61  ;;  %v1017_v49 = vpop.f32.mrb[13].mxu0 }
 0x150   :  { %v1476_v50 = vadd.f32 %v1017_v49, %v2205_v62  ;;  %v1019_v51 = vpop.f32.mrb[14].mxu0 }
 0x151   :  { %v1397_v52 = vpack.c.bf16 %v1115_v47, %v1114_v46  ;;  %v1077_v53 = vmul.f32 %v1475_v48, %v2214_v4  ;;  %v1477_v54 = vadd.f32 %v1019_v51, %v2207_v63  ;;  %v1021_v55 = vpop.f32.mrb[15].mxu0 }
 0x152   :  { %1212 = vst [vmem:[%s2333_s5 + $0x30] sm:$0xff] %v1476_v50  ;;  %v1478_v56 = vadd.f32 %v1021_v55, %v2209_v0 }
 0x153   :  { %1425 = vst [vmem:[%s2334_s4 + $0x10] sm:$0xff] %v1397_v52   ;;  %v1100_v57 = vadd.f32 %v2219_v10, %v1077_v53  ;;  %v1078_v58 = vmul.f32 %v1477_v54, %v2214_v4 }
 0x154   :  { %1213 = vst [vmem:[%s2333_s5 + $0x38] sm:$0xff] %v1478_v56 }
 0x155   :  { %v1101_v59 = vadd.f32 %v2219_v10, %v1078_v58  ;;  %v912_v60 = vpop.f32.mrb[16].mxu1  ;;  %v1116_v62 = vmax.f32 %v1100_v57, 0.0 }
 0x156   :  { %v1025_v61 = vpop.f32.mrb[16].mxu0  ;;  %v914_v0 = vpop.f32.mrb[17].mxu1 }
 0x157   :  { %v1117_v63 = vmax.f32 %v1101_v59, 0.0  ;;  %v1479_v2 = vadd.f32 %v1025_v61, %v912_v60  ;;  %v1027_v6 = vpop.f32.mrb[17].mxu0  ;;  %v916_v12 = vpop.f32.mrb[18].mxu1 }
 0x158   :  { %v1480_v8 = vadd.f32 %v1027_v6, %v914_v0  ;;  %v1029_v14 = vpop.f32.mrb[18].mxu0  ;;  %v918_v20 = vpop.f32.mrb[19].mxu1 }
 0x159   :  { %v1402_v16 = vpack.c.bf16 %v1117_v63, %v1116_v62  ;;  %v1079_v1 = vmul.f32 %v1479_v2, %v2214_v4  ;;  %v1481_v18 = vadd.f32 %v1029_v14, %v916_v12  ;;  %v1031_v3 = vpop.f32.mrb[19].mxu0 }
 0x15a   :  { %1214 = vst [vmem:[%s2333_s5 + $0x40] sm:$0xff] %v1480_v8  ;;  %v1482_v5 = vadd.f32 %v1031_v3, %v918_v20 }
 0x15b   :  { %1426 = vst [vmem:[%s2334_s4 + $0x18] sm:$0xff] %v1402_v16   ;;  %v1102_v22 = vadd.f32 %v2219_v10, %v1079_v1  ;;  %v1080_v24 = vmul.f32 %v1481_v18, %v2214_v4 }
 0x15c   :  { %1215 = vst [vmem:[%s2333_s5 + $0x48] sm:$0xff] %v1482_v5 }
 0x15d   :  { %v1103_v7 = vadd.f32 %v2219_v10, %v1080_v24  ;;  %v922_v9 = vpop.f32.mrb[20].mxu1  ;;  %v1118_v28 = vmax.f32 %v1102_v22, 0.0 }
 0x15e   :  { %v1035_v26 = vpop.f32.mrb[20].mxu0  ;;  %v924_v15 = vpop.f32.mrb[21].mxu1 }
 0x15f   :  { %v1119_v11 = vmax.f32 %v1103_v7, 0.0  ;;  %v1483_v13 = vadd.f32 %v1035_v26, %v922_v9  ;;  %v1037_v17 = vpop.f32.mrb[21].mxu0  ;;  %v926_v19 = vpop.f32.mrb[22].mxu1 }
 0x160   :  { %v1484_v30 = vadd.f32 %v1037_v17, %v924_v15  ;;  %v1039_v21 = vpop.f32.mrb[22].mxu0  ;;  %v928_v29 = vpop.f32.mrb[23].mxu1 }
 0x161   :  { %v1407_v23 = vpack.c.bf16 %v1119_v11, %v1118_v28  ;;  %v1081_v25 = vmul.f32 %v1483_v13, %v2214_v4  ;;  %v1485_v27 = vadd.f32 %v1039_v21, %v926_v19  ;;  %v1041_v31 = vpop.f32.mrb[23].mxu0 }
 0x162   :  { %1216 = vst [vmem:[%s2333_s5 + $0x50] sm:$0xff] %v1484_v30  ;;  %v1486_v32 = vadd.f32 %v1041_v31, %v928_v29 }
 0x163   :  { %1427 = vst [vmem:[%s2334_s4 + $0x20] sm:$0xff] %v1407_v23   ;;  %v1104_v33 = vadd.f32 %v2219_v10, %v1081_v25  ;;  %v1082_v34 = vmul.f32 %v1485_v27, %v2214_v4 }
 0x164   :  { %1217 = vst [vmem:[%s2333_s5 + $0x58] sm:$0xff] %v1486_v32 }
 0x165   :  { %v1105_v35 = vadd.f32 %v2219_v10, %v1082_v34  ;;  %v932_v36 = vpop.f32.mrb[24].mxu1  ;;  %v1120_v38 = vmax.f32 %v1104_v33, 0.0 }
 0x166   :  { %v1045_v37 = vpop.f32.mrb[24].mxu0  ;;  %v934_v41 = vpop.f32.mrb[25].mxu1 }
 0x167   :  { %v1121_v39 = vmax.f32 %v1105_v35, 0.0  ;;  %v1487_v40 = vadd.f32 %v1045_v37, %v932_v36  ;;  %v1047_v42 = vpop.f32.mrb[25].mxu0  ;;  %v936_v44 = vpop.f32.mrb[26].mxu1 }
 0x168   :  { %v1488_v43 = vadd.f32 %v1047_v42, %v934_v41  ;;  %v1049_v45 = vpop.f32.mrb[26].mxu0  ;;  %v938_v49 = vpop.f32.mrb[27].mxu1 }
 0x169   :  { %v1412_v46 = vpack.c.bf16 %v1121_v39, %v1120_v38  ;;  %v1083_v47 = vmul.f32 %v1487_v40, %v2214_v4  ;;  %v1489_v48 = vadd.f32 %v1049_v45, %v936_v44  ;;  %v1051_v50 = vpop.f32.mrb[27].mxu0 }
 0x16a   :  { %1218 = vst [vmem:[%s2333_s5 + $0x60] sm:$0xff] %v1488_v43  ;;  %v1490_v51 = vadd.f32 %v1051_v50, %v938_v49 }
 0x16b   :  { %1428 = vst [vmem:[%s2334_s4 + $0x28] sm:$0xff] %v1412_v46   ;;  %v1106_v52 = vadd.f32 %v2219_v10, %v1083_v47  ;;  %v1084_v53 = vmul.f32 %v1489_v48, %v2214_v4 }
 0x16c   :  { %1219 = vst [vmem:[%s2333_s5 + $0x68] sm:$0xff] %v1490_v51 }
 0x16d   :  { %v1107_v54 = vadd.f32 %v2219_v10, %v1084_v53  ;;  %v942_v55 = vpop.f32.mrb[28].mxu1  ;;  %v1122_v57 = vmax.f32 %v1106_v52, 0.0 }
 0x16e   :  { %v1055_v56 = vpop.f32.mrb[28].mxu0  ;;  %v944_v60 = vpop.f32.mrb[29].mxu1 }
 0x16f   :  { %v1123_v58 = vmax.f32 %v1107_v54, 0.0  ;;  %v1491_v59 = vadd.f32 %v1055_v56, %v942_v55  ;;  %v1057_v61 = vpop.f32.mrb[29].mxu0  ;;  %v946_v63 = vpop.f32.mrb[30].mxu1 }
 0x170   :  { %v1492_v62 = vadd.f32 %v1057_v61, %v944_v60  ;;  %v1059_v2 = vpop.f32.mrb[30].mxu0  ;;  %v948_v12 = vpop.f32.mrb[31].mxu1 }
 0x171   :  { %v1417_v0 = vpack.c.bf16 %v1123_v58, %v1122_v57  ;;  %v1085_v6 = vmul.f32 %v1491_v59, %v2214_v4  ;;  %v1493_v8 = vadd.f32 %v1059_v2, %v946_v63  ;;  %v1061_v14 = vpop.f32.mrb[31].mxu0 }
 0x172   :  { %1220 = vst [vmem:[%s2333_s5 + $0x70] sm:$0xff] %v1492_v62  ;;  %v1494_v16 = vadd.f32 %v1061_v14, %v948_v12 }
 0x173   :  { %1429 = vst [vmem:[%s2334_s4 + $0x30] sm:$0xff] %v1417_v0   ;;  %v1108_v1 = vadd.f32 %v2219_v10, %v1085_v6  ;;  %v1086_v18 = vmul.f32 %v1493_v8, %v2214_v4 }
 0x174   :  { %1221 = vst [vmem:[%s2333_s5 + $0x78] sm:$0xff] %v1494_v16 }
 0x175   :  { %v1109_v20 = vadd.f32 %v2219_v10, %v1086_v18  ;;  %v1124_v3 = vmax.f32 %v1108_v1, 0.0 }
 0x177   :  { %v1125_v5 = vmax.f32 %v1109_v20, 0.0 }
 0x179   :  { %v1422_v22 = vpack.c.bf16 %v1125_v5, %v1124_v3 }
 0x17b   :  { %1430 = vst [vmem:[%s2334_s4 + $0x38] sm:$0xff] %v1422_v22  }

// kernel: resnet_stem_forward.10
= control target key start
LH: loop header
LB: loop body
LE: loop exit
PB: predicated region body
PF: predicated region fallthrough
CT: control target
= control target key end

     0   :  { %s3076_s1 = inlined_call_operand.vmem [shape: bf16[1152,128], index: 1, kind: input, shape index: {}]   ;;  %s3077_s0 = inlined_call_operand.vmem [shape: bf16[128,1152], index: 0, kind: input, shape index: {}]   ;;  %s3078_s2 = inlined_call_operand.vmem [shape: f32[128,128], index: 2, kind: input, shape index: {}]   ;;  %s3079_s3 = inlined_call_operand.vmem [shape: f32[1,128], index: 3, kind: input, shape index: {}]   ;;  %s3080_s4 = inlined_call_operand.vmem [shape: f32[1,128], index: 4, kind: input, shape index: {}]   ;;  %s3081_s5 = inlined_call_operand.vmem [shape: bf16[128,128], index: 5, kind: output, shape index: {}]  }
   0x1   :  { %v2237_v0 = vld [vmem:[%s3076_s1 + $0x40] sm:$0xff]   ;;  %v2241_v4 = vld [vmem:[%s3076_s1 + $0x48] sm:$0xff]   ;;  %v2245_v8 = vld [vmem:[%s3076_s1 + $0x50] sm:$0xff]  }
   0x2   :  { %v2238_v1 = vld [vmem:[%s3076_s1 + $0xc0] sm:$0xff]   ;;  %1917 = vmatprep.subr.bf16.mxu0 %v2237_v0  ;;  %v2242_v5 = vld [vmem:[%s3076_s1 + $0xc8] sm:$0xff]   ;;  %v2246_v9 = vld [vmem:[%s3076_s1 + $0xd0] sm:$0xff]  }
   0x3   :  { %v2239_v2 = vld [vmem:[%s3076_s1] sm:$0xff]   ;;  %1981 = vmatprep.subr.bf16.mxu1 %v2238_v1  ;;  %v2243_v6 = vld [vmem:[%s3076_s1 + $0x8] sm:$0xff]   ;;  %v2247_v10 = vld [vmem:[%s3076_s1 + $0x10] sm:$0xff]  }
   0x4   :  { %v2240_v3 = vld [vmem:[%s3076_s1 + $0x80] sm:$0xff]   ;;  %1918 = vmatpush3.bf16.msra.mxu0 %v2239_v2  ;;  %v2244_v7 = vld [vmem:[%s3076_s1 + $0x88] sm:$0xff]   ;;  %v2248_v11 = vld [vmem:[%s3076_s1 + $0x90] sm:$0xff]  }
   0x5   :  { %1982 = vmatpush3.bf16.msra.mxu1 %v2240_v3  ;;  %1919 = vmatprep.subr.bf16.mxu0 %v2241_v4  ;;  %v2249_v12 = vld [vmem:[%s3076_s1 + $0x58] sm:$0xff]   ;;  %v2253_v16 = vld [vmem:[%s3076_s1 + $0x60] sm:$0xff]   ;;  %v2257_v20 = vld [vmem:[%s3076_s1 + $0x68] sm:$0xff]  }
   0x6   :  { %1983 = vmatprep.subr.bf16.mxu1 %v2242_v5  ;;  %v2250_v13 = vld [vmem:[%s3076_s1 + $0xd8] sm:$0xff]   ;;  %v2254_v17 = vld [vmem:[%s3076_s1 + $0xe0] sm:$0xff]   ;;  %v2258_v21 = vld [vmem:[%s3076_s1 + $0xe8] sm:$0xff]  }
   0x7   :  { %v2251_v14 = vld [vmem:[%s3076_s1 + $0x18] sm:$0xff]   ;;  %v2255_v18 = vld [vmem:[%s3076_s1 + $0x20] sm:$0xff]   ;;  %v2259_v22 = vld [vmem:[%s3076_s1 + $0x28] sm:$0xff]  }
   0x8   :  { %1920 = vmatpush3.bf16.msra.mxu0 %v2243_v6  ;;  %v2252_v15 = vld [vmem:[%s3076_s1 + $0x98] sm:$0xff]   ;;  %v2256_v19 = vld [vmem:[%s3076_s1 + $0xa0] sm:$0xff]   ;;  %v2260_v23 = vld [vmem:[%s3076_s1 + $0xa8] sm:$0xff]  }
   0x9   :  { %1984 = vmatpush3.bf16.msra.mxu1 %v2244_v7  ;;  %1921 = vmatprep.subr.bf16.mxu0 %v2245_v8  ;;  %v2261_v24 = vld [vmem:[%s3076_s1 + $0x70] sm:$0xff]   ;;  %v2265_v28 = vld [vmem:[%s3076_s1 + $0x78] sm:$0xff]   ;;  %v2269_v32 = vld [vmem:[%s3077_s0] ss:$36 sps:$4 sm:$0xff]  }
   0xa   :  { %1985 = vmatprep.subr.bf16.mxu1 %v2246_v9  ;;  %v2262_v25 = vld [vmem:[%s3076_s1 + $0xf0] sm:$0xff]   ;;  %v2266_v29 = vld [vmem:[%s3076_s1 + $0xf8] sm:$0xff]   ;;  %v2271_v33 = vld [vmem:[%s3077_s0 + $0x4] ss:$36 sps:$4 sm:$0xff]  }
   0xb   :  { %v2263_v26 = vld [vmem:[%s3076_s1 + $0x30] sm:$0xff]   ;;  %v2267_v30 = vld [vmem:[%s3076_s1 + $0x38] sm:$0xff]   ;;  %v2272_v34 = vld [vmem:[%s3077_s0 + $0x8] ss:$36 sps:$4 sm:$0xff]   ;;  %1093 = vmatprep.mubr.bf16.mxu0 %v2271_v33 }
   0xc   :  { %1922 = vmatpush3.bf16.msra.mxu0 %v2247_v10  ;;  %v2264_v27 = vld [vmem:[%s3076_s1 + $0xb0] sm:$0xff]   ;;  %v2268_v31 = vld [vmem:[%s3076_s1 + $0xb8] sm:$0xff]   ;;  %v2275_v36 = vld [vmem:[%s3076_s1 + $0x140] sm:$0xff]  }
   0xd   :  { %1986 = vmatpush3.bf16.msra.mxu1 %v2248_v11  ;;  %1923 = vmatprep.subr.bf16.mxu0 %v2249_v12  ;;  %v2274_v35 = vld [vmem:[%s3077_s0 + $0xc] ss:$36 sps:$4 sm:$0xff]   ;;  %v2276_v37 = vld [vmem:[%s3076_s1 + $0x1c0] sm:$0xff]   ;;  %v2281_v41 = vld [vmem:[%s3077_s0 + $0x54] ss:$36 sps:$4 sm:$0xff]  }
   0xe   :  { %1987 = vmatprep.subr.bf16.mxu1 %v2250_v13  ;;  %1190 = vmatprep.mubr.bf16.mxu1 %v2274_v35  ;;  %v2277_v38 = vld [vmem:[%s3076_s1 + $0x100] sm:$0xff]   ;;  %v2279_v40 = vld [vmem:[%s3077_s0 + $0x4c] ss:$36 sps:$4 sm:$0xff]   ;;  %v2289_v48 = vld [vmem:[%s3077_s0 + $0x94] ss:$36 sps:$4 sm:$0xff]  }
   0xf   :  { %v2278_v39 = vld [vmem:[%s3076_s1 + $0x180] sm:$0xff]   ;;  %v2283_v42 = vld [vmem:[%s3077_s0 + $0x48] ss:$36 sps:$4 sm:$0xff]   ;;  %v2284_v43 = vld [vmem:[%s3077_s0 + $0x50] ss:$36 sps:$4 sm:$0xff]  }
  0x10   :  { %1924 = vmatpush3.bf16.msra.mxu0 %v2251_v14  ;;  %v2285_v44 = vld [vmem:[%s3076_s1 + $0x148] sm:$0xff]   ;;  %v2291_v49 = vld [vmem:[%s3077_s0 + $0x9c] ss:$36 sps:$4 sm:$0xff]   ;;  %v2293_v50 = vld [vmem:[%s3077_s0 + $0x90] ss:$36 sps:$4 sm:$0xff]  }
  0x11   :  { %1988 = vmatpush3.bf16.msra.mxu1 %v2252_v15  ;;  %1925 = vmatprep.subr.bf16.mxu0 %v2253_v16  ;;  %v2286_v45 = vld [vmem:[%s3076_s1 + $0x1c8] sm:$0xff]   ;;  %v2294_v51 = vld [vmem:[%s3077_s0 + $0x98] ss:$36 sps:$4 sm:$0xff]   ;;  %v2295_v52 = vld [vmem:[%s3076_s1 + $0x150] sm:$0xff]  }
  0x12   :  { %1989 = vmatprep.subr.bf16.mxu1 %v2254_v17  ;;  %v2287_v46 = vld [vmem:[%s3076_s1 + $0x108] sm:$0xff]   ;;  %v2296_v53 = vld [vmem:[%s3076_s1 + $0x1d0] sm:$0xff]   ;;  %v2299_v56 = vld [vmem:[%s3077_s0 + $0xdc] ss:$36 sps:$4 sm:$0xff]  }
  0x13   :  { %v2288_v47 = vld [vmem:[%s3076_s1 + $0x188] sm:$0xff]   ;;  %v2297_v54 = vld [vmem:[%s3076_s1 + $0x110] sm:$0xff]   ;;  %v2303_v58 = vld [vmem:[%s3077_s0 + $0xd8] ss:$36 sps:$4 sm:$0xff]  }
  0x14   :  { %1926 = vmatpush3.bf16.msra.mxu0 %v2255_v18  ;;  %v2298_v55 = vld [vmem:[%s3076_s1 + $0x190] sm:$0xff]   ;;  %v2301_v57 = vld [vmem:[%s3077_s0 + $0xe4] ss:$36 sps:$4 sm:$0xff]   ;;  %v2305_v60 = vld [vmem:[%s3076_s1 + $0x158] sm:$0xff]  }
  0x15   :  { %1990 = vmatpush3.bf16.msra.mxu1 %v2256_v19  ;;  %1927 = vmatprep.subr.bf16.mxu0 %v2257_v20  ;;  %v2304_v59 = vld [vmem:[%s3077_s0 + $0xe0] ss:$36 sps:$4 sm:$0xff]   ;;  %v2306_v61 = vld [vmem:[%s3076_s1 + $0x1d8] sm:$0xff]   ;;  %v2311_v1 = vld [vmem:[%s3077_s0 + $0x12c] ss:$36 sps:$4 sm:$0xff]  }
  0x16   :  { %1991 = vmatprep.subr.bf16.mxu1 %v2258_v21  ;;  %v2307_v62 = vld [vmem:[%s3076_s1 + $0x118] sm:$0xff]   ;;  %v2309_v0 = vld [vmem:[%s3077_s0 + $0x124] ss:$36 sps:$4 sm:$0xff]   ;;  %v2319_v8 = vld [vmem:[%s3077_s0 + $0x16c] ss:$36 sps:$4 sm:$0xff]  }
  0x17   :  { %v2308_v63 = vld [vmem:[%s3076_s1 + $0x198] sm:$0xff]   ;;  %v2313_v2 = vld [vmem:[%s3077_s0 + $0x120] ss:$36 sps:$4 sm:$0xff]   ;;  %v2314_v4 = vld [vmem:[%s3077_s0 + $0x128] ss:$36 sps:$4 sm:$0xff]  }
  0x18   :  { %1928 = vmatpush3.bf16.msra.mxu0 %v2259_v22  ;;  %v2315_v3 = vld [vmem:[%s3076_s1 + $0x160] sm:$0xff]   ;;  %v2321_v9 = vld [vmem:[%s3077_s0 + $0x174] ss:$36 sps:$4 sm:$0xff]   ;;  %v2325_v10 = vld [vmem:[%s3076_s1 + $0x168] sm:$0xff]  }
  0x19   :  { %1992 = vmatpush3.bf16.msra.mxu1 %v2260_v23  ;;  %1929 = vmatprep.subr.bf16.mxu0 %v2261_v24  ;;  %v2316_v5 = vld [vmem:[%s3076_s1 + $0x1e0] sm:$0xff]   ;;  %v2326_v11 = vld [vmem:[%s3076_s1 + $0x1e8] sm:$0xff]   ;;  %v2324_v15 = vld [vmem:[%s3077_s0 + $0x170] ss:$36 sps:$4 sm:$0xff]  }
  0x1a   :  { %1993 = vmatprep.subr.bf16.mxu1 %v2262_v25  ;;  %v2317_v6 = vld [vmem:[%s3076_s1 + $0x120] sm:$0xff]   ;;  %v2323_v12 = vld [vmem:[%s3077_s0 + $0x168] ss:$36 sps:$4 sm:$0xff]   ;;  %v2329_v16 = vld [vmem:[%s3077_s0 + $0x1b4] ss:$36 sps:$4 sm:$0xff]  }
  0x1b   :  { %v2318_v7 = vld [vmem:[%s3076_s1 + $0x1a0] sm:$0xff]   ;;  %v2327_v13 = vld [vmem:[%s3076_s1 + $0x128] sm:$0xff]   ;;  %v2335_v18 = vld [vmem:[%s3076_s1 + $0x170] sm:$0xff]  }
  0x1c   :  { %1930 = vmatpush3.bf16.msra.mxu0 %v2263_v26  ;;  %v2328_v14 = vld [vmem:[%s3076_s1 + $0x1a8] sm:$0xff]   ;;  %v2331_v17 = vld [vmem:[%s3077_s0 + $0x1bc] ss:$36 sps:$4 sm:$0xff]   ;;  %v2336_v19 = vld [vmem:[%s3076_s1 + $0x1f0] sm:$0xff]  }
  0x1d   :  { %1994 = vmatpush3.bf16.msra.mxu1 %v2264_v27  ;;  %1931 = vmatprep.subr.bf16.mxu0 %v2265_v28  ;;  %v2337_v20 = vld [vmem:[%s3076_s1 + $0x130] sm:$0xff]   ;;  %v2334_v23 = vld [vmem:[%s3077_s0 + $0x1b8] ss:$36 sps:$4 sm:$0xff]   ;;  %v2341_v25 = vld [vmem:[%s3077_s0 + $0x204] ss:$36 sps:$4 sm:$0xff]  }
  0x1e   :  { %1995 = vmatprep.subr.bf16.mxu1 %v2266_v29  ;;  %v2338_v21 = vld [vmem:[%s3076_s1 + $0x1b0] sm:$0xff]   ;;  %v2339_v24 = vld [vmem:[%s3077_s0 + $0x1fc] ss:$36 sps:$4 sm:$0xff]  }
  0x1f   :  { %v2333_v22 = vld [vmem:[%s3077_s0 + $0x1b0] ss:$36 sps:$4 sm:$0xff]   ;;  %v2345_v26 = vld [vmem:[%s3076_s1 + $0x178] sm:$0xff]  }
  0x20   :  { %1932 = vmatpush3.bf16.msra.mxu0 %v2267_v30  ;;  %v2346_v27 = vld [vmem:[%s3076_s1 + $0x1f8] sm:$0xff]   ;;  %v2349_v35 = vld [vmem:[%s3077_s0 + $0x10] ss:$36 sps:$4 sm:$0xff]  }
  0x21   :  { %1996 = vmatpush3.bf16.msra.mxu1 %v2268_v31  ;;  %2045 = vmatprep.subr.bf16.mxu0 %v2275_v36  ;;  %v2347_v28 = vld [vmem:[%s3076_s1 + $0x138] sm:$0xff]   ;;  %v2344_v31 = vld [vmem:[%s3077_s0 + $0x200] ss:$36 sps:$4 sm:$0xff]  }
  0x22   :  { %2109 = vmatprep.subr.bf16.mxu1 %v2276_v37  ;;  %v2348_v29 = vld [vmem:[%s3076_s1 + $0x1b8] sm:$0xff]  }
  0x23   :  { %1094 = vmatmul.mubr.bf16.vlgmr.msra.gmra.mrb[0].mxu0 %v2269_v32  ;;  %v2343_v30 = vld [vmem:[%s3077_s0 + $0x1f8] ss:$36 sps:$4 sm:$0xff]   ;;  %v2355_v32 = vld [vmem:[%s3076_s1 + $0x200] sm:$0xff]  }
  0x24   :  { %1191 = vmatmul.mubr.bf16.vlgmr.msra.gmra.mrb[0].mxu1 %v2272_v34  ;;  %2046 = vmatpush3.bf16.msra.mxu0 %v2277_v38  ;;  %v2351_v33 = vld [vmem:[%s3077_s0 + $0x14] ss:$36 sps:$4 sm:$0xff]   ;;  %v2354_v34 = vld [vmem:[%s3077_s0 + $0x1c] ss:$36 sps:$4 sm:$0xff]   ;;  %v2358_v38 = vld [vmem:[%s3077_s0 + $0x64] ss:$36 sps:$4 sm:$0xff]  }
  0x25   :  { %2110 = vmatpush3.bf16.msra.mxu1 %v2278_v39  ;;  %1101 = vmatprep.mubr.bf16.mxu0 %v2279_v40  ;;  %v2352_v36 = vld [vmem:[%s3077_s0 + $0x18] ss:$36 sps:$4 sm:$0xff]   ;;  %v2362_v39 = vld [vmem:[%s3076_s1 + $0x208] sm:$0xff]   ;;  %v2369_v40 = vld [vmem:[%s3076_s1 + $0x210] sm:$0xff]  }
  0x26   :  { %1198 = vmatprep.mubr.bf16.mxu1 %v2281_v41  ;;  %2047 = vmatprep.subr.bf16.mxu0 %v2285_v44  ;;  %v2356_v37 = vld [vmem:[%s3077_s0 + $0x5c] ss:$36 sps:$4 sm:$0xff]   ;;  %v2365_v44 = vld [vmem:[%s3077_s0 + $0xac] ss:$36 sps:$4 sm:$0xff]  }
  0x27   :  { %2111 = vmatprep.subr.bf16.mxu1 %v2286_v45  ;;  %v2360_v41 = vld [vmem:[%s3077_s0 + $0x58] ss:$36 sps:$4 sm:$0xff]  }
  0x28   :  { %2048 = vmatpush3.bf16.msra.mxu0 %v2287_v46  ;;  %v2376_v45 = vld [vmem:[%s3076_s1 + $0x218] sm:$0xff]   ;;  %v2383_v46 = vld [vmem:[%s3076_s1 + $0x220] sm:$0xff]  }
  0x29   :  { %2112 = vmatpush3.bf16.msra.mxu1 %v2288_v47  ;;  %2049 = vmatprep.subr.bf16.mxu0 %v2295_v52  ;;  %v2367_v47 = vld [vmem:[%s3077_s0 + $0xa0] ss:$36 sps:$4 sm:$0xff]   ;;  %v2374_v52 = vld [vmem:[%s3077_s0 + $0xe8] ss:$36 sps:$4 sm:$0xff]  }
  0x2a   :  { %2113 = vmatprep.subr.bf16.mxu1 %v2296_v53  ;;  %v2397_v53 = vld [vmem:[%s3076_s1 + $0x230] sm:$0xff]  }
  0x2b   :  { %1102 = vmatmul.mubr.bf16.gmra.mrb[4].mxu0 %v2283_v42  ;;  %v2361_v42 = vld [vmem:[%s3077_s0 + $0x60] ss:$36 sps:$4 sm:$0xff]  }
  0x2c   :  { %1199 = vmatmul.mubr.bf16.gmra.mrb[4].mxu1 %v2284_v43  ;;  %1109 = vmatprep.mubr.bf16.mxu0 %v2289_v48  ;;  %v2363_v43 = vld [vmem:[%s3077_s0 + $0xa4] ss:$36 sps:$4 sm:$0xff]  }
  0x2d   :  { %1206 = vmatprep.mubr.bf16.mxu1 %v2291_v49  ;;  %2050 = vmatpush3.bf16.msra.mxu0 %v2297_v54  ;;  %v2368_v48 = vld [vmem:[%s3077_s0 + $0xa8] ss:$36 sps:$4 sm:$0xff]   ;;  %v2375_v54 = vld [vmem:[%s3077_s0 + $0xf0] ss:$36 sps:$4 sm:$0xff]  }
  0x2e   :  { %2114 = vmatpush3.bf16.msra.mxu1 %v2298_v55  ;;  %2051 = vmatprep.subr.bf16.mxu0 %v2305_v60  ;;  %v2370_v49 = vld [vmem:[%s3077_s0 + $0xec] ss:$36 sps:$4 sm:$0xff]   ;;  %v2377_v55 = vld [vmem:[%s3077_s0 + $0x134] ss:$36 sps:$4 sm:$0xff]   ;;  %v2384_v60 = vld [vmem:[%s3077_s0 + $0x17c] ss:$36 sps:$4 sm:$0xff]  }
  0x2f   :  { %2115 = vmatprep.subr.bf16.mxu1 %v2306_v61  ;;  %v2386_v61 = vld [vmem:[%s3077_s0 + $0x184] ss:$36 sps:$4 sm:$0xff]  }
  0x31   :  { %2052 = vmatpush3.bf16.msra.mxu0 %v2307_v62  ;;  %v2388_v62 = vld [vmem:[%s3077_s0 + $0x178] ss:$36 sps:$4 sm:$0xff]  }
  0x32   :  { %2116 = vmatpush3.bf16.msra.mxu1 %v2308_v63  ;;  %2053 = vmatprep.subr.bf16.mxu0 %v2315_v3  ;;  %v2389_v63 = vld [vmem:[%s3077_s0 + $0x180] ss:$36 sps:$4 sm:$0xff]   ;;  %v2396_v3 = vld [vmem:[%s3077_s0 + $0x1c8] ss:$36 sps:$4 sm:$0xff]  }
  0x33   :  { %1110 = vmatmul.mubr.bf16.gmra.mrb[8].mxu0 %v2293_v50  ;;  %2117 = vmatprep.subr.bf16.mxu1 %v2316_v5  ;;  %v2372_v50 = vld [vmem:[%s3077_s0 + $0xf4] ss:$36 sps:$4 sm:$0xff]  }
  0x34   :  { %1207 = vmatmul.mubr.bf16.gmra.mrb[8].mxu1 %v2294_v51  ;;  %1117 = vmatprep.mubr.bf16.mxu0 %v2299_v56  ;;  %v2390_v51 = vld [vmem:[%s3076_s1 + $0x228] sm:$0xff]   ;;  %v2379_v56 = vld [vmem:[%s3077_s0 + $0x13c] ss:$36 sps:$4 sm:$0xff]   ;;  %v2400_v5 = vld [vmem:[%s3077_s0 + $0x214] ss:$36 sps:$4 sm:$0xff]  }
  0x35   :  { %1214 = vmatprep.mubr.bf16.mxu1 %v2301_v57  ;;  %2054 = vmatpush3.bf16.msra.mxu0 %v2317_v6  ;;  %v2404_v57 = vld [vmem:[%s3076_s1 + $0x238] sm:$0xff]   ;;  %v2402_v6 = vld [vmem:[%s3077_s0 + $0x208] ss:$36 sps:$4 sm:$0xff]  }
  0x36   :  { %2118 = vmatpush3.bf16.msra.mxu1 %v2318_v7  ;;  %2055 = vmatprep.subr.bf16.mxu0 %v2325_v10  ;;  %v2403_v7 = vld [vmem:[%s3077_s0 + $0x210] ss:$36 sps:$4 sm:$0xff]   ;;  %v2407_v10 = vld [vmem:[%s3077_s0 + $0x68] ss:$36 sps:$4 sm:$0xff]  }
  0x37   :  { %2119 = vmatprep.subr.bf16.mxu1 %v2326_v11  ;;  %v2408_v11 = vld [vmem:[%s3077_s0 + $0x188] ss:$36 sps:$4 sm:$0xff]  }
  0x39   :  { %2056 = vmatpush3.bf16.msra.mxu0 %v2327_v13  ;;  %v2410_v13 = vld [vmem:[%s3077_s0 + $0x1d0] ss:$36 sps:$4 sm:$0xff]  }
  0x3a   :  { %2120 = vmatpush3.bf16.msra.mxu1 %v2328_v14  ;;  %2057 = vmatprep.subr.bf16.mxu0 %v2335_v18  ;;  %v2411_v14 = vld [vmem:[%s3077_s0 + $0xf8] ss:$36 sps:$4 sm:$0xff]   ;;  %v245_v18 = vld [vmem:[%s3078_s2] sm:$0xff] }
  0x3b   :  { %1118 = vmatmul.mubr.bf16.gmra.mrb[12].mxu0 %v2303_v58  ;;  %2121 = vmatprep.subr.bf16.mxu1 %v2336_v19  ;;  %v2381_v58 = vld [vmem:[%s3077_s0 + $0x130] ss:$36 sps:$4 sm:$0xff]  }
  0x3c   :  { %1215 = vmatmul.mubr.bf16.gmra.mrb[12].mxu1 %v2304_v59  ;;  %1125 = vmatprep.mubr.bf16.mxu0 %v2309_v0  ;;  %v2382_v59 = vld [vmem:[%s3077_s0 + $0x138] ss:$36 sps:$4 sm:$0xff]   ;;  %v2391_v0 = vld [vmem:[%s3077_s0 + $0x1c4] ss:$36 sps:$4 sm:$0xff]  }
  0x3d   :  { %1222 = vmatprep.mubr.bf16.mxu1 %v2311_v1  ;;  %2058 = vmatpush3.bf16.msra.mxu0 %v2337_v20  ;;  %v2393_v1 = vld [vmem:[%s3077_s0 + $0x1cc] ss:$36 sps:$4 sm:$0xff]  }
  0x3e   :  { %2122 = vmatpush3.bf16.msra.mxu1 %v2338_v21  ;;  %2059 = vmatprep.subr.bf16.mxu0 %v2345_v26 }
  0x3f   :  { %2123 = vmatprep.subr.bf16.mxu1 %v2346_v27 }
  0x41   :  { %2060 = vmatpush3.bf16.msra.mxu0 %v2347_v28 }
  0x42   :  { %2124 = vmatpush3.bf16.msra.mxu1 %v2348_v29  ;;  %2189 = vmatprep.subr.bf16.mxu0 %v2355_v32 }
  0x43   :  { %1126 = vmatmul.mubr.bf16.gmra.mrb[16].mxu0 %v2313_v2  ;;  %2221 = vmatprep.subr.bf16.mxu1 %v2355_v32  ;;  %v2395_v2 = vld [vmem:[%s3077_s0 + $0x1c0] ss:$36 sps:$4 sm:$0xff]  }
  0x44   :  { %1223 = vmatmul.mubr.bf16.gmra.mrb[16].mxu1 %v2314_v4  ;;  %1133 = vmatprep.mubr.bf16.mxu0 %v2319_v8  ;;  %v2398_v4 = vld [vmem:[%s3077_s0 + $0x20c] ss:$36 sps:$4 sm:$0xff]   ;;  %v2405_v8 = vld [vmem:[%s3077_s0 + $0x20] ss:$36 sps:$4 sm:$0xff]  }
  0x45   :  { %1230 = vmatprep.mubr.bf16.mxu1 %v2321_v9  ;;  %v2406_v9 = vld [vmem:[%s3077_s0 + $0x140] ss:$36 sps:$4 sm:$0xff]  }
  0x4b   :  { %1134 = vmatmul.mubr.bf16.gmra.mrb[20].mxu0 %v2323_v12  ;;  %v2409_v12 = vld [vmem:[%s3077_s0 + $0xb0] ss:$36 sps:$4 sm:$0xff]  }
  0x4c   :  { %1231 = vmatmul.mubr.bf16.gmra.mrb[20].mxu1 %v2324_v15  ;;  %1141 = vmatprep.mubr.bf16.mxu0 %v2329_v16  ;;  %v2412_v15 = vld [vmem:[%s3077_s0 + $0x218] ss:$36 sps:$4 sm:$0xff]  }
  0x4d   :  { %1238 = vmatprep.mubr.bf16.mxu1 %v2331_v17 }
  0x53   :  { %1142 = vmatmul.mubr.bf16.gmra.mrb[24].mxu0 %v2333_v22 }
  0x54   :  { %1239 = vmatmul.mubr.bf16.gmra.mrb[24].mxu1 %v2334_v23  ;;  %1149 = vmatprep.mubr.bf16.mxu0 %v2339_v24 }
  0x55   :  { %1246 = vmatprep.mubr.bf16.mxu1 %v2341_v25  ;;  %v246_v25 = vld [vmem:[%s3078_s2 + $0x8] sm:$0xff] }
  0x5b   :  { %1150 = vmatmul.mubr.bf16.gmra.mrb[28].mxu0 %v2343_v30 }
  0x5c   :  { %1247 = vmatmul.mubr.bf16.gmra.mrb[28].mxu1 %v2344_v31  ;;  %1287 = vmatprep.mubr.bf16.mxu0 %v2351_v33 }
  0x5d   :  { %1384 = vmatprep.mubr.bf16.mxu1 %v2354_v34 }
  0x63   :  { %1288 = vmatmul.mubr.bf16.vlgmr.msra.gmra.mrb[32].mxu0 %v2349_v35 }
  0x64   :  { %1385 = vmatmul.mubr.bf16.vlgmr.msra.gmra.mrb[32].mxu1 %v2352_v36  ;;  %2190 = vmatpush3.bf16.msra.mxu0 %v2355_v32  ;;  %v247_v36 = vld [vmem:[%s3078_s2 + $0x10] sm:$0xff] }
  0x65   :  { %2229 = vmatpush3.bf16.msra.mxu1 %v2355_v32  ;;  %1295 = vmatprep.mubr.bf16.mxu0 %v2356_v37 }
  0x66   :  { %1392 = vmatprep.mubr.bf16.mxu1 %v2358_v38  ;;  %2191 = vmatprep.subr.bf16.mxu0 %v2362_v39 }
  0x67   :  { %2222 = vmatprep.subr.bf16.mxu1 %v2362_v39 }
  0x68   :  { %2192 = vmatpush3.bf16.msra.mxu0 %v2362_v39 }
  0x69   :  { %2230 = vmatpush3.bf16.msra.mxu1 %v2362_v39  ;;  %2193 = vmatprep.subr.bf16.mxu0 %v2369_v40 }
  0x6a   :  { %2223 = vmatprep.subr.bf16.mxu1 %v2369_v40 }
  0x6b   :  { %1296 = vmatmul.mubr.bf16.gmra.mrb[36].mxu0 %v2360_v41 }
  0x6c   :  { %1393 = vmatmul.mubr.bf16.gmra.mrb[36].mxu1 %v2361_v42  ;;  %1303 = vmatprep.mubr.bf16.mxu0 %v2363_v43  ;;  %v248_v43 = vld [vmem:[%s3078_s2 + $0x18] sm:$0xff] }
  0x6d   :  { %1400 = vmatprep.mubr.bf16.mxu1 %v2365_v44  ;;  %2194 = vmatpush3.bf16.msra.mxu0 %v2369_v40 }
  0x6e   :  { %2231 = vmatpush3.bf16.msra.mxu1 %v2369_v40  ;;  %2195 = vmatprep.subr.bf16.mxu0 %v2376_v45 }
  0x6f   :  { %2224 = vmatprep.subr.bf16.mxu1 %v2376_v45 }
  0x71   :  { %2196 = vmatpush3.bf16.msra.mxu0 %v2376_v45 }
  0x72   :  { %2232 = vmatpush3.bf16.msra.mxu1 %v2376_v45  ;;  %2197 = vmatprep.subr.bf16.mxu0 %v2383_v46 }
  0x73   :  { %1304 = vmatmul.mubr.bf16.gmra.mrb[40].mxu0 %v2367_v47  ;;  %2225 = vmatprep.subr.bf16.mxu1 %v2383_v46 }
  0x74   :  { %1401 = vmatmul.mubr.bf16.gmra.mrb[40].mxu1 %v2368_v48  ;;  %1311 = vmatprep.mubr.bf16.mxu0 %v2370_v49 }
  0x75   :  { %1408 = vmatprep.mubr.bf16.mxu1 %v2372_v50  ;;  %2198 = vmatpush3.bf16.msra.mxu0 %v2383_v46 }
  0x76   :  { %2233 = vmatpush3.bf16.msra.mxu1 %v2383_v46  ;;  %2199 = vmatprep.subr.bf16.mxu0 %v2390_v51 }
  0x77   :  { %2226 = vmatprep.subr.bf16.mxu1 %v2390_v51 }
  0x79   :  { %2200 = vmatpush3.bf16.msra.mxu0 %v2390_v51 }
  0x7a   :  { %2234 = vmatpush3.bf16.msra.mxu1 %v2390_v51  ;;  %2201 = vmatprep.subr.bf16.mxu0 %v2397_v53 }
  0x7b   :  { %1312 = vmatmul.mubr.bf16.gmra.mrb[44].mxu0 %v2374_v52  ;;  %2227 = vmatprep.subr.bf16.mxu1 %v2397_v53 }
  0x7c   :  { %1409 = vmatmul.mubr.bf16.gmra.mrb[44].mxu1 %v2375_v54  ;;  %1319 = vmatprep.mubr.bf16.mxu0 %v2377_v55  ;;  %v249_v54 = vld [vmem:[%s3078_s2 + $0x20] sm:$0xff] }
  0x7d   :  { %1416 = vmatprep.mubr.bf16.mxu1 %v2379_v56  ;;  %2202 = vmatpush3.bf16.msra.mxu0 %v2397_v53 }
  0x7e   :  { %2235 = vmatpush3.bf16.msra.mxu1 %v2397_v53  ;;  %2203 = vmatprep.subr.bf16.mxu0 %v2404_v57 }
  0x7f   :  { %2228 = vmatprep.subr.bf16.mxu1 %v2404_v57 }
  0x81   :  { %2204 = vmatpush3.bf16.msra.mxu0 %v2404_v57 }
  0x82   :  { %2236 = vmatpush3.bf16.msra.mxu1 %v2404_v57 }
  0x83   :  { %1320 = vmatmul.mubr.bf16.gmra.mrb[48].mxu0 %v2381_v58 }
  0x84   :  { %1417 = vmatmul.mubr.bf16.gmra.mrb[48].mxu1 %v2382_v59  ;;  %1327 = vmatprep.mubr.bf16.mxu0 %v2384_v60 }
  0x85   :  { %1424 = vmatprep.mubr.bf16.mxu1 %v2386_v61  ;;  %v250_v61 = vld [vmem:[%s3078_s2 + $0x28] sm:$0xff] }
  0x8b   :  { %1328 = vmatmul.mubr.bf16.gmra.mrb[52].mxu0 %v2388_v62 }
  0x8c   :  { %1425 = vmatmul.mubr.bf16.gmra.mrb[52].mxu1 %v2389_v63  ;;  %1335 = vmatprep.mubr.bf16.mxu0 %v2391_v0 }
  0x8d   :  { %1432 = vmatprep.mubr.bf16.mxu1 %v2393_v1 }
  0x93   :  { %1336 = vmatmul.mubr.bf16.gmra.mrb[56].mxu0 %v2395_v2 }
  0x94   :  { %1433 = vmatmul.mubr.bf16.gmra.mrb[56].mxu1 %v2396_v3  ;;  %1343 = vmatprep.mubr.bf16.mxu0 %v2398_v4 }
  0x95   :  { %1440 = vmatprep.mubr.bf16.mxu1 %v2400_v5 }
  0x9b   :  { %1344 = vmatmul.mubr.bf16.gmra.mrb[60].mxu0 %v2402_v6 }
  0x9c   :  { %1441 = vmatmul.mubr.bf16.gmra.mrb[60].mxu1 %v2403_v7  ;;  %2205 = vmatprep.mubr.bf16.mxu0 %v2405_v8  ;;  %v251_v8 = vld [vmem:[%s3078_s2 + $0x30] sm:$0xff] }
  0x9d   :  { %2213 = vmatprep.mubr.bf16.mxu1 %v2406_v9 }
  0xa3   :  { %2206 = vmatmul.mubr.bf16.vlgmr.msra.gmra.mrb[64].mxu0 %v2407_v10 }
  0xa4   :  { %2214 = vmatmul.mubr.bf16.vlgmr.msra.gmra.mrb[64].mxu1 %v2408_v11  ;;  %2209 = vmatprep.mubr.bf16.mxu0 %v2409_v12 }
  0xa5   :  { %2217 = vmatprep.mubr.bf16.mxu1 %v2410_v13 }
  0xab   :  { %2210 = vmatmul.mubr.bf16.gmra.mrb[68].mxu0 %v2411_v14 }
  0xac   :  { %2218 = vmatmul.mubr.bf16.gmra.mrb[68].mxu1 %v2412_v15  ;;  %v252_v15 = vld [vmem:[%s3078_s2 + $0x38] sm:$0xff] }
  0xf6   :  { %v1933_v16 = vpop.f32.mrb[0].mxu0 }
  0xf7   :  { %v1997_v17 = vpop.f32.mrb[0].mxu1  ;;  %v1934_v19 = vpop.f32.mrb[1].mxu0 }
  0xf8   :  { %v1935_v20 = vadd.f32 %v1934_v19, %v1933_v16  ;;  %v1998_v21 = vpop.f32.mrb[1].mxu1  ;;  %v1936_v22 = vpop.f32.mrb[2].mxu0 }
  0xf9   :  { %v1999_v23 = vadd.f32 %v1998_v21, %v1997_v17  ;;  %v2000_v24 = vpop.f32.mrb[2].mxu1  ;;  %v1937_v26 = vpop.f32.mrb[3].mxu0 }
  0xfa   :  { %v1096_v27 = vadd.f32 %v1935_v20, %v245_v18  ;;  %v1938_v28 = vadd.f32 %v1937_v26, %v1936_v22  ;;  %v2001_v29 = vpop.f32.mrb[3].mxu1  ;;  %v253_v26 = vld [vmem:[%s3078_s2 + $0x40] sm:$0xff] }
  0xfb   :  { %v2002_v30 = vadd.f32 %v2001_v29, %v2000_v24 }
  0xfc   :  { %v2881_v31 = vadd.f32 %v1999_v23, %v1096_v27  ;;  %v1099_v32 = vadd.f32 %v1938_v28, %v246_v25 }
  0xfe   :  { %v2883_v33 = vadd.f32 %v2002_v30, %v1099_v32  ;;  %v1939_v34 = vpop.f32.mrb[4].mxu0 }
  0xff   :  { %v2003_v35 = vpop.f32.mrb[4].mxu1  ;;  %v1940_v37 = vpop.f32.mrb[5].mxu0 }
 0x100   :  { %v1941_v38 = vadd.f32 %v1940_v37, %v1939_v34  ;;  %v2004_v39 = vpop.f32.mrb[5].mxu1  ;;  %v1942_v40 = vpop.f32.mrb[6].mxu0 }
 0x101   :  { %v2005_v41 = vadd.f32 %v2004_v39, %v2003_v35  ;;  %v2006_v42 = vpop.f32.mrb[6].mxu1  ;;  %v1943_v44 = vpop.f32.mrb[7].mxu0  ;;  %v254_v35 = vld [vmem:[%s3078_s2 + $0x48] sm:$0xff] }
 0x102   :  { %v1104_v45 = vadd.f32 %v1941_v38, %v247_v36  ;;  %v1944_v46 = vadd.f32 %v1943_v44, %v1942_v40  ;;  %v2007_v47 = vpop.f32.mrb[7].mxu1 }
 0x103   :  { %v2008_v48 = vadd.f32 %v2007_v47, %v2006_v42 }
 0x104   :  { %v2891_v49 = vadd.f32 %v2005_v41, %v1104_v45  ;;  %v1107_v50 = vadd.f32 %v1944_v46, %v248_v43  ;;  %v255_v46 = vld [vmem:[%s3078_s2 + $0x50] sm:$0xff] }
 0x106   :  { %v2893_v51 = vadd.f32 %v2008_v48, %v1107_v50  ;;  %v1945_v52 = vpop.f32.mrb[8].mxu0 }
 0x107   :  { %v2009_v53 = vpop.f32.mrb[8].mxu1  ;;  %v1946_v55 = vpop.f32.mrb[9].mxu0 }
 0x108   :  { %v1947_v56 = vadd.f32 %v1946_v55, %v1945_v52  ;;  %v2010_v57 = vpop.f32.mrb[9].mxu1  ;;  %v1948_v58 = vpop.f32.mrb[10].mxu0  ;;  %v256_v55 = vld [vmem:[%s3078_s2 + $0x58] sm:$0xff] }
 0x109   :  { %v2011_v59 = vadd.f32 %v2010_v57, %v2009_v53  ;;  %v2012_v60 = vpop.f32.mrb[10].mxu1  ;;  %v1949_v62 = vpop.f32.mrb[11].mxu0 }
 0x10a   :  { %v1112_v63 = vadd.f32 %v1947_v56, %v249_v54  ;;  %v1950_v0 = vadd.f32 %v1949_v62, %v1948_v58  ;;  %v2013_v1 = vpop.f32.mrb[11].mxu1 }
 0x10b   :  { %v2014_v2 = vadd.f32 %v2013_v1, %v2012_v60 }
 0x10c   :  { %v2901_v3 = vadd.f32 %v2011_v59, %v1112_v63  ;;  %v1115_v4 = vadd.f32 %v1950_v0, %v250_v61 }
 0x10e   :  { %v2903_v5 = vadd.f32 %v2014_v2, %v1115_v4  ;;  %v1951_v6 = vpop.f32.mrb[12].mxu0  ;;  %v257_v2 = vld [vmem:[%s3078_s2 + $0x60] sm:$0xff] }
 0x10f   :  { %v2015_v7 = vpop.f32.mrb[12].mxu1  ;;  %v1952_v9 = vpop.f32.mrb[13].mxu0 }
 0x110   :  { %v1953_v10 = vadd.f32 %v1952_v9, %v1951_v6  ;;  %v2016_v11 = vpop.f32.mrb[13].mxu1  ;;  %v1954_v12 = vpop.f32.mrb[14].mxu0 }
 0x111   :  { %v2017_v13 = vadd.f32 %v2016_v11, %v2015_v7  ;;  %v2018_v14 = vpop.f32.mrb[14].mxu1  ;;  %v1955_v16 = vpop.f32.mrb[15].mxu0  ;;  %v258_v11 = vld [vmem:[%s3078_s2 + $0x68] sm:$0xff] }
 0x112   :  { %v1120_v17 = vadd.f32 %v1953_v10, %v251_v8  ;;  %v1956_v18 = vadd.f32 %v1955_v16, %v1954_v12  ;;  %v2019_v19 = vpop.f32.mrb[15].mxu1 }
 0x113   :  { %v2020_v20 = vadd.f32 %v2019_v19, %v2018_v14 }
 0x114   :  { %v2911_v21 = vadd.f32 %v2017_v13, %v1120_v17  ;;  %v1123_v22 = vadd.f32 %v1956_v18, %v252_v15 }
 0x116   :  { %v2913_v23 = vadd.f32 %v2020_v20, %v1123_v22  ;;  %v1957_v24 = vpop.f32.mrb[16].mxu0 }
 0x117   :  { %v2021_v25 = vpop.f32.mrb[16].mxu1  ;;  %v1958_v27 = vpop.f32.mrb[17].mxu0 }
 0x118   :  { %v1959_v28 = vadd.f32 %v1958_v27, %v1957_v24  ;;  %v2022_v29 = vpop.f32.mrb[17].mxu1  ;;  %v1960_v30 = vpop.f32.mrb[18].mxu0  ;;  %v259_v24 = vld [vmem:[%s3078_s2 + $0x70] sm:$0xff] }
 0x119   :  { %v2023_v32 = vadd.f32 %v2022_v29, %v2021_v25  ;;  %v2024_v34 = vpop.f32.mrb[18].mxu1  ;;  %v1961_v36 = vpop.f32.mrb[19].mxu0 }
 0x11a   :  { %v1128_v37 = vadd.f32 %v1959_v28, %v253_v26  ;;  %v1962_v38 = vadd.f32 %v1961_v36, %v1960_v30  ;;  %v2025_v39 = vpop.f32.mrb[19].mxu1 }
 0x11b   :  { %v2026_v40 = vadd.f32 %v2025_v39, %v2024_v34 }
 0x11c   :  { %v2921_v41 = vadd.f32 %v2023_v32, %v1128_v37  ;;  %v1131_v42 = vadd.f32 %v1962_v38, %v254_v35  ;;  %v260_v32 = vld [vmem:[%s3078_s2 + $0x78] sm:$0xff] }
 0x11e   :  { %v2923_v43 = vadd.f32 %v2026_v40, %v1131_v42  ;;  %v1963_v44 = vpop.f32.mrb[20].mxu0 }
 0x11f   :  { %v2027_v45 = vpop.f32.mrb[20].mxu1  ;;  %v1964_v47 = vpop.f32.mrb[21].mxu0 }
 0x120   :  { %v1965_v48 = vadd.f32 %v1964_v47, %v1963_v44  ;;  %v2028_v50 = vpop.f32.mrb[21].mxu1  ;;  %v1966_v52 = vpop.f32.mrb[22].mxu0 }
 0x121   :  { %v2029_v53 = vadd.f32 %v2028_v50, %v2027_v45  ;;  %v2030_v54 = vpop.f32.mrb[22].mxu1  ;;  %v1967_v56 = vpop.f32.mrb[23].mxu0 }
 0x122   :  { %v1136_v57 = vadd.f32 %v1965_v48, %v255_v46  ;;  %v1968_v58 = vadd.f32 %v1967_v56, %v1966_v52  ;;  %v2031_v59 = vpop.f32.mrb[23].mxu1 }
 0x123   :  { %v2032_v60 = vadd.f32 %v2031_v59, %v2030_v54 }
 0x124   :  { %v2931_v61 = vadd.f32 %v2029_v53, %v1136_v57  ;;  %v1139_v62 = vadd.f32 %v1968_v58, %v256_v55 }
 0x126   :  { %v2933_v63 = vadd.f32 %v2032_v60, %v1139_v62  ;;  %v1969_v0 = vpop.f32.mrb[24].mxu0 }
 0x127   :  { %v2033_v1 = vpop.f32.mrb[24].mxu1  ;;  %v1970_v4 = vpop.f32.mrb[25].mxu0 }
 0x128   :  { %v1971_v6 = vadd.f32 %v1970_v4, %v1969_v0  ;;  %v2034_v7 = vpop.f32.mrb[25].mxu1  ;;  %v1972_v8 = vpop.f32.mrb[26].mxu0 }
 0x129   :  { %v2035_v9 = vadd.f32 %v2034_v7, %v2033_v1  ;;  %v2036_v10 = vpop.f32.mrb[26].mxu1  ;;  %v1973_v12 = vpop.f32.mrb[27].mxu0 }
 0x12a   :  { %v1144_v13 = vadd.f32 %v1971_v6, %v257_v2  ;;  %v1974_v14 = vadd.f32 %v1973_v12, %v1972_v8  ;;  %v2037_v15 = vpop.f32.mrb[27].mxu1 }
 0x12b   :  { %v2038_v16 = vadd.f32 %v2037_v15, %v2036_v10 }
 0x12c   :  { %v2941_v17 = vadd.f32 %v2035_v9, %v1144_v13  ;;  %v1147_v18 = vadd.f32 %v1974_v14, %v258_v11 }
 0x12e   :  { %v2943_v19 = vadd.f32 %v2038_v16, %v1147_v18  ;;  %v1975_v20 = vpop.f32.mrb[28].mxu0 }
 0x12f   :  { %v2039_v22 = vpop.f32.mrb[28].mxu1  ;;  %v1976_v25 = vpop.f32.mrb[29].mxu0 }
 0x130   :  { %v1977_v26 = vadd.f32 %v1976_v25, %v1975_v20  ;;  %v2040_v27 = vpop.f32.mrb[29].mxu1  ;;  %v1978_v28 = vpop.f32.mrb[30].mxu0 }
 0x131   :  { %v2041_v29 = vadd.f32 %v2040_v27, %v2039_v22  ;;  %v2042_v30 = vpop.f32.mrb[30].mxu1  ;;  %v1979_v34 = vpop.f32.mrb[31].mxu0 }
 0x132   :  { %v1152_v35 = vadd.f32 %v1977_v26, %v259_v24  ;;  %v1980_v36 = vadd.f32 %v1979_v34, %v1978_v28  ;;  %v2043_v37 = vpop.f32.mrb[31].mxu1 }
 0x133   :  { %v2044_v38 = vadd.f32 %v2043_v37, %v2042_v30 }
 0x134   :  { %v2951_v39 = vadd.f32 %v2041_v29, %v1152_v35  ;;  %v1155_v40 = vadd.f32 %v1980_v36, %v260_v32 }
 0x136   :  { %v2953_v42 = vadd.f32 %v2044_v38, %v1155_v40  ;;  %v2061_v44 = vpop.f32.mrb[32].mxu0 }
 0x137   :  { %v2125_v45 = vpop.f32.mrb[32].mxu1  ;;  %v2062_v46 = vpop.f32.mrb[33].mxu0 }
 0x138   :  { %v2063_v47 = vadd.f32 %v2062_v46, %v2061_v44  ;;  %v2126_v48 = vpop.f32.mrb[33].mxu1  ;;  %v2064_v50 = vpop.f32.mrb[34].mxu0 }
 0x139   :  { %v2127_v52 = vadd.f32 %v2126_v48, %v2125_v45  ;;  %v2128_v53 = vpop.f32.mrb[34].mxu1  ;;  %v2065_v54 = vpop.f32.mrb[35].mxu0 }
 0x13a   :  { %v1290_v55 = vadd.f32 %v2063_v47, %v2881_v31  ;;  %v2066_v56 = vadd.f32 %v2065_v54, %v2064_v50  ;;  %v2129_v57 = vpop.f32.mrb[35].mxu1 }
 0x13b   :  { %v2130_v58 = vadd.f32 %v2129_v57, %v2128_v53 }
 0x13c   :  { %v1293_v59 = vadd.f32 %v2066_v56, %v2883_v33  ;;  %v2957_v60 = vadd.f32 %v2127_v52, %v1290_v55 }
 0x13e   :  { %v2067_v62 = vpop.f32.mrb[36].mxu0  ;;  %v2959_v0 = vadd.f32 %v2130_v58, %v1293_v59 }
 0x13f   :  { %v2131_v1 = vpop.f32.mrb[36].mxu1  ;;  %v2068_v2 = vpop.f32.mrb[37].mxu0 }
 0x140   :  { %v2069_v4 = vadd.f32 %v2068_v2, %v2067_v62  ;;  %v2132_v6 = vpop.f32.mrb[37].mxu1  ;;  %v2070_v7 = vpop.f32.mrb[38].mxu0 }
 0x141   :  { %v2133_v8 = vadd.f32 %v2132_v6, %v2131_v1  ;;  %v2134_v9 = vpop.f32.mrb[38].mxu1  ;;  %v2071_v10 = vpop.f32.mrb[39].mxu0 }
 0x142   :  { %v1298_v31 = vadd.f32 %v2069_v4, %v2891_v49  ;;  %v2072_v11 = vadd.f32 %v2071_v10, %v2070_v7  ;;  %v2135_v12 = vpop.f32.mrb[39].mxu1 }
 0x143   :  { %v2136_v13 = vadd.f32 %v2135_v12, %v2134_v9 }
 0x144   :  { %v1301_v33 = vadd.f32 %v2072_v11, %v2893_v51  ;;  %v2963_v14 = vadd.f32 %v2133_v8, %v1298_v31 }
 0x146   :  { %v2073_v15 = vpop.f32.mrb[40].mxu0  ;;  %v2965_v16 = vadd.f32 %v2136_v13, %v1301_v33 }
 0x147   :  { %v2137_v18 = vpop.f32.mrb[40].mxu1  ;;  %v2074_v20 = vpop.f32.mrb[41].mxu0 }
 0x148   :  { %v2075_v22 = vadd.f32 %v2074_v20, %v2073_v15  ;;  %v2138_v24 = vpop.f32.mrb[41].mxu1  ;;  %v2076_v25 = vpop.f32.mrb[42].mxu0 }
 0x149   :  { %v2139_v26 = vadd.f32 %v2138_v24, %v2137_v18  ;;  %v2140_v27 = vpop.f32.mrb[42].mxu1  ;;  %v2077_v28 = vpop.f32.mrb[43].mxu0 }
 0x14a   :  { %v1306_v49 = vadd.f32 %v2075_v22, %v2901_v3  ;;  %v2078_v29 = vadd.f32 %v2077_v28, %v2076_v25  ;;  %v2141_v30 = vpop.f32.mrb[43].mxu1 }
 0x14b   :  { %v2142_v32 = vadd.f32 %v2141_v30, %v2140_v27 }
 0x14c   :  { %v1309_v51 = vadd.f32 %v2078_v29, %v2903_v5  ;;  %v2969_v34 = vadd.f32 %v2139_v26, %v1306_v49 }
 0x14e   :  { %v2079_v35 = vpop.f32.mrb[44].mxu0  ;;  %v2971_v36 = vadd.f32 %v2142_v32, %v1309_v51 }
 0x14f   :  { %v2143_v37 = vpop.f32.mrb[44].mxu1  ;;  %v2080_v38 = vpop.f32.mrb[45].mxu0 }
 0x150   :  { %v2081_v40 = vadd.f32 %v2080_v38, %v2079_v35  ;;  %v2144_v44 = vpop.f32.mrb[45].mxu1  ;;  %v2082_v45 = vpop.f32.mrb[46].mxu0 }
 0x151   :  { %v2145_v46 = vadd.f32 %v2144_v44, %v2143_v37  ;;  %v2146_v47 = vpop.f32.mrb[46].mxu1  ;;  %v2083_v48 = vpop.f32.mrb[47].mxu0 }
 0x152   :  { %v1314_v3 = vadd.f32 %v2081_v40, %v2911_v21  ;;  %v2084_v50 = vadd.f32 %v2083_v48, %v2082_v45  ;;  %v2147_v52 = vpop.f32.mrb[47].mxu1 }
 0x153   :  { %v2148_v53 = vadd.f32 %v2147_v52, %v2146_v47 }
 0x154   :  { %v1317_v5 = vadd.f32 %v2084_v50, %v2913_v23  ;;  %v2975_v54 = vadd.f32 %v2145_v46, %v1314_v3 }
 0x156   :  { %v2085_v55 = vpop.f32.mrb[48].mxu0  ;;  %v2977_v56 = vadd.f32 %v2148_v53, %v1317_v5 }
 0x157   :  { %v2149_v57 = vpop.f32.mrb[48].mxu1  ;;  %v2086_v58 = vpop.f32.mrb[49].mxu0 }
 0x158   :  { %v2087_v59 = vadd.f32 %v2086_v58, %v2085_v55  ;;  %v2150_v62 = vpop.f32.mrb[49].mxu1  ;;  %v2088_v1 = vpop.f32.mrb[50].mxu0 }
 0x159   :  { %v2151_v2 = vadd.f32 %v2150_v62, %v2149_v57  ;;  %v2152_v4 = vpop.f32.mrb[50].mxu1  ;;  %v2089_v6 = vpop.f32.mrb[51].mxu0 }
 0x15a   :  { %v1322_v21 = vadd.f32 %v2087_v59, %v2921_v41  ;;  %v2090_v7 = vadd.f32 %v2089_v6, %v2088_v1  ;;  %v2153_v8 = vpop.f32.mrb[51].mxu1 }
 0x15b   :  { %v2154_v9 = vadd.f32 %v2153_v8, %v2152_v4 }
 0x15c   :  { %v1325_v23 = vadd.f32 %v2090_v7, %v2923_v43  ;;  %v2981_v10 = vadd.f32 %v2151_v2, %v1322_v21  ;;  %v2998_v7 = vld [vmem:[%s3079_s3] ss:$0 sm:$0xff] }
 0x15e   :  { %v2091_v31 = vpop.f32.mrb[52].mxu0  ;;  %v2983_v11 = vadd.f32 %v2154_v9, %v1325_v23 }
 0x15f   :  { %v2155_v12 = vpop.f32.mrb[52].mxu1  ;;  %v2092_v13 = vpop.f32.mrb[53].mxu0 }
 0x160   :  { %v2093_v33 = vadd.f32 %v2092_v13, %v2091_v31  ;;  %v2156_v15 = vpop.f32.mrb[53].mxu1  ;;  %v2094_v18 = vpop.f32.mrb[54].mxu0 }
 0x161   :  { %v2157_v20 = vadd.f32 %v2156_v15, %v2155_v12  ;;  %v2158_v22 = vpop.f32.mrb[54].mxu1  ;;  %v2095_v24 = vpop.f32.mrb[55].mxu0 }
 0x162   :  { %v1330_v41 = vadd.f32 %v2093_v33, %v2931_v61  ;;  %v2096_v25 = vadd.f32 %v2095_v24, %v2094_v18  ;;  %v2159_v26 = vpop.f32.mrb[55].mxu1 }
 0x163   :  { %v2160_v27 = vadd.f32 %v2159_v26, %v2158_v22 }
 0x164   :  { %v1333_v43 = vadd.f32 %v2096_v25, %v2933_v63  ;;  %v1427_v28 = vadd.f32 %v2157_v20, %v1330_v41 }
 0x166   :  { %v2097_v49 = vpop.f32.mrb[56].mxu0  ;;  %v1430_v29 = vadd.f32 %v2160_v27, %v1333_v43 }
 0x167   :  { %v2161_v30 = vpop.f32.mrb[56].mxu1  ;;  %v2098_v32 = vpop.f32.mrb[57].mxu0 }
 0x168   :  { %v2099_v51 = vadd.f32 %v2098_v32, %v2097_v49  ;;  %v2162_v35 = vpop.f32.mrb[57].mxu1  ;;  %v2100_v37 = vpop.f32.mrb[58].mxu0 }
 0x169   :  { %v2163_v38 = vadd.f32 %v2162_v35, %v2161_v30  ;;  %v2164_v40 = vpop.f32.mrb[58].mxu1  ;;  %v2101_v44 = vpop.f32.mrb[59].mxu0 }
 0x16a   :  { %v1338_v45 = vadd.f32 %v2099_v51, %v2941_v17  ;;  %v2102_v46 = vadd.f32 %v2101_v44, %v2100_v37  ;;  %v2165_v61 = vpop.f32.mrb[59].mxu1 }
 0x16b   :  { %v2166_v47 = vadd.f32 %v2165_v61, %v2164_v40 }
 0x16c   :  { %v1341_v48 = vadd.f32 %v2102_v46, %v2943_v19  ;;  %v2989_v3 = vadd.f32 %v2163_v38, %v1338_v45 }
 0x16e   :  { %v2103_v63 = vpop.f32.mrb[60].mxu0  ;;  %v2991_v50 = vadd.f32 %v2166_v47, %v1341_v48 }
 0x16f   :  { %v2167_v52 = vpop.f32.mrb[60].mxu1  ;;  %v2104_v53 = vpop.f32.mrb[61].mxu0 }
 0x170   :  { %v2105_v5 = vadd.f32 %v2104_v53, %v2103_v63  ;;  %v2168_v55 = vpop.f32.mrb[61].mxu1  ;;  %v2106_v57 = vpop.f32.mrb[62].mxu0 }
 0x171   :  { %v2169_v58 = vadd.f32 %v2168_v55, %v2167_v52  ;;  %v2170_v59 = vpop.f32.mrb[62].mxu1  ;;  %v2107_v62 = vpop.f32.mrb[63].mxu0 }
 0x172   :  { %v1346_v17 = vadd.f32 %v2105_v5, %v2951_v39  ;;  %v2108_v1 = vadd.f32 %v2107_v62, %v2106_v57  ;;  %v2171_v2 = vpop.f32.mrb[63].mxu1  ;;  %v3006_v39 = vld [vmem:[%s3080_s4] ss:$0 sm:$0xff] }
 0x173   :  { %v2172_v4 = vadd.f32 %v2171_v2, %v2170_v59 }
 0x174   :  { %v1349_v19 = vadd.f32 %v2108_v1, %v2953_v42  ;;  %v1443_v6 = vadd.f32 %v2169_v58, %v1346_v17 }
 0x176   :  { %v2207_v21 = vpop.f32.mrb[64].mxu0  ;;  %v3000_v8 = vadd.f32 %v2172_v4, %v1349_v19 }
 0x177   :  { %v1492_v9 = vadd.f32 %v2207_v21, %v2963_v14  ;;  %v2215_v23 = vpop.f32.mrb[64].mxu1  ;;  %v1483_v31 = vpop.f32.mrb[65].mxu0 }
 0x178   :  { %v1524_v12 = vadd.f32 %v2215_v23, %v1427_v28  ;;  %v1484_v42 = vadd.f32 %v1483_v31, %v2957_v60  ;;  %v1515_v13 = vpop.f32.mrb[65].mxu1  ;;  %v2208_v33 = vpop.f32.mrb[66].mxu0 }
 0x179   :  { %v1555_v15 = vmul.f32 %v2998_v7, %v1492_v9  ;;  %v1516_v18 = vadd.f32 %v1515_v13, %v2981_v10  ;;  %v1495_v20 = vadd.f32 %v2208_v33, %v2965_v16  ;;  %v2216_v22 = vpop.f32.mrb[66].mxu1  ;;  %v1486_v14 = vpop.f32.mrb[67].mxu0 }
 0x17a   :  { %v1563_v24 = vmul.f32 %v2998_v7, %v1524_v12  ;;  %v1553_v41 = vmul.f32 %v2998_v7, %v1484_v42  ;;  %v1527_v25 = vadd.f32 %v2216_v22, %v1430_v29  ;;  %v1487_v26 = vadd.f32 %v1486_v14, %v2959_v0  ;;  %v1518_v27 = vpop.f32.mrb[67].mxu1 }
 0x17b   :  { %v1578_v60 = vadd.f32 %v3006_v39, %v1555_v15  ;;  %v1561_v43 = vmul.f32 %v2998_v7, %v1516_v18  ;;  %v1556_v28 = vmul.f32 %v2998_v7, %v1495_v20  ;;  %v1519_v10 = vadd.f32 %v1518_v27, %v2983_v11 }
 0x17c   :  { %v1586_v16 = vadd.f32 %v3006_v39, %v1563_v24  ;;  %v1576_v49 = vadd.f32 %v3006_v39, %v1553_v41  ;;  %v1564_v30 = vmul.f32 %v2998_v7, %v1527_v25  ;;  %v1554_v32 = vmul.f32 %v2998_v7, %v1487_v26 }
 0x17d   :  { %v1594_v29 = vmax.f32 %v1578_v60, 0.0  ;;  %v1584_v0 = vadd.f32 %v3006_v39, %v1561_v43  ;;  %v1579_v51 = vadd.f32 %v3006_v39, %v1556_v28  ;;  %v1562_v35 = vmul.f32 %v2998_v7, %v1519_v10 }
 0x17e   :  { %v1602_v37 = vmax.f32 %v1586_v16, 0.0  ;;  %v1592_v38 = vmax.f32 %v1576_v49, 0.0  ;;  %v1587_v40 = vadd.f32 %v3006_v39, %v1564_v30  ;;  %v1577_v11 = vadd.f32 %v3006_v39, %v1554_v32  ;;  %v2211_v44 = vpop.f32.mrb[68].mxu0 }
 0x17f   :  { %v1600_v45 = vmax.f32 %v1584_v0, 0.0  ;;  %v1595_v46 = vmax.f32 %v1579_v51, 0.0  ;;  %v1585_v61 = vadd.f32 %v3006_v39, %v1562_v35  ;;  %v1508_v47 = vadd.f32 %v2211_v44, %v2975_v54  ;;  %v2219_v48 = vpop.f32.mrb[68].mxu1  ;;  %v1499_v63 = vpop.f32.mrb[69].mxu0 }
 0x180   :  { %v1603_v52 = vmax.f32 %v1587_v40, 0.0  ;;  %v1593_v53 = vmax.f32 %v1577_v11, 0.0  ;;  %v1540_v5 = vadd.f32 %v2219_v48, %v1443_v6  ;;  %v1500_v55 = vadd.f32 %v1499_v63, %v2969_v34  ;;  %v1531_v57 = vpop.f32.mrb[69].mxu1  ;;  %v2212_v58 = vpop.f32.mrb[70].mxu0 }
 0x181   :  { %v1878_v59 = vpack.c.bf16 %v1595_v46, %v1594_v29  ;;  %v1601_v62 = vmax.f32 %v1585_v61, 0.0  ;;  %v1559_v17 = vmul.f32 %v2998_v7, %v1508_v47  ;;  %v1532_v1 = vadd.f32 %v1531_v57, %v2989_v3  ;;  %v2220_v2 = vpop.f32.mrb[70].mxu1  ;;  %v1502_v4 = vpop.f32.mrb[71].mxu0 }
 0x182   :  { %v1898_v19 = vpack.c.bf16 %v1603_v52, %v1602_v37  ;;  %v1873_v21 = vpack.c.bf16 %v1593_v53, %v1592_v38  ;;  %v1567_v54 = vmul.f32 %v2998_v7, %v1540_v5  ;;  %v1557_v9 = vmul.f32 %v2998_v7, %v1500_v55  ;;  %v1534_v23 = vpop.f32.mrb[71].mxu1 }
 0x183   :  { %1910 = vst [vmem:[%s3081_s5 + $0x8] sm:$0xff] %v1878_v59   ;;  %v1893_v34 = vpack.c.bf16 %v1601_v62, %v1600_v45  ;;  %v1565_v6 = vmul.f32 %v2998_v7, %v1532_v1  ;;  %v1511_v31 = vadd.f32 %v2212_v58, %v2977_v56  ;;  %v1543_v3 = vadd.f32 %v2220_v2, %v3000_v8 }
 0x184   :  { %1914 = vst [vmem:[%s3081_s5 + $0x28] sm:$0xff] %v1898_v19   ;;  %1874 = vst [vmem:[%s3081_s5] sm:$0xff] %v1873_v21   ;;  %v1503_v12 = vadd.f32 %v1502_v4, %v2971_v36  ;;  %v1582_v42 = vadd.f32 %v3006_v39, %v1559_v17  ;;  %v1535_v13 = vadd.f32 %v1534_v23, %v2991_v50 }
 0x185   :  { %1913 = vst [vmem:[%s3081_s5 + $0x20] sm:$0xff] %v1893_v34   ;;  %v1560_v56 = vmul.f32 %v2998_v7, %v1511_v31  ;;  %v1590_v33 = vadd.f32 %v3006_v39, %v1567_v54  ;;  %v1580_v15 = vadd.f32 %v3006_v39, %v1557_v9  ;;  %v1568_v18 = vmul.f32 %v2998_v7, %v1543_v3 }
 0x186   :  { %v1558_v8 = vmul.f32 %v2998_v7, %v1503_v12  ;;  %v1588_v36 = vadd.f32 %v3006_v39, %v1565_v6  ;;  %v1566_v22 = vmul.f32 %v2998_v7, %v1535_v13  ;;  %v1598_v41 = vmax.f32 %v1582_v42, 0.0 }
 0x187   :  { %v1583_v20 = vadd.f32 %v3006_v39, %v1560_v56  ;;  %v1591_v14 = vadd.f32 %v3006_v39, %v1568_v18  ;;  %v1606_v26 = vmax.f32 %v1590_v33, 0.0  ;;  %v1596_v27 = vmax.f32 %v1580_v15, 0.0 }
 0x188   :  { %v1581_v24 = vadd.f32 %v3006_v39, %v1558_v8  ;;  %v1589_v25 = vadd.f32 %v3006_v39, %v1566_v22  ;;  %v1604_v28 = vmax.f32 %v1588_v36, 0.0 }
 0x189   :  { %v1599_v50 = vmax.f32 %v1583_v20, 0.0  ;;  %v1607_v60 = vmax.f32 %v1591_v14, 0.0 }
 0x18a   :  { %v1597_v43 = vmax.f32 %v1581_v24, 0.0  ;;  %v1605_v16 = vmax.f32 %v1589_v25, 0.0 }
 0x18b   :  { %v1888_v10 = vpack.c.bf16 %v1599_v50, %v1598_v41  ;;  %v1908_v49 = vpack.c.bf16 %v1607_v60, %v1606_v26 }
 0x18c   :  { %v1883_v30 = vpack.c.bf16 %v1597_v43, %v1596_v27  ;;  %v1903_v7 = vpack.c.bf16 %v1605_v16, %v1604_v28 }
 0x18d   :  { %1912 = vst [vmem:[%s3081_s5 + $0x18] sm:$0xff] %v1888_v10   ;;  %1916 = vst [vmem:[%s3081_s5 + $0x38] sm:$0xff] %v1908_v49  }
 0x18e   :  { %1911 = vst [vmem:[%s3081_s5 + $0x10] sm:$0xff] %v1883_v30   ;;  %1915 = vst [vmem:[%s3081_s5 + $0x30] sm:$0xff] %v1903_v7  }

// kernel: resnet_stem_forward.11
= control target key start
LH: loop header
LB: loop body
LE: loop exit
PB: predicated region body
PF: predicated region fallthrough
CT: control target
= control target key end

     0   :  { %s1623_s0 = inlined_call_operand.vmem [shape: bf16[32,1152], index: 0, kind: input, shape index: {}]   ;;  %s1624_s1 = inlined_call_operand.vmem [shape: bf16[1152,128], index: 1, kind: input, shape index: {}]   ;;  %s1625_s2 = inlined_call_operand.hbm [shape: f32[32,128], index: 2, kind: output, shape index: {}]  }
   0x1   :  { %v1201_v0 = vld [vmem:[%s1624_s1 + $0x40] sm:$0xff]   ;;  %v1205_v4 = vld [vmem:[%s1624_s1 + $0x48] sm:$0xff]   ;;  %v1209_v8 = vld [vmem:[%s1624_s1 + $0x50] sm:$0xff]  }
   0x2   :  { %v1202_v1 = vld [vmem:[%s1624_s1 + $0xc0] sm:$0xff]   ;;  %1056 = vmatprep.subr.bf16.mxu0 %v1201_v0  ;;  %v1206_v5 = vld [vmem:[%s1624_s1 + $0xc8] sm:$0xff]   ;;  %v1210_v9 = vld [vmem:[%s1624_s1 + $0xd0] sm:$0xff]  }
   0x3   :  { %v1203_v2 = vld [vmem:[%s1624_s1] sm:$0xff]   ;;  %1084 = vmatprep.subr.bf16.mxu1 %v1202_v1  ;;  %v1207_v6 = vld [vmem:[%s1624_s1 + $0x8] sm:$0xff]   ;;  %v1211_v10 = vld [vmem:[%s1624_s1 + $0x10] sm:$0xff]  }
   0x4   :  { %v1204_v3 = vld [vmem:[%s1624_s1 + $0x80] sm:$0xff]   ;;  %1057 = vmatpush3.bf16.msra.mxu0 %v1203_v2  ;;  %v1208_v7 = vld [vmem:[%s1624_s1 + $0x88] sm:$0xff]   ;;  %v1212_v11 = vld [vmem:[%s1624_s1 + $0x90] sm:$0xff]  }
   0x5   :  { %1085 = vmatpush3.bf16.msra.mxu1 %v1204_v3  ;;  %1058 = vmatprep.subr.bf16.mxu0 %v1205_v4  ;;  %v1213_v12 = vld [vmem:[%s1624_s1 + $0x58] sm:$0xff]   ;;  %v1217_v16 = vld [vmem:[%s1624_s1 + $0x60] sm:$0xff]   ;;  %v1221_v20 = vld [vmem:[%s1624_s1 + $0x68] sm:$0xff]  }
   0x6   :  { %1086 = vmatprep.subr.bf16.mxu1 %v1206_v5  ;;  %v1214_v13 = vld [vmem:[%s1624_s1 + $0xd8] sm:$0xff]   ;;  %v1218_v17 = vld [vmem:[%s1624_s1 + $0xe0] sm:$0xff]   ;;  %v1222_v21 = vld [vmem:[%s1624_s1 + $0xe8] sm:$0xff]  }
   0x7   :  { %v1215_v14 = vld [vmem:[%s1624_s1 + $0x18] sm:$0xff]   ;;  %v1219_v18 = vld [vmem:[%s1624_s1 + $0x20] sm:$0xff]   ;;  %v1223_v22 = vld [vmem:[%s1624_s1 + $0x28] sm:$0xff]  }
   0x8   :  { %1059 = vmatpush3.bf16.msra.mxu0 %v1207_v6  ;;  %v1216_v15 = vld [vmem:[%s1624_s1 + $0x98] sm:$0xff]   ;;  %v1220_v19 = vld [vmem:[%s1624_s1 + $0xa0] sm:$0xff]   ;;  %v1224_v23 = vld [vmem:[%s1624_s1 + $0xa8] sm:$0xff]  }
   0x9   :  { %1087 = vmatpush3.bf16.msra.mxu1 %v1208_v7  ;;  %1060 = vmatprep.subr.bf16.mxu0 %v1209_v8  ;;  %v1225_v24 = vld [vmem:[%s1624_s1 + $0x70] sm:$0xff]   ;;  %v1229_v28 = vld [vmem:[%s1624_s1 + $0x78] sm:$0xff]   ;;  %v1233_v32 = vld [vmem:[%s1623_s0] ss:$36 sps:$4 sm:$0xff]  }
   0xa   :  { %1088 = vmatprep.subr.bf16.mxu1 %v1210_v9  ;;  %v1226_v25 = vld [vmem:[%s1624_s1 + $0xf0] sm:$0xff]   ;;  %v1230_v29 = vld [vmem:[%s1624_s1 + $0xf8] sm:$0xff]   ;;  %v1235_v33 = vld [vmem:[%s1623_s0 + $0x4] ss:$36 sps:$4 sm:$0xff]  }
   0xb   :  { %v1227_v26 = vld [vmem:[%s1624_s1 + $0x30] sm:$0xff]   ;;  %v1231_v30 = vld [vmem:[%s1624_s1 + $0x38] sm:$0xff]   ;;  %v1236_v34 = vld [vmem:[%s1623_s0 + $0x8] ss:$36 sps:$4 sm:$0xff]   ;;  %733 = vmatprep.mubr.bf16.mxu0 %v1235_v33 }
   0xc   :  { %1061 = vmatpush3.bf16.msra.mxu0 %v1211_v10  ;;  %v1228_v27 = vld [vmem:[%s1624_s1 + $0xb0] sm:$0xff]   ;;  %v1232_v31 = vld [vmem:[%s1624_s1 + $0xb8] sm:$0xff]   ;;  %v1239_v36 = vld [vmem:[%s1624_s1 + $0x140] sm:$0xff]  }
   0xd   :  { %1089 = vmatpush3.bf16.msra.mxu1 %v1212_v11  ;;  %1062 = vmatprep.subr.bf16.mxu0 %v1213_v12  ;;  %v1238_v35 = vld [vmem:[%s1623_s0 + $0xc] ss:$36 sps:$4 sm:$0xff]   ;;  %v1240_v37 = vld [vmem:[%s1624_s1 + $0x100] sm:$0xff]   ;;  %v1251_v48 = vld [vmem:[%s1624_s1 + $0x158] sm:$0xff]  }
   0xe   :  { %1090 = vmatprep.subr.bf16.mxu1 %v1214_v13  ;;  %782 = vmatprep.mubr.bf16.mxu1 %v1238_v35  ;;  %v1241_v38 = vld [vmem:[%s1624_s1 + $0x1c0] sm:$0xff]   ;;  %v1243_v40 = vld [vmem:[%s1624_s1 + $0x148] sm:$0xff]   ;;  %v1247_v44 = vld [vmem:[%s1624_s1 + $0x150] sm:$0xff]  }
   0xf   :  { %v1242_v39 = vld [vmem:[%s1624_s1 + $0x180] sm:$0xff]   ;;  %v1244_v41 = vld [vmem:[%s1624_s1 + $0x108] sm:$0xff]   ;;  %v1248_v45 = vld [vmem:[%s1624_s1 + $0x110] sm:$0xff]  }
  0x10   :  { %1063 = vmatpush3.bf16.msra.mxu0 %v1215_v14  ;;  %v1245_v42 = vld [vmem:[%s1624_s1 + $0x1c8] sm:$0xff]   ;;  %v1249_v46 = vld [vmem:[%s1624_s1 + $0x1d0] sm:$0xff]   ;;  %v1252_v49 = vld [vmem:[%s1624_s1 + $0x118] sm:$0xff]  }
  0x11   :  { %1091 = vmatpush3.bf16.msra.mxu1 %v1216_v15  ;;  %1064 = vmatprep.subr.bf16.mxu0 %v1217_v16  ;;  %v1246_v43 = vld [vmem:[%s1624_s1 + $0x188] sm:$0xff]   ;;  %v1250_v47 = vld [vmem:[%s1624_s1 + $0x190] sm:$0xff]   ;;  %v1253_v50 = vld [vmem:[%s1624_s1 + $0x1d8] sm:$0xff]  }
  0x12   :  { %1092 = vmatprep.subr.bf16.mxu1 %v1218_v17  ;;  %v1254_v51 = vld [vmem:[%s1624_s1 + $0x198] sm:$0xff]   ;;  %v1255_v52 = vld [vmem:[%s1624_s1 + $0x160] sm:$0xff]   ;;  %v1259_v56 = vld [vmem:[%s1624_s1 + $0x168] sm:$0xff]  }
  0x13   :  { %v1256_v53 = vld [vmem:[%s1624_s1 + $0x120] sm:$0xff]   ;;  %v1260_v57 = vld [vmem:[%s1623_s0 + $0x4c] ss:$36 sps:$4 sm:$0xff]   ;;  %v1262_v58 = vld [vmem:[%s1623_s0 + $0x54] ss:$36 sps:$4 sm:$0xff]  }
  0x14   :  { %1065 = vmatpush3.bf16.msra.mxu0 %v1219_v18  ;;  %v1257_v54 = vld [vmem:[%s1624_s1 + $0x1e0] sm:$0xff]   ;;  %v1264_v59 = vld [vmem:[%s1624_s1 + $0x128] sm:$0xff]   ;;  %v1266_v61 = vld [vmem:[%s1623_s0 + $0x50] ss:$36 sps:$4 sm:$0xff]  }
  0x15   :  { %1093 = vmatpush3.bf16.msra.mxu1 %v1220_v19  ;;  %1066 = vmatprep.subr.bf16.mxu0 %v1221_v20  ;;  %v1258_v55 = vld [vmem:[%s1624_s1 + $0x1a0] sm:$0xff]   ;;  %v1265_v60 = vld [vmem:[%s1623_s0 + $0x48] ss:$36 sps:$4 sm:$0xff]   ;;  %v1269_v0 = vld [vmem:[%s1624_s1 + $0x170] sm:$0xff]  }
  0x16   :  { %1094 = vmatprep.subr.bf16.mxu1 %v1222_v21  ;;  %v1267_v62 = vld [vmem:[%s1624_s1 + $0x1e8] sm:$0xff]   ;;  %v1270_v1 = vld [vmem:[%s1624_s1 + $0x130] sm:$0xff]   ;;  %v1273_v4 = vld [vmem:[%s1624_s1 + $0x178] sm:$0xff]  }
  0x17   :  { %v1268_v63 = vld [vmem:[%s1624_s1 + $0x1a8] sm:$0xff]   ;;  %v1271_v2 = vld [vmem:[%s1624_s1 + $0x1f0] sm:$0xff]   ;;  %v1274_v5 = vld [vmem:[%s1624_s1 + $0x138] sm:$0xff]  }
  0x18   :  { %1067 = vmatpush3.bf16.msra.mxu0 %v1223_v22  ;;  %v1272_v3 = vld [vmem:[%s1624_s1 + $0x1b0] sm:$0xff]   ;;  %v1275_v6 = vld [vmem:[%s1624_s1 + $0x1f8] sm:$0xff]   ;;  %v1280_v10 = vld [vmem:[%s1624_s1 + $0x200] sm:$0xff]  }
  0x19   :  { %1095 = vmatpush3.bf16.msra.mxu1 %v1224_v23  ;;  %1068 = vmatprep.subr.bf16.mxu0 %v1225_v24  ;;  %v1276_v7 = vld [vmem:[%s1623_s0 + $0x10] ss:$36 sps:$4 sm:$0xff]   ;;  %v1279_v9 = vld [vmem:[%s1624_s1 + $0x1b8] sm:$0xff]   ;;  %v1284_v13 = vld [vmem:[%s1624_s1 + $0x208] sm:$0xff]  }
  0x1a   :  { %1096 = vmatprep.subr.bf16.mxu1 %v1226_v25  ;;  %v1278_v8 = vld [vmem:[%s1623_s0 + $0x14] ss:$36 sps:$4 sm:$0xff]   ;;  %v1283_v12 = vld [vmem:[%s1623_s0 + $0x1c] ss:$36 sps:$4 sm:$0xff]   ;;  %v1289_v17 = vld [vmem:[%s1623_s0 + $0x64] ss:$36 sps:$4 sm:$0xff]  }
  0x1b   :  { %v1281_v11 = vld [vmem:[%s1623_s0 + $0x18] ss:$36 sps:$4 sm:$0xff]   ;;  %v1288_v16 = vld [vmem:[%s1624_s1 + $0x210] sm:$0xff]   ;;  %v1291_v18 = vld [vmem:[%s1623_s0 + $0x60] ss:$36 sps:$4 sm:$0xff]  }
  0x1c   :  { %1069 = vmatpush3.bf16.msra.mxu0 %v1227_v26  ;;  %v1285_v14 = vld [vmem:[%s1623_s0 + $0x5c] ss:$36 sps:$4 sm:$0xff]  }
  0x1d   :  { %1097 = vmatpush3.bf16.msra.mxu1 %v1228_v27  ;;  %1070 = vmatprep.subr.bf16.mxu0 %v1229_v28  ;;  %v1287_v15 = vld [vmem:[%s1623_s0 + $0x58] ss:$36 sps:$4 sm:$0xff]   ;;  %v1293_v20 = vld [vmem:[%s1624_s1 + $0x220] sm:$0xff]  }
  0x1e   :  { %1098 = vmatprep.subr.bf16.mxu1 %v1230_v29  ;;  %v1292_v19 = vld [vmem:[%s1624_s1 + $0x218] sm:$0xff]   ;;  %v1297_v21 = vld [vmem:[%s1623_s0 + $0x20] ss:$36 sps:$4 sm:$0xff]  }
  0x20   :  { %1071 = vmatpush3.bf16.msra.mxu0 %v1231_v30 }
  0x21   :  { %1099 = vmatpush3.bf16.msra.mxu1 %v1232_v31  ;;  %1112 = vmatprep.subr.bf16.mxu0 %v1239_v36 }
  0x22   :  { %1140 = vmatprep.subr.bf16.mxu1 %v1241_v38 }
  0x23   :  { %734 = vmatmul.mubr.bf16.vlgmr.msra.gmra.mrb[0].mxu0 %v1233_v32 }
  0x24   :  { %783 = vmatmul.mubr.bf16.vlgmr.msra.gmra.mrb[0].mxu1 %v1236_v34  ;;  %1113 = vmatpush3.bf16.msra.mxu0 %v1240_v37 }
  0x25   :  { %1141 = vmatpush3.bf16.msra.mxu1 %v1242_v39  ;;  %1114 = vmatprep.subr.bf16.mxu0 %v1243_v40 }
  0x26   :  { %1142 = vmatprep.subr.bf16.mxu1 %v1245_v42  ;;  %741 = vmatprep.mubr.bf16.mxu0 %v1260_v57 }
  0x27   :  { %790 = vmatprep.mubr.bf16.mxu1 %v1262_v58 }
  0x28   :  { %1115 = vmatpush3.bf16.msra.mxu0 %v1244_v41 }
  0x29   :  { %1143 = vmatpush3.bf16.msra.mxu1 %v1246_v43  ;;  %1116 = vmatprep.subr.bf16.mxu0 %v1247_v44 }
  0x2a   :  { %1144 = vmatprep.subr.bf16.mxu1 %v1249_v46 }
  0x2b   :  { %742 = vmatmul.mubr.bf16.gmra.mrb[4].mxu0 %v1265_v60 }
  0x2c   :  { %1117 = vmatpush3.bf16.msra.mxu0 %v1248_v45  ;;  %791 = vmatmul.mubr.bf16.gmra.mrb[4].mxu1 %v1266_v61 }
  0x2d   :  { %1145 = vmatpush3.bf16.msra.mxu1 %v1250_v47  ;;  %1118 = vmatprep.subr.bf16.mxu0 %v1251_v48 }
  0x2e   :  { %1146 = vmatprep.subr.bf16.mxu1 %v1253_v50  ;;  %831 = vmatprep.mubr.bf16.mxu0 %v1278_v8 }
  0x2f   :  { %880 = vmatprep.mubr.bf16.mxu1 %v1283_v12 }
  0x30   :  { %1119 = vmatpush3.bf16.msra.mxu0 %v1252_v49 }
  0x31   :  { %1147 = vmatpush3.bf16.msra.mxu1 %v1254_v51  ;;  %1120 = vmatprep.subr.bf16.mxu0 %v1255_v52 }
  0x32   :  { %1148 = vmatprep.subr.bf16.mxu1 %v1257_v54 }
  0x34   :  { %1121 = vmatpush3.bf16.msra.mxu0 %v1256_v53 }
  0x35   :  { %1149 = vmatpush3.bf16.msra.mxu1 %v1258_v55  ;;  %1122 = vmatprep.subr.bf16.mxu0 %v1259_v56 }
  0x36   :  { %1150 = vmatprep.subr.bf16.mxu1 %v1267_v62 }
  0x38   :  { %1123 = vmatpush3.bf16.msra.mxu0 %v1264_v59 }
  0x39   :  { %1151 = vmatpush3.bf16.msra.mxu1 %v1268_v63  ;;  %1124 = vmatprep.subr.bf16.mxu0 %v1269_v0 }
  0x3a   :  { %1152 = vmatprep.subr.bf16.mxu1 %v1271_v2 }
  0x3c   :  { %1125 = vmatpush3.bf16.msra.mxu0 %v1270_v1 }
  0x3d   :  { %1153 = vmatpush3.bf16.msra.mxu1 %v1272_v3  ;;  %1126 = vmatprep.subr.bf16.mxu0 %v1273_v4 }
  0x3e   :  { %1154 = vmatprep.subr.bf16.mxu1 %v1275_v6 }
  0x40   :  { %1127 = vmatpush3.bf16.msra.mxu0 %v1274_v5 }
  0x41   :  { %1155 = vmatpush3.bf16.msra.mxu1 %v1279_v9  ;;  %1178 = vmatprep.subr.bf16.mxu0 %v1280_v10 }
  0x43   :  { %832 = vmatmul.mubr.bf16.vlgmr.msra.gmra.mrb[8].mxu0 %v1276_v7 }
  0x44   :  { %1179 = vmatpush3.bf16.msra.mxu0 %v1280_v10  ;;  %881 = vmatmul.mubr.bf16.vlgmr.msra.gmra.mrb[8].mxu1 %v1281_v11 }
  0x45   :  { %1180 = vmatprep.subr.bf16.mxu0 %v1284_v13  ;;  %839 = vmatprep.mubr.bf16.mxu0 %v1285_v14 }
  0x46   :  { %888 = vmatprep.mubr.bf16.mxu1 %v1289_v17 }
  0x48   :  { %1181 = vmatpush3.bf16.msra.mxu0 %v1284_v13 }
  0x49   :  { %1182 = vmatprep.subr.bf16.mxu0 %v1288_v16 }
  0x4b   :  { %840 = vmatmul.mubr.bf16.gmra.mrb[12].mxu0 %v1287_v15 }
  0x4c   :  { %1183 = vmatpush3.bf16.msra.mxu0 %v1288_v16  ;;  %889 = vmatmul.mubr.bf16.gmra.mrb[12].mxu1 %v1291_v18 }
  0x4d   :  { %1184 = vmatprep.subr.bf16.mxu0 %v1292_v19 }
  0x4e   :  { %7 = vsyncpa [#allocation3], 0  ;;  %1194 = vmatprep.mubr.bf16.mxu0 %v1297_v21  ;;  %v1294_v22 = vld [vmem:[%s1624_s1 + $0x228] sm:$0xff]   ;;  %v1295_v23 = vld [vmem:[%s1624_s1 + $0x230] sm:$0xff]  }
  0x4f   :  { %v1296_v24 = vld [vmem:[%s1624_s1 + $0x238] sm:$0xff]   ;;  %v1298_v25 = vld [vmem:[%s1623_s0 + $0x68] ss:$36 sps:$4 sm:$0xff]   ;;  %s1323_s0 = smov [#allocation2]  }
  0x50   :  { %1185 = vmatpush3.bf16.msra.mxu0 %v1292_v19  ;;  %s955_s1 = sshll.u32 %s1323_s0, 4  ;;  %s956_s1 = int_to_ptr.vmem [resolvable:$true] %s955_s1 }
  0x51   :  { %1186 = vmatprep.subr.bf16.mxu0 %v1293_v20  ;;  %s1299_s21 = scalar_lea.vmem %s956_s1, 512  ;;  %p1304_p1 = scmp.lt.s32.totalorder %s956_s1, %s956_s1 }
  0x52   :  { %p1300_p0 = scmp.ne.s32.totalorder %s956_s1, %s1299_s21  ;;  %p1305_p2 = scmp.lt.s32.totalorder %s1299_s21, %s1299_s21 }
  0x54   :  { %1187 = vmatpush3.bf16.msra.mxu0 %v1293_v20  ;;  %p1306_p3 = por %p1305_p2, %p1304_p1 }
  0x55   :  { %1188 = vmatprep.subr.bf16.mxu0 %v1294_v22 }
  0x56   :  { %p1307_p4 = pnand %p1306_p3, %p1300_p0 }
  0x58   :  { %1189 = vmatpush3.bf16.msra.mxu0 %v1294_v22 }
  0x59   :  { %1190 = vmatprep.subr.bf16.mxu0 %v1295_v23 }
  0x5c   :  { %1191 = vmatpush3.bf16.msra.mxu0 %v1295_v23 }
  0x5d   :  { %1192 = vmatprep.subr.bf16.mxu0 %v1296_v24 }
  0x60   :  { %1193 = vmatpush3.bf16.msra.mxu0 %v1296_v24 }
  0x63   :  { %1195 = vmatmul.mubr.bf16.vlgmr.msra.gmra.mrb[16].mxu0 %v1298_v25 }
  0xf6   :  { %v1072_v26 = vpop.f32.mrb[0].mxu0 }
  0xf7   :  { %v1100_v27 = vpop.f32.mrb[0].mxu1  ;;  %v1073_v28 = vpop.f32.mrb[1].mxu0 }
  0xf8   :  { %v1074_v29 = vadd.f32 %v1073_v28, %v1072_v26  ;;  %v1101_v30 = vpop.f32.mrb[1].mxu1  ;;  %v1075_v31 = vpop.f32.mrb[2].mxu0 }
  0xf9   :  { %v1102_v32 = vadd.f32 %v1101_v30, %v1100_v27  ;;  %v1103_v33 = vpop.f32.mrb[2].mxu1  ;;  %v1076_v34 = vpop.f32.mrb[3].mxu0 }
  0xfa   :  { %v1077_v35 = vadd.f32 %v1076_v34, %v1075_v31  ;;  %v1104_v36 = vpop.f32.mrb[3].mxu1 }
  0xfb   :  { %v785_v37 = vadd.f32 %v1102_v32, %v1074_v29  ;;  %v1105_v38 = vadd.f32 %v1104_v36, %v1103_v33 }
  0xfd   :  { %v788_v39 = vadd.f32 %v1105_v38, %v1077_v35 }
  0xfe   :  { %v1078_v40 = vpop.f32.mrb[4].mxu0 }
  0xff   :  { %v1106_v41 = vpop.f32.mrb[4].mxu1  ;;  %v1079_v42 = vpop.f32.mrb[5].mxu0 }
 0x100   :  { %v1107_v43 = vpop.f32.mrb[5].mxu1  ;;  %v1080_v44 = vadd.f32 %v1079_v42, %v1078_v40  ;;  %v1081_v46 = vpop.f32.mrb[6].mxu0 }
 0x101   :  { %v1108_v45 = vadd.f32 %v1107_v43, %v1106_v41  ;;  %v1109_v47 = vpop.f32.mrb[6].mxu1  ;;  %v1082_v48 = vpop.f32.mrb[7].mxu0 }
 0x102   :  { %v1110_v49 = vpop.f32.mrb[7].mxu1  ;;  %v1083_v51 = vadd.f32 %v1082_v48, %v1081_v46 }
 0x103   :  { %v793_v50 = vadd.f32 %v1108_v45, %v1080_v44  ;;  %v1111_v52 = vadd.f32 %v1110_v49, %v1109_v47 }
 0x105   :  { %v796_v53 = vadd.f32 %v1111_v52, %v1083_v51 }
 0x116   :  { %v1128_v54 = vpop.f32.mrb[8].mxu0 }
 0x117   :  { %v1129_v55 = vpop.f32.mrb[9].mxu0  ;;  %v1156_v58 = vpop.f32.mrb[8].mxu1 }
 0x118   :  { %v1130_v56 = vadd.f32 %v1129_v55, %v1128_v54  ;;  %v1131_v57 = vpop.f32.mrb[10].mxu0  ;;  %v1157_v62 = vpop.f32.mrb[9].mxu1 }
 0x119   :  { %v1132_v59 = vpop.f32.mrb[11].mxu0  ;;  %v1158_v63 = vadd.f32 %v1157_v62, %v1156_v58  ;;  %v1159_v0 = vpop.f32.mrb[10].mxu1 }
 0x11a   :  { %v834_v60 = vadd.f32 %v1130_v56, %v785_v37  ;;  %v1133_v61 = vadd.f32 %v1132_v59, %v1131_v57  ;;  %v1160_v2 = vpop.f32.mrb[11].mxu1 }
 0x11b   :  { %v1161_v3 = vadd.f32 %v1160_v2, %v1159_v0 }
 0x11c   :  { %v837_v1 = vadd.f32 %v1133_v61, %v788_v39  ;;  %v883_v4 = vadd.f32 %v1158_v63, %v834_v60 }
 0x11e   :  { %v1134_v5 = vpop.f32.mrb[12].mxu0  ;;  %v886_v7 = vadd.f32 %v1161_v3, %v837_v1 }
 0x11f   :  { %v1135_v6 = vpop.f32.mrb[13].mxu0  ;;  %v1162_v10 = vpop.f32.mrb[12].mxu1 }
 0x120   :  { %v1136_v8 = vadd.f32 %v1135_v6, %v1134_v5  ;;  %v1137_v9 = vpop.f32.mrb[14].mxu0  ;;  %v1163_v14 = vpop.f32.mrb[13].mxu1 }
 0x121   :  { %v1138_v11 = vpop.f32.mrb[15].mxu0  ;;  %v1164_v15 = vadd.f32 %v1163_v14, %v1162_v10  ;;  %v1165_v16 = vpop.f32.mrb[14].mxu1 }
 0x122   :  { %v842_v12 = vadd.f32 %v1136_v8, %v793_v50  ;;  %v1139_v13 = vadd.f32 %v1138_v11, %v1137_v9  ;;  %v1166_v18 = vpop.f32.mrb[15].mxu1 }
 0x123   :  { %v1167_v19 = vadd.f32 %v1166_v18, %v1165_v16 }
 0x124   :  { %v845_v17 = vadd.f32 %v1139_v13, %v796_v53  ;;  %v891_v20 = vadd.f32 %v1164_v15, %v842_v12 }
 0x126   :  { %v894_v21 = vadd.f32 %v1167_v19, %v845_v17 }
 0x136   :  { %v1196_v22 = vpop.f32.mrb[16].mxu0 }
 0x137   :  { %v940_v23 = vadd.f32 %v1196_v22, %v891_v20  ;;  %v931_v24 = vpop.f32.mrb[17].mxu0 }
 0x138   :  { %v932_v25 = vadd.f32 %v931_v24, %v883_v4  ;;  %v1197_v26 = vpop.f32.mrb[18].mxu0 }
 0x139   :  { %948 = vst [vmem:[#allocation2 + $0x10] sm:$0xff] %v940_v23  ;;  %v943_v27 = vadd.f32 %v1197_v26, %v894_v21  ;;  %v934_v28 = vpop.f32.mrb[19].mxu0 }
 0x13a   :  { %946 = vst [vmem:[#allocation2] sm:$0xff] %v932_v25  ;;  %v935_v29 = vadd.f32 %v934_v28, %v886_v7 }
 0x13b   :  { %949 = vst [vmem:[#allocation2 + $0x18] sm:$0xff] %v943_v27 }
 0x13c   :  { %947 = vst [vmem:[#allocation2 + $0x8] sm:$0xff] %v935_v29 }
 0x13d   :  { %1310 = shalt.err (!%p1307_p4)
}
 0x13e   :  { %s1311_s24 = scalar_lea.hbm %s1625_s2, 512 }
 0x13f   :  { %p1312_p5 = scmp.ne.s32.totalorder %s1625_s2, %s1311_s24  ;;  %p1315_p6 = scmp.lt.u32.totalorder %s1311_s24, %s1625_s2 }
 0x141   :  { %p1317_p7 = pnand %p1315_p6, %p1312_p5 }
 0x143   :  { %1320 = shalt.err (!%p1317_p7)
}
 0x144   :  { %s1324_s29 = smov 128   ;;  %s1325_s30 = smov 8  }
 0x145   :  { %961 = dma.vmem_to_hbm [thread:$0]  %s956_s1, 512, %s1625_s2, [#allocation3], %s1324_s29, %s1324_s29, %s1325_s30  }
 0x146   :  { %1321 = dma.done.wait [#allocation3], 512  }
 0x147   :  { %1322 = vsyncadd [#allocation3], 4294966784 }
 0x148   :  { %965 = vsyncpa [#allocation3], 1 }

</bundles_post_ra>
